<compile_context>
chip_gen: v7x
topology: tpu7x:2x2x1
jax: 0.10.0
libtpu: 0.0.40
codegen_flags: <defaults>
</compile_context>

<pallas_src>
from functools import partial

import jax
import jax.numpy as jnp
from jax.experimental import pallas as pl
from jax.experimental.pallas import tpu as pltpu

EPS = 1e-5


def _conv3x3_bn_relu(buf_ref, w_ref, s_ref, t_ref, not_left, not_right,
                     W, M, Cin, use_im2col):
    """3x3 'same' conv + folded BN + ReLU from a flat tap buffer.

    buf_ref: (rows, Cin) bf16; conv input data lives at row offset 1, so the
    tap (kh, kw) of flattened output pixel m is the single contiguous slice
    starting at buffer row m + kh*W + kw (no per-tap compaction copies).
    w_ref: (9*Cin, Cout) bf16, row = (kh*3 + kw)*Cin + cin.
    Returns (M, Cout) f32.
    """
    def tap(kh, kw):
        p = buf_ref[pl.ds(kh * W + kw, M), :]
        # Flat-buffer taps wrap around the image's left/right borders (and, at
        # the extreme corners, touch the two uninitialized slack rows of the
        # buffer); those positions are exactly the masked ones below, and
        # jnp.where lowers to a select, so garbage there never propagates.
        if kw == 0:
            p = jnp.where(not_left, p, 0.0)     # left border
        elif kw == 2:
            p = jnp.where(not_right, p, 0.0)    # right border
        return p

    if use_im2col:
        # Small C: one big-K matmul on an (M, 9*C) im2col slab fills the MXU.
        im2col = jnp.concatenate(
            [tap(kh, kw) for kh in range(3) for kw in range(3)], axis=-1)
        acc = jnp.dot(im2col, w_ref[...], preferred_element_type=jnp.float32)
    else:
        # Large C (>= 128): skip the materialized im2col slab -- nine
        # accumulating K=C matmuls straight from the tap buffer (K=128+ still
        # fills the MXU; saves the slab's VMEM + vst/vld).
        acc = None
        for kh in range(3):
            for kw in range(3):
                wk = w_ref[pl.ds((kh * 3 + kw) * Cin, Cin), :]
                d = jnp.dot(tap(kh, kw), wk, preferred_element_type=jnp.float32)
                acc = d if acc is None else acc + d

    return jnp.maximum(acc * s_ref[...] + t_ref[...], 0.0)


def down_kernel(x_ref, w1_ref, s1_ref, t1_ref, w2_ref, s2_ref, t2_ref,
                o_ref, buf1_ref, buf2_ref, *, W, TH, C1, C2,
                im2col_1, im2col_2):
    M0 = (TH + 4) * W      # pooled rows in this tile (2-row halo each side)
    M1 = (TH + 2) * W      # conv1 output rows (1-row halo each side)
    M2 = TH * W            # conv2 / final output rows for this tile

    th = pl.program_id(1)
    last = pl.num_programs(1) - 1

    # Left/right image-border masks (flattened pixel index % W).
    col1 = jax.lax.broadcasted_iota(jnp.int32, (M1, 1), 0) % W
    col2 = jax.lax.broadcasted_iota(jnp.int32, (M2, 1), 0) % W

    # ---- Conv1 3x3 pad=1 + folded BN + ReLU (recomputed on the halo rows) --
    # Tile data at row offset 1; rows 0 and M0+1 are never written -- every
    # read landing there is border-masked inside _conv3x3_bn_relu.
    buf1_ref[pl.ds(1, M0), :] = x_ref[0, 0]
    y1 = _conv3x3_bn_relu(buf1_ref, w1_ref, s1_ref, t1_ref,
                          col1 != 0, col1 != W - 1, W, M1, C1, im2col_1)

    # ---- Conv2 input: y1 (bf16) with out-of-image halo rows zeroed ---------
    buf2_ref[pl.ds(1, M1), :] = y1.astype(buf2_ref.dtype)
    zrow = jnp.zeros((W, C2), buf2_ref.dtype)

    @pl.when(th == 0)
    def _():  # y1 halo row above the image -> conv2's zero padding
        buf2_ref[pl.ds(1, W), :] = zrow

    @pl.when(th == last)
    def _():  # y1 halo row below the image -> conv2's zero padding
        buf2_ref[pl.ds(1 + M1 - W, W), :] = zrow

    # ---- Conv2 3x3 pad=1 + folded BN + ReLU --------------------------------
    y2 = _conv3x3_bn_relu(buf2_ref, w2_ref, s2_ref, t2_ref,
                          col2 != 0, col2 != W - 1, W, M2, C2, im2col_2)
    o_ref[0] = y2


def _pick_tile_rows(H, W, Cmax, target_bytes=2 << 20):
    """Largest divisor of H whose (TH+4)*W*Cmax bf16 tile stays ~<= 2 MiB and
    keeps the output block (TH*W) a multiple of 8 sublanes."""
    divs = [d for d in range(1, H + 1)
            if H % d == 0 and ((d * W) % 8 == 0 or d == H)]
    fitting = [d for d in divs if (d + 4) * W * Cmax * 2 <= target_bytes]
    return max(fitting) if fitting else min(divs)


def down_forward(x, params, tile_rows=None):
    """x: (N, Cin, H2, W2) NCHW float32 -> (N, Cout, H2//2, W2//2) NCHW."""
    (w1, b1, g1, be1, m1, v1, w2, b2, g2, be2, m2, v2) = params
    N, Cin, H2, W2 = x.shape
    H, W = H2 // 2, W2 // 2
    HW = H * W
    Cout = w1.shape[0]

    TH = tile_rows if tile_rows is not None else _pick_tile_rows(H, W, max(Cin, Cout))
    if H % TH != 0 or ((TH * W) % 8 != 0 and TH != H):
        raise ValueError(f"invalid tile_rows={TH} for H={H}, W={W}")
    NT = H // TH
    THP = TH + 4
    M0, M1, M2 = THP * W, (TH + 2) * W, TH * W

    im2col_1 = Cin < 128
    im2col_2 = Cout < 128

    # glue: NCHW -> NHWC with the 2x2 max-pool fused into the same pass, then
    # cast to bf16 (the MXU operands are bf16 anyway) -> the kernel reads 1x
    # pooled bf16 bytes instead of 4x f32 window slabs.
    xh = jnp.transpose(x, (0, 2, 3, 1)).reshape(N, H, 2, W, 2, Cin)
    pooled = jnp.max(xh, axis=(2, 4)).astype(jnp.bfloat16)        # (N,H,W,Cin)

    # glue: 2 zero halo rows top/bottom, then overlapping spatial tiles of
    # TH+4 rows (conv1 is recomputed on the halo rows).  The 4/TH-row HBM
    # duplication is the price for keeping the BlockSpec pipeline fully
    # automatic; a pl.Element overlapping-window spec would avoid it.
    padded = jnp.pad(pooled, ((0, 0), (2, 2), (0, 0), (0, 0)))    # (N,H+4,W,C)
    ridx = jnp.arange(NT)[:, None] * TH + jnp.arange(THP)[None, :]
    xk = padded[:, ridx].reshape(N, NT, M0, Cin)                  # (N,NT,M0,C)

    # glue: fold conv bias + eval-mode BatchNorm into per-channel scale/shift.
    inv1 = g1 / jnp.sqrt(v1 + EPS)
    inv2 = g2 / jnp.sqrt(v2 + EPS)
    s1 = inv1.reshape(1, Cout)
    t1 = (be1 + (b1 - m1) * inv1).reshape(1, Cout)
    s2 = inv2.reshape(1, Cout)
    t2 = (be2 + (b2 - m2) * inv2).reshape(1, Cout)

    # glue: OIHW -> (9*Cin, Cout) bf16; row index = (kh*3+kw)*Cin + cin,
    # matching the kernel's tap ordering.
    w1k = jnp.transpose(w1, (2, 3, 1, 0)).reshape(9 * Cin, Cout).astype(jnp.bfloat16)
    w2k = jnp.transpose(w2, (2, 3, 1, 0)).reshape(9 * Cout, Cout).astype(jnp.bfloat16)

    # Per-step VMEM budget (double-buffered tiles + single-buffered weights +
    # scratch + f32 intermediates).  Cap at 64 MiB so the config also fits a
    # v7x TensorCore; the 32 MiB floor raises v5e's 16 MiB default.
    need = (2 * M0 * Cin * 2                     # input tile (bf16, 2 bufs)
            + 2 * M2 * Cout * 4                  # output tile (f32, 2 bufs)
            + (9 * Cin * Cout + 9 * Cout * Cout) * 2 + 4 * Cout * 4
            + (M0 + 2) * Cin * 2 + (M1 + 2) * Cout * 2
            + M1 * Cout * 4 + M2 * Cout * 4
            + (M1 * 9 * Cin * 2 if im2col_1 else 0)
            + (M2 * 9 * Cout * 2 if im2col_2 else 0))
    vmem_limit = int(max(32 << 20, min(64 << 20, 2 * need)))

    kernel = partial(down_kernel, W=W, TH=TH, C1=Cin, C2=Cout,
                     im2col_1=im2col_1, im2col_2=im2col_2)

    def build_call(single_buffer_invariants):
        def inv_spec(shape):
            if single_buffer_invariants:
                # Constant index_map -> a second pipeline buffer is wasted VMEM.
                return pl.BlockSpec(shape, lambda n, t: (0, 0),
                                    pipeline_mode=pl.Buffered(1))
            return pl.BlockSpec(shape, lambda n, t: (0, 0))

        return pl.pallas_call(
            kernel,
            out_shape=jax.ShapeDtypeStruct((N, HW, Cout), jnp.float32),
            grid_spec=pltpu.PrefetchScalarGridSpec(
                num_scalar_prefetch=0,
                grid=(N, NT),
                in_specs=[
                    pl.BlockSpec((1, 1, M0, Cin), lambda n, t: (n, t, 0, 0)),
                    inv_spec((9 * Cin, Cout)),
                    inv_spec((1, Cout)),
                    inv_spec((1, Cout)),
                    inv_spec((9 * Cout, Cout)),
                    inv_spec((1, Cout)),
                    inv_spec((1, Cout)),
                ],
                out_specs=pl.BlockSpec((1, M2, Cout), lambda n, t: (n, t, 0)),
                scratch_shapes=[
                    pltpu.VMEM((M0 + 2, Cin), jnp.bfloat16),
                    pltpu.VMEM((M1 + 2, Cout), jnp.bfloat16),
                ],
            ),
            # Every (batch, tile) step is fully independent -> shard across
            # TensorCores on megacore / v7x parts.
            compiler_params=pltpu.CompilerParams(
                dimension_semantics=("parallel", "parallel"),
                vmem_limit_bytes=vmem_limit),
        )

    args = (xk, w1k, s1, t1, w2k, s2, t2)
    try:
        out = jax.block_until_ready(build_call(True)(*args))
    except Exception:
        # pipeline_mode=pl.Buffered(1) not supported on this jax/backend ->
        # fall back to default double-buffered invariants.
        out = build_call(False)(*args)

    # glue: (N, HW, Cout) -> NCHW
    return jnp.transpose(out.reshape(N, H, W, Cout), (0, 3, 1, 2))


def down_reference(x, params):
    """Pure-JAX f32 reference matching the PyTorch module (eval-mode BN)."""
    (w1, b1, g1, be1, m1, v1, w2, b2, g2, be2, m2, v2) = params
    p = jax.lax.reduce_window(x, -jnp.inf, jax.lax.max,
                              (1, 1, 2, 2), (1, 1, 2, 2), "VALID")

    def conv_bn_relu(h, w, b, g, be, m, v):
        y = jax.lax.conv_general_dilated(
            h, w, window_strides=(1, 1), padding="SAME",
            dimension_numbers=("NCHW", "OIHW", "NCHW"))
        y = y + b[None, :, None, None]
        y = (y - m[None, :, None, None]) / jnp.sqrt(v[None, :, None, None] + EPS)
        y = y * g[None, :, None, None] + be[None, :, None, None]
        return jnp.maximum(y, 0.0)

    h = conv_bn_relu(p, w1, b1, g1, be1, m1, v1)
    return conv_bn_relu(h, w2, b2, g2, be2, m2, v2)


if __name__ == "__main__":
    N, Cin, Cout, H2 = 2, 4, 8, 16
    key = jax.random.PRNGKey(0)
    ks = jax.random.split(key, 13)

    x = jax.random.normal(ks[0], (N, Cin, H2, H2), jnp.float32)

    w1 = 0.2 * jax.random.normal(ks[1], (Cout, Cin, 3, 3), jnp.float32)
    b1 = 0.1 * jax.random.normal(ks[2], (Cout,), jnp.float32)
    g1 = 1.0 + 0.1 * jax.random.normal(ks[3], (Cout,), jnp.float32)
    be1 = 0.1 * jax.random.normal(ks[4], (Cout,), jnp.float32)
    m1 = 0.1 * jax.random.normal(ks[5], (Cout,), jnp.float32)
    v1 = 1.0 + 0.1 * jax.random.uniform(ks[6], (Cout,), jnp.float32)

    w2 = 0.2 * jax.random.normal(ks[7], (Cout, Cout, 3, 3), jnp.float32)
    b2 = 0.1 * jax.random.normal(ks[8], (Cout,), jnp.float32)
    g2 = 1.0 + 0.1 * jax.random.normal(ks[9], (Cout,), jnp.float32)
    be2 = 0.1 * jax.random.normal(ks[10], (Cout,), jnp.float32)
    m2 = 0.1 * jax.random.normal(ks[11], (Cout,), jnp.float32)
    v2 = 1.0 + 0.1 * jax.random.uniform(ks[12], (Cout,), jnp.float32)

    params = (w1, b1, g1, be1, m1, v1, w2, b2, g2, be2, m2, v2)

    # tile_rows=4 -> 2 spatial tiles per image: exercises the halo recompute
    # and the top/bottom boundary zeroing paths.
    out = down_forward(x, params, tile_rows=4)
    jax.block_until_ready(out)

    assert out.shape == (N, Cout, H2 // 2, H2 // 2), out.shape
    ref = down_reference(x, params)
    err = float(jnp.max(jnp.abs(out - ref)))
    scale = float(jnp.max(jnp.abs(ref))) + 1e-6
    # bf16 MXU operands + bf16 pooled input / tap buffers (f32 accumulation):
    # accept bf16-level error, absolute or relative to the output scale.
    if err < 1.5e-1 or err / scale < 2e-2:
        print("KERNEL_OK")
    else:
        print("MISMATCH max_abs_err=", err, "rel=", err / scale)
</pallas_src>

<mosaic_0001>
module attributes {stable_mosaic.version = 11 : i64} {
  func.func @down_kernel(%arg0: i32, %arg1: i32, %arg2: memref<1x1x64x4xbf16, #tpu.memory_space<vmem>>, %arg3: memref<36x8xbf16, #tpu.memory_space<vmem>>, %arg4: memref<1x8xf32, #tpu.memory_space<vmem>>, %arg5: memref<1x8xf32, #tpu.memory_space<vmem>>, %arg6: memref<72x8xbf16, #tpu.memory_space<vmem>>, %arg7: memref<1x8xf32, #tpu.memory_space<vmem>>, %arg8: memref<1x8xf32, #tpu.memory_space<vmem>>, %arg9: memref<1x32x8xf32, #tpu.memory_space<vmem>>, %arg10: memref<66x4xbf16, #tpu.memory_space<vmem>>, %arg11: memref<50x8xbf16, #tpu.memory_space<vmem>>) attributes {dimension_semantics = [#tpu.dimension_semantics<parallel>, #tpu.dimension_semantics<parallel>], iteration_bounds = array<i64: 2, 2>, scalar_prefetch = 0 : i64, scratch_operands = 2 : i64, tpu.core_type = #tpu.core_type<tc>, window_params = [{transform_indices = @transform_0, window_bounds = array<i64: 1, 1, 64, 4>}, {pipeline_mode = #tpu.pipeline_mode<synchronous>, transform_indices = @transform_1, window_bounds = array<i64: 36, 8>}, {pipeline_mode = #tpu.pipeline_mode<synchronous>, transform_indices = @transform_2, window_bounds = array<i64: 1, 8>}, {pipeline_mode = #tpu.pipeline_mode<synchronous>, transform_indices = @transform_3, window_bounds = array<i64: 1, 8>}, {pipeline_mode = #tpu.pipeline_mode<synchronous>, transform_indices = @transform_4, window_bounds = array<i64: 72, 8>}, {pipeline_mode = #tpu.pipeline_mode<synchronous>, transform_indices = @transform_5, window_bounds = array<i64: 1, 8>}, {pipeline_mode = #tpu.pipeline_mode<synchronous>, transform_indices = @transform_6, window_bounds = array<i64: 1, 8>}, {transform_indices = @transform_7, window_bounds = array<i64: 1, 32, 8>}]} {
    %0 = tpu.iota {dimensions = array<i32: 0>} : vector<48x1xi32>
    %c8_i32 = arith.constant 8 : i32
    %c0_i32 = arith.constant 0 : i32
    %1 = arith.cmpi eq, %c8_i32, %c0_i32 : i32
    %c1_i32 = arith.constant 1 : i32
    %2 = arith.select %1, %c1_i32, %c8_i32 : i32
    %3 = vector.broadcast %2 : i32 to vector<48x1xi32>
    %4 = arith.remsi %0, %3 : vector<48x1xi32>
    %c0_i32_0 = arith.constant 0 : i32
    %5 = vector.broadcast %c0_i32_0 : i32 to vector<48x1xi32>
    %6 = arith.cmpi ne, %4, %5 : vector<48x1xi32>
    %c0_i32_1 = arith.constant 0 : i32
    %7 = vector.broadcast %c0_i32_1 : i32 to vector<48x1xi32>
    %8 = arith.cmpi slt, %4, %7 : vector<48x1xi32>
    %c0_i32_2 = arith.constant 0 : i32
    %9 = arith.cmpi slt, %2, %c0_i32_2 : i32
    %10 = vector.broadcast %9 : i1 to vector<48x1xi1>
    %11 = vector.broadcast %10 : vector<48x1xi1> to vector<48x1xi1>
    %12 = arith.xori %8, %11 : vector<48x1xi1>
    %13 = arith.andi %12, %6 : vector<48x1xi1>
    %14 = vector.broadcast %2 : i32 to vector<48x1xi32>
    %15 = arith.addi %4, %14 : vector<48x1xi32>
    %16 = arith.select %13, %15, %4 : vector<48x1xi1>, vector<48x1xi32>
    %17 = tpu.iota {dimensions = array<i32: 0>} : vector<32x1xi32>
    %c8_i32_3 = arith.constant 8 : i32
    %c0_i32_4 = arith.constant 0 : i32
    %18 = arith.cmpi eq, %c8_i32_3, %c0_i32_4 : i32
    %c1_i32_5 = arith.constant 1 : i32
    %19 = arith.select %18, %c1_i32_5, %c8_i32_3 : i32
    %20 = vector.broadcast %19 : i32 to vector<32x1xi32>
    %21 = arith.remsi %17, %20 : vector<32x1xi32>
    %c0_i32_6 = arith.constant 0 : i32
    %22 = vector.broadcast %c0_i32_6 : i32 to vector<32x1xi32>
    %23 = arith.cmpi ne, %21, %22 : vector<32x1xi32>
    %c0_i32_7 = arith.constant 0 : i32
    %24 = vector.broadcast %c0_i32_7 : i32 to vector<32x1xi32>
    %25 = arith.cmpi slt, %21, %24 : vector<32x1xi32>
    %c0_i32_8 = arith.constant 0 : i32
    %26 = arith.cmpi slt, %19, %c0_i32_8 : i32
    %27 = vector.broadcast %26 : i1 to vector<32x1xi1>
    %28 = vector.broadcast %27 : vector<32x1xi1> to vector<32x1xi1>
    %29 = arith.xori %25, %28 : vector<32x1xi1>
    %30 = arith.andi %29, %23 : vector<32x1xi1>
    %31 = vector.broadcast %19 : i32 to vector<32x1xi32>
    %32 = arith.addi %21, %31 : vector<32x1xi32>
    %33 = arith.select %30, %32, %21 : vector<32x1xi1>, vector<32x1xi32>
    %c0 = arith.constant 0 : index
    %c0_9 = arith.constant 0 : index
    %c0_10 = arith.constant 0 : index
    %c0_11 = arith.constant 0 : index
    %34 = vector.load %arg2[%c0, %c0_9, %c0_10, %c0_11] : memref<1x1x64x4xbf16, #tpu.memory_space<vmem>>, vector<1x1x64x4xbf16>
    %35 = vector.shape_cast %34 : vector<1x1x64x4xbf16> to vector<64x4xbf16>
    %c1 = arith.constant 1 : index
    %c0_12 = arith.constant 0 : index
    %36 = vector.load %arg10[%c1, %c0_12] : memref<66x4xbf16, #tpu.memory_space<vmem>>, vector<64x4xbf16>
    tpu.vector_store %arg10[%c1, %c0_12], %35 {strides = array<i32>} : memref<66x4xbf16, #tpu.memory_space<vmem>>, vector<64x4xbf16>,
    %c0_i32_13 = arith.constant 0 : i32
    %37 = vector.broadcast %c0_i32_13 : i32 to vector<48x1xi32>
    %38 = arith.cmpi ne, %16, %37 : vector<48x1xi32>
    %c7_i32 = arith.constant 7 : i32
    %39 = vector.broadcast %c7_i32 : i32 to vector<48x1xi32>
    %40 = arith.cmpi ne, %16, %39 : vector<48x1xi32>
    %c0_14 = arith.constant 0 : index
    %c0_15 = arith.constant 0 : index
    %41 = vector.load %arg10[%c0_14, %c0_15] : memref<66x4xbf16, #tpu.memory_space<vmem>>, vector<48x4xbf16>
    %cst = arith.constant 0.000000e+00 : f32
    %42 = arith.truncf %cst : f32 to bf16
    %43 = vector.shape_cast %38 : vector<48x1xi1> to vector<48x1xi1>
    %44 = vector.broadcast %43 : vector<48x1xi1> to vector<48x4xi1>
    %45 = vector.broadcast %42 : bf16 to vector<48x4xbf16>
    %46 = arith.select %44, %41, %45 : vector<48x4xi1>, vector<48x4xbf16>
    %c1_16 = arith.constant 1 : index
    %c0_17 = arith.constant 0 : index
    %47 = vector.load %arg10[%c1_16, %c0_17] : memref<66x4xbf16, #tpu.memory_space<vmem>>, vector<48x4xbf16>
    %c2 = arith.constant 2 : index
    %c0_18 = arith.constant 0 : index
    %48 = vector.load %arg10[%c2, %c0_18] : memref<66x4xbf16, #tpu.memory_space<vmem>>, vector<48x4xbf16>
    %cst_19 = arith.constant 0.000000e+00 : f32
    %49 = arith.truncf %cst_19 : f32 to bf16
    %50 = vector.shape_cast %40 : vector<48x1xi1> to vector<48x1xi1>
    %51 = vector.broadcast %50 : vector<48x1xi1> to vector<48x4xi1>
    %52 = vector.broadcast %49 : bf16 to vector<48x4xbf16>
    %53 = arith.select %51, %48, %52 : vector<48x4xi1>, vector<48x4xbf16>
    %c8 = arith.constant 8 : index
    %c0_20 = arith.constant 0 : index
    %54 = vector.load %arg10[%c8, %c0_20] : memref<66x4xbf16, #tpu.memory_space<vmem>>, vector<48x4xbf16>
    %cst_21 = arith.constant 0.000000e+00 : f32
    %55 = arith.truncf %cst_21 : f32 to bf16
    %56 = vector.shape_cast %38 : vector<48x1xi1> to vector<48x1xi1>
    %57 = vector.broadcast %56 : vector<48x1xi1> to vector<48x4xi1>
    %58 = vector.broadcast %55 : bf16 to vector<48x4xbf16>
    %59 = arith.select %57, %54, %58 : vector<48x4xi1>, vector<48x4xbf16>
    %c9 = arith.constant 9 : index
    %c0_22 = arith.constant 0 : index
    %60 = vector.load %arg10[%c9, %c0_22] : memref<66x4xbf16, #tpu.memory_space<vmem>>, vector<48x4xbf16>
    %c10 = arith.constant 10 : index
    %c0_23 = arith.constant 0 : index
    %61 = vector.load %arg10[%c10, %c0_23] : memref<66x4xbf16, #tpu.memory_space<vmem>>, vector<48x4xbf16>
    %cst_24 = arith.constant 0.000000e+00 : f32
    %62 = arith.truncf %cst_24 : f32 to bf16
    %63 = vector.shape_cast %40 : vector<48x1xi1> to vector<48x1xi1>
    %64 = vector.broadcast %63 : vector<48x1xi1> to vector<48x4xi1>
    %65 = vector.broadcast %62 : bf16 to vector<48x4xbf16>
    %66 = arith.select %64, %61, %65 : vector<48x4xi1>, vector<48x4xbf16>
    %c16 = arith.constant 16 : index
    %c0_25 = arith.constant 0 : index
    %67 = vector.load %arg10[%c16, %c0_25] : memref<66x4xbf16, #tpu.memory_space<vmem>>, vector<48x4xbf16>
    %cst_26 = arith.constant 0.000000e+00 : f32
    %68 = arith.truncf %cst_26 : f32 to bf16
    %69 = vector.shape_cast %38 : vector<48x1xi1> to vector<48x1xi1>
    %70 = vector.broadcast %69 : vector<48x1xi1> to vector<48x4xi1>
    %71 = vector.broadcast %68 : bf16 to vector<48x4xbf16>
    %72 = arith.select %70, %67, %71 : vector<48x4xi1>, vector<48x4xbf16>
    %c17 = arith.constant 17 : index
    %c0_27 = arith.constant 0 : index
    %73 = vector.load %arg10[%c17, %c0_27] : memref<66x4xbf16, #tpu.memory_space<vmem>>, vector<48x4xbf16>
    %c18 = arith.constant 18 : index
    %c0_28 = arith.constant 0 : index
    %74 = vector.load %arg10[%c18, %c0_28] : memref<66x4xbf16, #tpu.memory_space<vmem>>, vector<48x4xbf16>
    %cst_29 = arith.constant 0.000000e+00 : f32
    %75 = arith.truncf %cst_29 : f32 to bf16
    %76 = vector.shape_cast %40 : vector<48x1xi1> to vector<48x1xi1>
    %77 = vector.broadcast %76 : vector<48x1xi1> to vector<48x4xi1>
    %78 = vector.broadcast %75 : bf16 to vector<48x4xbf16>
    %79 = arith.select %77, %74, %78 : vector<48x4xi1>, vector<48x4xbf16>
    %80 = tpu.concatenate %46, %47, %53, %59, %60, %66, %72, %73, %79 in 1 : vector<48x4xbf16>, vector<48x4xbf16>, vector<48x4xbf16>, vector<48x4xbf16>, vector<48x4xbf16>, vector<48x4xbf16>, vector<48x4xbf16>, vector<48x4xbf16>, vector<48x4xbf16> -> vector<48x36xbf16>
    %c0_30 = arith.constant 0 : index
    %c0_31 = arith.constant 0 : index
    %81 = vector.load %arg3[%c0_30, %c0_31] : memref<36x8xbf16, #tpu.memory_space<vmem>>, vector<36x8xbf16>
    %cst_32 = arith.constant dense<0.000000e+00> : vector<48x8xf32>
    %82 = tpu.matmul %80, %81, %cst_32 {dimension_numbers = #tpu.dot_dimension_numbers<[1], [0], [0], [1], [0, 0, 1, 1], [], []>} : vector<48x36xbf16>, vector<36x8xbf16>, vector<48x8xf32> -> vector<48x8xf32>
    %c0_33 = arith.constant 0 : index
    %c0_34 = arith.constant 0 : index
    %83 = vector.load %arg4[%c0_33, %c0_34] : memref<1x8xf32, #tpu.memory_space<vmem>>, vector<1x8xf32>
    %84 = vector.broadcast %83 : vector<1x8xf32> to vector<48x8xf32>
    %85 = arith.mulf %82, %84 : vector<48x8xf32>
    %c0_35 = arith.constant 0 : index
    %c0_36 = arith.constant 0 : index
    %86 = vector.load %arg5[%c0_35, %c0_36] : memref<1x8xf32, #tpu.memory_space<vmem>>, vector<1x8xf32>
    %87 = vector.broadcast %86 : vector<1x8xf32> to vector<48x8xf32>
    %88 = arith.addf %85, %87 : vector<48x8xf32>
    %cst_37 = arith.constant 0.000000e+00 : f32
    %89 = vector.broadcast %cst_37 : f32 to vector<48x8xf32>
    %90 = arith.maximumf %88, %89 : vector<48x8xf32>
    %91 = arith.truncf %90 : vector<48x8xf32> to vector<48x8xbf16>
    %c1_38 = arith.constant 1 : index
    %c0_39 = arith.constant 0 : index
    %92 = vector.load %arg11[%c1_38, %c0_39] : memref<50x8xbf16, #tpu.memory_space<vmem>>, vector<48x8xbf16>
    tpu.vector_store %arg11[%c1_38, %c0_39], %91 {strides = array<i32>} : memref<50x8xbf16, #tpu.memory_space<vmem>>, vector<48x8xbf16>,
    %cst_40 = arith.constant 0.000000e+00 : bf16
    %93 = vector.broadcast %cst_40 : bf16 to vector<8x8xbf16>
    %c0_i32_41 = arith.constant 0 : i32
    %94 = arith.cmpi eq, %arg1, %c0_i32_41 : i32
    %95 = arith.extui %94 : i1 to i32
    %c0_i32_42 = arith.constant 0 : i32
    %96 = arith.cmpi ne, %95, %c0_i32_42 : i32
    scf.if %96 {
      %c1_82 = arith.constant 1 : index
      %c0_83 = arith.constant 0 : index
      %157 = vector.load %arg11[%c1_82, %c0_83] : memref<50x8xbf16, #tpu.memory_space<vmem>>, vector<8x8xbf16>
      tpu.vector_store %arg11[%c1_82, %c0_83], %93 {strides = array<i32>} : memref<50x8xbf16, #tpu.memory_space<vmem>>, vector<8x8xbf16>,
    } else {
    }
    %c1_i32_43 = arith.constant 1 : i32
    %97 = arith.cmpi eq, %arg1, %c1_i32_43 : i32
    %98 = arith.extui %97 : i1 to i32
    %c0_i32_44 = arith.constant 0 : i32
    %99 = arith.cmpi ne, %98, %c0_i32_44 : i32
    scf.if %99 {
      %c41 = arith.constant 41 : index
      %c0_82 = arith.constant 0 : index
      %157 = vector.load %arg11[%c41, %c0_82] : memref<50x8xbf16, #tpu.memory_space<vmem>>, vector<8x8xbf16>
      tpu.vector_store %arg11[%c41, %c0_82], %93 {strides = array<i32>} : memref<50x8xbf16, #tpu.memory_space<vmem>>, vector<8x8xbf16>,
    } else {
    }
    %c0_i32_45 = arith.constant 0 : i32
    %100 = vector.broadcast %c0_i32_45 : i32 to vector<32x1xi32>
    %101 = arith.cmpi ne, %33, %100 : vector<32x1xi32>
    %c7_i32_46 = arith.constant 7 : i32
    %102 = vector.broadcast %c7_i32_46 : i32 to vector<32x1xi32>
    %103 = arith.cmpi ne, %33, %102 : vector<32x1xi32>
    %c0_47 = arith.constant 0 : index
    %c0_48 = arith.constant 0 : index
    %104 = vector.load %arg11[%c0_47, %c0_48] : memref<50x8xbf16, #tpu.memory_space<vmem>>, vector<32x8xbf16>
    %cst_49 = arith.constant 0.000000e+00 : f32
    %105 = arith.truncf %cst_49 : f32 to bf16
    %106 = vector.shape_cast %101 : vector<32x1xi1> to vector<32x1xi1>
    %107 = vector.broadcast %106 : vector<32x1xi1> to vector<32x8xi1>
    %108 = vector.broadcast %105 : bf16 to vector<32x8xbf16>
    %109 = arith.select %107, %104, %108 : vector<32x8xi1>, vector<32x8xbf16>
    %c1_50 = arith.constant 1 : index
    %c0_51 = arith.constant 0 : index
    %110 = vector.load %arg11[%c1_50, %c0_51] : memref<50x8xbf16, #tpu.memory_space<vmem>>, vector<32x8xbf16>
    %c2_52 = arith.constant 2 : index
    %c0_53 = arith.constant 0 : index
    %111 = vector.load %arg11[%c2_52, %c0_53] : memref<50x8xbf16, #tpu.memory_space<vmem>>, vector<32x8xbf16>
    %cst_54 = arith.constant 0.000000e+00 : f32
    %112 = arith.truncf %cst_54 : f32 to bf16
    %113 = vector.shape_cast %103 : vector<32x1xi1> to vector<32x1xi1>
    %114 = vector.broadcast %113 : vector<32x1xi1> to vector<32x8xi1>
    %115 = vector.broadcast %112 : bf16 to vector<32x8xbf16>
    %116 = arith.select %114, %111, %115 : vector<32x8xi1>, vector<32x8xbf16>
    %c8_55 = arith.constant 8 : index
    %c0_56 = arith.constant 0 : index
    %117 = vector.load %arg11[%c8_55, %c0_56] : memref<50x8xbf16, #tpu.memory_space<vmem>>, vector<32x8xbf16>
    %cst_57 = arith.constant 0.000000e+00 : f32
    %118 = arith.truncf %cst_57 : f32 to bf16
    %119 = vector.shape_cast %101 : vector<32x1xi1> to vector<32x1xi1>
    %120 = vector.broadcast %119 : vector<32x1xi1> to vector<32x8xi1>
    %121 = vector.broadcast %118 : bf16 to vector<32x8xbf16>
    %122 = arith.select %120, %117, %121 : vector<32x8xi1>, vector<32x8xbf16>
    %c9_58 = arith.constant 9 : index
    %c0_59 = arith.constant 0 : index
    %123 = vector.load %arg11[%c9_58, %c0_59] : memref<50x8xbf16, #tpu.memory_space<vmem>>, vector<32x8xbf16>
    %c10_60 = arith.constant 10 : index
    %c0_61 = arith.constant 0 : index
    %124 = vector.load %arg11[%c10_60, %c0_61] : memref<50x8xbf16, #tpu.memory_space<vmem>>, vector<32x8xbf16>
    %cst_62 = arith.constant 0.000000e+00 : f32
    %125 = arith.truncf %cst_62 : f32 to bf16
    %126 = vector.shape_cast %103 : vector<32x1xi1> to vector<32x1xi1>
    %127 = vector.broadcast %126 : vector<32x1xi1> to vector<32x8xi1>
    %128 = vector.broadcast %125 : bf16 to vector<32x8xbf16>
    %129 = arith.select %127, %124, %128 : vector<32x8xi1>, vector<32x8xbf16>
    %c16_63 = arith.constant 16 : index
    %c0_64 = arith.constant 0 : index
    %130 = vector.load %arg11[%c16_63, %c0_64] : memref<50x8xbf16, #tpu.memory_space<vmem>>, vector<32x8xbf16>
    %cst_65 = arith.constant 0.000000e+00 : f32
    %131 = arith.truncf %cst_65 : f32 to bf16
    %132 = vector.shape_cast %101 : vector<32x1xi1> to vector<32x1xi1>
    %133 = vector.broadcast %132 : vector<32x1xi1> to vector<32x8xi1>
    %134 = vector.broadcast %131 : bf16 to vector<32x8xbf16>
    %135 = arith.select %133, %130, %134 : vector<32x8xi1>, vector<32x8xbf16>
    %c17_66 = arith.constant 17 : index
    %c0_67 = arith.constant 0 : index
    %136 = vector.load %arg11[%c17_66, %c0_67] : memref<50x8xbf16, #tpu.memory_space<vmem>>, vector<32x8xbf16>
    %c18_68 = arith.constant 18 : index
    %c0_69 = arith.constant 0 : index
    %137 = vector.load %arg11[%c18_68, %c0_69] : memref<50x8xbf16, #tpu.memory_space<vmem>>, vector<32x8xbf16>
    %cst_70 = arith.constant 0.000000e+00 : f32
    %138 = arith.truncf %cst_70 : f32 to bf16
    %139 = vector.shape_cast %103 : vector<32x1xi1> to vector<32x1xi1>
    %140 = vector.broadcast %139 : vector<32x1xi1> to vector<32x8xi1>
    %141 = vector.broadcast %138 : bf16 to vector<32x8xbf16>
    %142 = arith.select %140, %137, %141 : vector<32x8xi1>, vector<32x8xbf16>
    %143 = tpu.concatenate %109, %110, %116, %122, %123, %129, %135, %136, %142 in 1 : vector<32x8xbf16>, vector<32x8xbf16>, vector<32x8xbf16>, vector<32x8xbf16>, vector<32x8xbf16>, vector<32x8xbf16>, vector<32x8xbf16>, vector<32x8xbf16>, vector<32x8xbf16> -> vector<32x72xbf16>
    %c0_71 = arith.constant 0 : index
    %c0_72 = arith.constant 0 : index
    %144 = vector.load %arg6[%c0_71, %c0_72] : memref<72x8xbf16, #tpu.memory_space<vmem>>, vector<72x8xbf16>
    %cst_73 = arith.constant dense<0.000000e+00> : vector<32x8xf32>
    %145 = tpu.matmul %143, %144, %cst_73 {dimension_numbers = #tpu.dot_dimension_numbers<[1], [0], [0], [1], [0, 0, 1, 1], [], []>} : vector<32x72xbf16>, vector<72x8xbf16>, vector<32x8xf32> -> vector<32x8xf32>
    %c0_74 = arith.constant 0 : index
    %c0_75 = arith.constant 0 : index
    %146 = vector.load %arg7[%c0_74, %c0_75] : memref<1x8xf32, #tpu.memory_space<vmem>>, vector<1x8xf32>
    %147 = vector.broadcast %146 : vector<1x8xf32> to vector<32x8xf32>
    %148 = arith.mulf %145, %147 : vector<32x8xf32>
    %c0_76 = arith.constant 0 : index
    %c0_77 = arith.constant 0 : index
    %149 = vector.load %arg8[%c0_76, %c0_77] : memref<1x8xf32, #tpu.memory_space<vmem>>, vector<1x8xf32>
    %150 = vector.broadcast %149 : vector<1x8xf32> to vector<32x8xf32>
    %151 = arith.addf %148, %150 : vector<32x8xf32>
    %cst_78 = arith.constant 0.000000e+00 : f32
    %152 = vector.broadcast %cst_78 : f32 to vector<32x8xf32>
    %153 = arith.maximumf %151, %152 : vector<32x8xf32>
    %c0_79 = arith.constant 0 : index
    %c0_80 = arith.constant 0 : index
    %c0_81 = arith.constant 0 : index
    %154 = vector.load %arg9[%c0_79, %c0_80, %c0_81] : memref<1x32x8xf32, #tpu.memory_space<vmem>>, vector<1x32x8xf32>
    %155 = vector.shape_cast %154 : vector<1x32x8xf32> to vector<32x8xf32>
    %156 = vector.shape_cast %153 : vector<32x8xf32> to vector<1x32x8xf32>
    tpu.vector_store %arg9[%c0_79, %c0_80, %c0_81], %156 {strides = array<i32>} : memref<1x32x8xf32, #tpu.memory_space<vmem>>, vector<1x32x8xf32>,
    return
  }
  func.func @transform_0(%arg0: i32, %arg1: i32) -> (i32, i32, i32, i32) {
    %c0_i32 = arith.constant 0 : i32
    %c0_i32_0 = arith.constant 0 : i32
    %c0_i32_1 = arith.constant 0 : i32
    return %arg0, %arg1, %c0_i32, %c0_i32_0 : i32, i32, i32, i32
  }
  func.func @transform_1(%arg0: i32, %arg1: i32) -> (i32, i32) {
    %c0_i32 = arith.constant 0 : i32
    %c0_i32_0 = arith.constant 0 : i32
    %c0_i32_1 = arith.constant 0 : i32
    return %c0_i32, %c0_i32_0 : i32, i32
  }
  func.func @transform_2(%arg0: i32, %arg1: i32) -> (i32, i32) {
    %c0_i32 = arith.constant 0 : i32
    %c0_i32_0 = arith.constant 0 : i32
    %c0_i32_1 = arith.constant 0 : i32
    return %c0_i32, %c0_i32_0 : i32, i32
  }
  func.func @transform_3(%arg0: i32, %arg1: i32) -> (i32, i32) {
    %c0_i32 = arith.constant 0 : i32
    %c0_i32_0 = arith.constant 0 : i32
    %c0_i32_1 = arith.constant 0 : i32
    return %c0_i32, %c0_i32_0 : i32, i32
  }
  func.func @transform_4(%arg0: i32, %arg1: i32) -> (i32, i32) {
    %c0_i32 = arith.constant 0 : i32
    %c0_i32_0 = arith.constant 0 : i32
    %c0_i32_1 = arith.constant 0 : i32
    return %c0_i32, %c0_i32_0 : i32, i32
  }
  func.func @transform_5(%arg0: i32, %arg1: i32) -> (i32, i32) {
    %c0_i32 = arith.constant 0 : i32
    %c0_i32_0 = arith.constant 0 : i32
    %c0_i32_1 = arith.constant 0 : i32
    return %c0_i32, %c0_i32_0 : i32, i32
  }
  func.func @transform_6(%arg0: i32, %arg1: i32) -> (i32, i32) {
    %c0_i32 = arith.constant 0 : i32
    %c0_i32_0 = arith.constant 0 : i32
    %c0_i32_1 = arith.constant 0 : i32
    return %c0_i32, %c0_i32_0 : i32, i32
  }
  func.func @transform_7(%arg0: i32, %arg1: i32) -> (i32, i32, i32) {
    %c0_i32 = arith.constant 0 : i32
    %c0_i32_0 = arith.constant 0 : i32
    return %arg0, %arg1, %c0_i32 : i32, i32, i32
  }
}

module attributes {stable_mosaic.version = 11 : i64} {
  func.func @down_kernel(%arg0: i32, %arg1: i32, %arg2: memref<1x1x64x4xbf16, #tpu.memory_space<vmem>>, %arg3: memref<36x8xbf16, #tpu.memory_space<vmem>>, %arg4: memref<1x8xf32, #tpu.memory_space<vmem>>, %arg5: memref<1x8xf32, #tpu.memory_space<vmem>>, %arg6: memref<72x8xbf16, #tpu.memory_space<vmem>>, %arg7: memref<1x8xf32, #tpu.memory_space<vmem>>, %arg8: memref<1x8xf32, #tpu.memory_space<vmem>>, %arg9: memref<1x32x8xf32, #tpu.memory_space<vmem>>, %arg10: memref<66x4xbf16, #tpu.memory_space<vmem>>, %arg11: memref<50x8xbf16, #tpu.memory_space<vmem>>) attributes {dimension_semantics = [#tpu.dimension_semantics<parallel>, #tpu.dimension_semantics<parallel>], iteration_bounds = array<i64: 2, 2>, scalar_prefetch = 0 : i64, scratch_operands = 2 : i64, tpu.core_type = #tpu.core_type<tc>, window_params = [{transform_indices = @transform_0, window_bounds = array<i64: 1, 1, 64, 4>}, {pipeline_mode = #tpu.pipeline_mode<synchronous>, transform_indices = @transform_1, window_bounds = array<i64: 36, 8>}, {pipeline_mode = #tpu.pipeline_mode<synchronous>, transform_indices = @transform_2, window_bounds = array<i64: 1, 8>}, {pipeline_mode = #tpu.pipeline_mode<synchronous>, transform_indices = @transform_3, window_bounds = array<i64: 1, 8>}, {pipeline_mode = #tpu.pipeline_mode<synchronous>, transform_indices = @transform_4, window_bounds = array<i64: 72, 8>}, {pipeline_mode = #tpu.pipeline_mode<synchronous>, transform_indices = @transform_5, window_bounds = array<i64: 1, 8>}, {pipeline_mode = #tpu.pipeline_mode<synchronous>, transform_indices = @transform_6, window_bounds = array<i64: 1, 8>}, {transform_indices = @transform_7, window_bounds = array<i64: 1, 32, 8>}]} {
    %0 = tpu.iota {dimensions = array<i32: 0>} : vector<48x1xi32>
    %c8_i32 = arith.constant 8 : i32
    %c0_i32 = arith.constant 0 : i32
    %1 = arith.cmpi eq, %c8_i32, %c0_i32 : i32
    %c1_i32 = arith.constant 1 : i32
    %2 = arith.select %1, %c1_i32, %c8_i32 : i32
    %3 = vector.broadcast %2 : i32 to vector<48x1xi32>
    %4 = arith.remsi %0, %3 : vector<48x1xi32>
    %c0_i32_0 = arith.constant 0 : i32
    %5 = vector.broadcast %c0_i32_0 : i32 to vector<48x1xi32>
    %6 = arith.cmpi ne, %4, %5 : vector<48x1xi32>
    %c0_i32_1 = arith.constant 0 : i32
    %7 = vector.broadcast %c0_i32_1 : i32 to vector<48x1xi32>
    %8 = arith.cmpi slt, %4, %7 : vector<48x1xi32>
    %c0_i32_2 = arith.constant 0 : i32
    %9 = arith.cmpi slt, %2, %c0_i32_2 : i32
    %10 = vector.broadcast %9 : i1 to vector<48x1xi1>
    %11 = vector.broadcast %10 : vector<48x1xi1> to vector<48x1xi1>
    %12 = arith.xori %8, %11 : vector<48x1xi1>
    %13 = arith.andi %12, %6 : vector<48x1xi1>
    %14 = vector.broadcast %2 : i32 to vector<48x1xi32>
    %15 = arith.addi %4, %14 : vector<48x1xi32>
    %16 = arith.select %13, %15, %4 : vector<48x1xi1>, vector<48x1xi32>
    %17 = tpu.iota {dimensions = array<i32: 0>} : vector<32x1xi32>
    %c8_i32_3 = arith.constant 8 : i32
    %c0_i32_4 = arith.constant 0 : i32
    %18 = arith.cmpi eq, %c8_i32_3, %c0_i32_4 : i32
    %c1_i32_5 = arith.constant 1 : i32
    %19 = arith.select %18, %c1_i32_5, %c8_i32_3 : i32
    %20 = vector.broadcast %19 : i32 to vector<32x1xi32>
    %21 = arith.remsi %17, %20 : vector<32x1xi32>
    %c0_i32_6 = arith.constant 0 : i32
    %22 = vector.broadcast %c0_i32_6 : i32 to vector<32x1xi32>
    %23 = arith.cmpi ne, %21, %22 : vector<32x1xi32>
    %c0_i32_7 = arith.constant 0 : i32
    %24 = vector.broadcast %c0_i32_7 : i32 to vector<32x1xi32>
    %25 = arith.cmpi slt, %21, %24 : vector<32x1xi32>
    %c0_i32_8 = arith.constant 0 : i32
    %26 = arith.cmpi slt, %19, %c0_i32_8 : i32
    %27 = vector.broadcast %26 : i1 to vector<32x1xi1>
    %28 = vector.broadcast %27 : vector<32x1xi1> to vector<32x1xi1>
    %29 = arith.xori %25, %28 : vector<32x1xi1>
    %30 = arith.andi %29, %23 : vector<32x1xi1>
    %31 = vector.broadcast %19 : i32 to vector<32x1xi32>
    %32 = arith.addi %21, %31 : vector<32x1xi32>
    %33 = arith.select %30, %32, %21 : vector<32x1xi1>, vector<32x1xi32>
    %c0 = arith.constant 0 : index
    %c0_9 = arith.constant 0 : index
    %c0_10 = arith.constant 0 : index
    %c0_11 = arith.constant 0 : index
    %34 = vector.load %arg2[%c0, %c0_9, %c0_10, %c0_11] : memref<1x1x64x4xbf16, #tpu.memory_space<vmem>>, vector<1x1x64x4xbf16>
    %35 = vector.shape_cast %34 : vector<1x1x64x4xbf16> to vector<64x4xbf16>
    %c1 = arith.constant 1 : index
    %c0_12 = arith.constant 0 : index
    %36 = vector.load %arg10[%c1, %c0_12] : memref<66x4xbf16, #tpu.memory_space<vmem>>, vector<64x4xbf16>
    tpu.vector_store %arg10[%c1, %c0_12], %35 {strides = array<i32>} : memref<66x4xbf16, #tpu.memory_space<vmem>>, vector<64x4xbf16>,
    %c0_i32_13 = arith.constant 0 : i32
    %37 = vector.broadcast %c0_i32_13 : i32 to vector<48x1xi32>
    %38 = arith.cmpi ne, %16, %37 : vector<48x1xi32>
    %c7_i32 = arith.constant 7 : i32
    %39 = vector.broadcast %c7_i32 : i32 to vector<48x1xi32>
    %40 = arith.cmpi ne, %16, %39 : vector<48x1xi32>
    %c0_14 = arith.constant 0 : index
    %c0_15 = arith.constant 0 : index
    %41 = vector.load %arg10[%c0_14, %c0_15] : memref<66x4xbf16, #tpu.memory_space<vmem>>, vector<48x4xbf16>
    %cst = arith.constant 0.000000e+00 : f32
    %42 = arith.truncf %cst : f32 to bf16
    %43 = vector.shape_cast %38 : vector<48x1xi1> to vector<48x1xi1>
    %44 = vector.broadcast %43 : vector<48x1xi1> to vector<48x4xi1>
    %45 = vector.broadcast %42 : bf16 to vector<48x4xbf16>
    %46 = arith.select %44, %41, %45 : vector<48x4xi1>, vector<48x4xbf16>
    %c1_16 = arith.constant 1 : index
    %c0_17 = arith.constant 0 : index
    %47 = vector.load %arg10[%c1_16, %c0_17] : memref<66x4xbf16, #tpu.memory_space<vmem>>, vector<48x4xbf16>
    %c2 = arith.constant 2 : index
    %c0_18 = arith.constant 0 : index
    %48 = vector.load %arg10[%c2, %c0_18] : memref<66x4xbf16, #tpu.memory_space<vmem>>, vector<48x4xbf16>
    %cst_19 = arith.constant 0.000000e+00 : f32
    %49 = arith.truncf %cst_19 : f32 to bf16
    %50 = vector.shape_cast %40 : vector<48x1xi1> to vector<48x1xi1>
    %51 = vector.broadcast %50 : vector<48x1xi1> to vector<48x4xi1>
    %52 = vector.broadcast %49 : bf16 to vector<48x4xbf16>
    %53 = arith.select %51, %48, %52 : vector<48x4xi1>, vector<48x4xbf16>
    %c8 = arith.constant 8 : index
    %c0_20 = arith.constant 0 : index
    %54 = vector.load %arg10[%c8, %c0_20] : memref<66x4xbf16, #tpu.memory_space<vmem>>, vector<48x4xbf16>
    %cst_21 = arith.constant 0.000000e+00 : f32
    %55 = arith.truncf %cst_21 : f32 to bf16
    %56 = vector.shape_cast %38 : vector<48x1xi1> to vector<48x1xi1>
    %57 = vector.broadcast %56 : vector<48x1xi1> to vector<48x4xi1>
    %58 = vector.broadcast %55 : bf16 to vector<48x4xbf16>
    %59 = arith.select %57, %54, %58 : vector<48x4xi1>, vector<48x4xbf16>
    %c9 = arith.constant 9 : index
    %c0_22 = arith.constant 0 : index
    %60 = vector.load %arg10[%c9, %c0_22] : memref<66x4xbf16, #tpu.memory_space<vmem>>, vector<48x4xbf16>
    %c10 = arith.constant 10 : index
    %c0_23 = arith.constant 0 : index
    %61 = vector.load %arg10[%c10, %c0_23] : memref<66x4xbf16, #tpu.memory_space<vmem>>, vector<48x4xbf16>
    %cst_24 = arith.constant 0.000000e+00 : f32
    %62 = arith.truncf %cst_24 : f32 to bf16
    %63 = vector.shape_cast %40 : vector<48x1xi1> to vector<48x1xi1>
    %64 = vector.broadcast %63 : vector<48x1xi1> to vector<48x4xi1>
    %65 = vector.broadcast %62 : bf16 to vector<48x4xbf16>
    %66 = arith.select %64, %61, %65 : vector<48x4xi1>, vector<48x4xbf16>
    %c16 = arith.constant 16 : index
    %c0_25 = arith.constant 0 : index
    %67 = vector.load %arg10[%c16, %c0_25] : memref<66x4xbf16, #tpu.memory_space<vmem>>, vector<48x4xbf16>
    %cst_26 = arith.constant 0.000000e+00 : f32
    %68 = arith.truncf %cst_26 : f32 to bf16
    %69 = vector.shape_cast %38 : vector<48x1xi1> to vector<48x1xi1>
    %70 = vector.broadcast %69 : vector<48x1xi1> to vector<48x4xi1>
    %71 = vector.broadcast %68 : bf16 to vector<48x4xbf16>
    %72 = arith.select %70, %67, %71 : vector<48x4xi1>, vector<48x4xbf16>
    %c17 = arith.constant 17 : index
    %c0_27 = arith.constant 0 : index
    %73 = vector.load %arg10[%c17, %c0_27] : memref<66x4xbf16, #tpu.memory_space<vmem>>, vector<48x4xbf16>
    %c18 = arith.constant 18 : index
    %c0_28 = arith.constant 0 : index
    %74 = vector.load %arg10[%c18, %c0_28] : memref<66x4xbf16, #tpu.memory_space<vmem>>, vector<48x4xbf16>
    %cst_29 = arith.constant 0.000000e+00 : f32
    %75 = arith.truncf %cst_29 : f32 to bf16
    %76 = vector.shape_cast %40 : vector<48x1xi1> to vector<48x1xi1>
    %77 = vector.broadcast %76 : vector<48x1xi1> to vector<48x4xi1>
    %78 = vector.broadcast %75 : bf16 to vector<48x4xbf16>
    %79 = arith.select %77, %74, %78 : vector<48x4xi1>, vector<48x4xbf16>
    %80 = tpu.concatenate %46, %47, %53, %59, %60, %66, %72, %73, %79 in 1 : vector<48x4xbf16>, vector<48x4xbf16>, vector<48x4xbf16>, vector<48x4xbf16>, vector<48x4xbf16>, vector<48x4xbf16>, vector<48x4xbf16>, vector<48x4xbf16>, vector<48x4xbf16> -> vector<48x36xbf16>
    %c0_30 = arith.constant 0 : index
    %c0_31 = arith.constant 0 : index
    %81 = vector.load %arg3[%c0_30, %c0_31] : memref<36x8xbf16, #tpu.memory_space<vmem>>, vector<36x8xbf16>
    %cst_32 = arith.constant dense<0.000000e+00> : vector<48x8xf32>
    %82 = tpu.matmul %80, %81, %cst_32 {dimension_numbers = #tpu.dot_dimension_numbers<[1], [0], [0], [1], [0, 0, 1, 1], [], []>} : vector<48x36xbf16>, vector<36x8xbf16>, vector<48x8xf32> -> vector<48x8xf32>
    %c0_33 = arith.constant 0 : index
    %c0_34 = arith.constant 0 : index
    %83 = vector.load %arg4[%c0_33, %c0_34] : memref<1x8xf32, #tpu.memory_space<vmem>>, vector<1x8xf32>
    %84 = vector.broadcast %83 : vector<1x8xf32> to vector<48x8xf32>
    %85 = arith.mulf %82, %84 : vector<48x8xf32>
    %c0_35 = arith.constant 0 : index
    %c0_36 = arith.constant 0 : index
    %86 = vector.load %arg5[%c0_35, %c0_36] : memref<1x8xf32, #tpu.memory_space<vmem>>, vector<1x8xf32>
    %87 = vector.broadcast %86 : vector<1x8xf32> to vector<48x8xf32>
    %88 = arith.addf %85, %87 : vector<48x8xf32>
    %cst_37 = arith.constant 0.000000e+00 : f32
    %89 = vector.broadcast %cst_37 : f32 to vector<48x8xf32>
    %90 = arith.maximumf %88, %89 : vector<48x8xf32>
    %91 = arith.truncf %90 : vector<48x8xf32> to vector<48x8xbf16>
    %c1_38 = arith.constant 1 : index
    %c0_39 = arith.constant 0 : index
    %92 = vector.load %arg11[%c1_38, %c0_39] : memref<50x8xbf16, #tpu.memory_space<vmem>>, vector<48x8xbf16>
    tpu.vector_store %arg11[%c1_38, %c0_39], %91 {strides = array<i32>} : memref<50x8xbf16, #tpu.memory_space<vmem>>, vector<48x8xbf16>,
    %cst_40 = arith.constant 0.000000e+00 : bf16
    %93 = vector.broadcast %cst_40 : bf16 to vector<8x8xbf16>
    %c0_i32_41 = arith.constant 0 : i32
    %94 = arith.cmpi eq, %arg1, %c0_i32_41 : i32
    %95 = arith.extui %94 : i1 to i32
    %c0_i32_42 = arith.constant 0 : i32
    %96 = arith.cmpi ne, %95, %c0_i32_42 : i32
    scf.if %96 {
      %c1_82 = arith.constant 1 : index
      %c0_83 = arith.constant 0 : index
      %157 = vector.load %arg11[%c1_82, %c0_83] : memref<50x8xbf16, #tpu.memory_space<vmem>>, vector<8x8xbf16>
      tpu.vector_store %arg11[%c1_82, %c0_83], %93 {strides = array<i32>} : memref<50x8xbf16, #tpu.memory_space<vmem>>, vector<8x8xbf16>,
    } else {
    }
    %c1_i32_43 = arith.constant 1 : i32
    %97 = arith.cmpi eq, %arg1, %c1_i32_43 : i32
    %98 = arith.extui %97 : i1 to i32
    %c0_i32_44 = arith.constant 0 : i32
    %99 = arith.cmpi ne, %98, %c0_i32_44 : i32
    scf.if %99 {
      %c41 = arith.constant 41 : index
      %c0_82 = arith.constant 0 : index
      %157 = vector.load %arg11[%c41, %c0_82] : memref<50x8xbf16, #tpu.memory_space<vmem>>, vector<8x8xbf16>
      tpu.vector_store %arg11[%c41, %c0_82], %93 {strides = array<i32>} : memref<50x8xbf16, #tpu.memory_space<vmem>>, vector<8x8xbf16>,
    } else {
    }
    %c0_i32_45 = arith.constant 0 : i32
    %100 = vector.broadcast %c0_i32_45 : i32 to vector<32x1xi32>
    %101 = arith.cmpi ne, %33, %100 : vector<32x1xi32>
    %c7_i32_46 = arith.constant 7 : i32
    %102 = vector.broadcast %c7_i32_46 : i32 to vector<32x1xi32>
    %103 = arith.cmpi ne, %33, %102 : vector<32x1xi32>
    %c0_47 = arith.constant 0 : index
    %c0_48 = arith.constant 0 : index
    %104 = vector.load %arg11[%c0_47, %c0_48] : memref<50x8xbf16, #tpu.memory_space<vmem>>, vector<32x8xbf16>
    %cst_49 = arith.constant 0.000000e+00 : f32
    %105 = arith.truncf %cst_49 : f32 to bf16
    %106 = vector.shape_cast %101 : vector<32x1xi1> to vector<32x1xi1>
    %107 = vector.broadcast %106 : vector<32x1xi1> to vector<32x8xi1>
    %108 = vector.broadcast %105 : bf16 to vector<32x8xbf16>
    %109 = arith.select %107, %104, %108 : vector<32x8xi1>, vector<32x8xbf16>
    %c1_50 = arith.constant 1 : index
    %c0_51 = arith.constant 0 : index
    %110 = vector.load %arg11[%c1_50, %c0_51] : memref<50x8xbf16, #tpu.memory_space<vmem>>, vector<32x8xbf16>
    %c2_52 = arith.constant 2 : index
    %c0_53 = arith.constant 0 : index
    %111 = vector.load %arg11[%c2_52, %c0_53] : memref<50x8xbf16, #tpu.memory_space<vmem>>, vector<32x8xbf16>
    %cst_54 = arith.constant 0.000000e+00 : f32
    %112 = arith.truncf %cst_54 : f32 to bf16
    %113 = vector.shape_cast %103 : vector<32x1xi1> to vector<32x1xi1>
    %114 = vector.broadcast %113 : vector<32x1xi1> to vector<32x8xi1>
    %115 = vector.broadcast %112 : bf16 to vector<32x8xbf16>
    %116 = arith.select %114, %111, %115 : vector<32x8xi1>, vector<32x8xbf16>
    %c8_55 = arith.constant 8 : index
    %c0_56 = arith.constant 0 : index
    %117 = vector.load %arg11[%c8_55, %c0_56] : memref<50x8xbf16, #tpu.memory_space<vmem>>, vector<32x8xbf16>
    %cst_57 = arith.constant 0.000000e+00 : f32
    %118 = arith.truncf %cst_57 : f32 to bf16
    %119 = vector.shape_cast %101 : vector<32x1xi1> to vector<32x1xi1>
    %120 = vector.broadcast %119 : vector<32x1xi1> to vector<32x8xi1>
    %121 = vector.broadcast %118 : bf16 to vector<32x8xbf16>
    %122 = arith.select %120, %117, %121 : vector<32x8xi1>, vector<32x8xbf16>
    %c9_58 = arith.constant 9 : index
    %c0_59 = arith.constant 0 : index
    %123 = vector.load %arg11[%c9_58, %c0_59] : memref<50x8xbf16, #tpu.memory_space<vmem>>, vector<32x8xbf16>
    %c10_60 = arith.constant 10 : index
    %c0_61 = arith.constant 0 : index
    %124 = vector.load %arg11[%c10_60, %c0_61] : memref<50x8xbf16, #tpu.memory_space<vmem>>, vector<32x8xbf16>
    %cst_62 = arith.constant 0.000000e+00 : f32
    %125 = arith.truncf %cst_62 : f32 to bf16
    %126 = vector.shape_cast %103 : vector<32x1xi1> to vector<32x1xi1>
    %127 = vector.broadcast %126 : vector<32x1xi1> to vector<32x8xi1>
    %128 = vector.broadcast %125 : bf16 to vector<32x8xbf16>
    %129 = arith.select %127, %124, %128 : vector<32x8xi1>, vector<32x8xbf16>
    %c16_63 = arith.constant 16 : index
    %c0_64 = arith.constant 0 : index
    %130 = vector.load %arg11[%c16_63, %c0_64] : memref<50x8xbf16, #tpu.memory_space<vmem>>, vector<32x8xbf16>
    %cst_65 = arith.constant 0.000000e+00 : f32
    %131 = arith.truncf %cst_65 : f32 to bf16
    %132 = vector.shape_cast %101 : vector<32x1xi1> to vector<32x1xi1>
    %133 = vector.broadcast %132 : vector<32x1xi1> to vector<32x8xi1>
    %134 = vector.broadcast %131 : bf16 to vector<32x8xbf16>
    %135 = arith.select %133, %130, %134 : vector<32x8xi1>, vector<32x8xbf16>
    %c17_66 = arith.constant 17 : index
    %c0_67 = arith.constant 0 : index
    %136 = vector.load %arg11[%c17_66, %c0_67] : memref<50x8xbf16, #tpu.memory_space<vmem>>, vector<32x8xbf16>
    %c18_68 = arith.constant 18 : index
    %c0_69 = arith.constant 0 : index
    %137 = vector.load %arg11[%c18_68, %c0_69] : memref<50x8xbf16, #tpu.memory_space<vmem>>, vector<32x8xbf16>
    %cst_70 = arith.constant 0.000000e+00 : f32
    %138 = arith.truncf %cst_70 : f32 to bf16
    %139 = vector.shape_cast %103 : vector<32x1xi1> to vector<32x1xi1>
    %140 = vector.broadcast %139 : vector<32x1xi1> to vector<32x8xi1>
    %141 = vector.broadcast %138 : bf16 to vector<32x8xbf16>
    %142 = arith.select %140, %137, %141 : vector<32x8xi1>, vector<32x8xbf16>
    %143 = tpu.concatenate %109, %110, %116, %122, %123, %129, %135, %136, %142 in 1 : vector<32x8xbf16>, vector<32x8xbf16>, vector<32x8xbf16>, vector<32x8xbf16>, vector<32x8xbf16>, vector<32x8xbf16>, vector<32x8xbf16>, vector<32x8xbf16>, vector<32x8xbf16> -> vector<32x72xbf16>
    %c0_71 = arith.constant 0 : index
    %c0_72 = arith.constant 0 : index
    %144 = vector.load %arg6[%c0_71, %c0_72] : memref<72x8xbf16, #tpu.memory_space<vmem>>, vector<72x8xbf16>
    %cst_73 = arith.constant dense<0.000000e+00> : vector<32x8xf32>
    %145 = tpu.matmul %143, %144, %cst_73 {dimension_numbers = #tpu.dot_dimension_numbers<[1], [0], [0], [1], [0, 0, 1, 1], [], []>} : vector<32x72xbf16>, vector<72x8xbf16>, vector<32x8xf32> -> vector<32x8xf32>
    %c0_74 = arith.constant 0 : index
    %c0_75 = arith.constant 0 : index
    %146 = vector.load %arg7[%c0_74, %c0_75] : memref<1x8xf32, #tpu.memory_space<vmem>>, vector<1x8xf32>
    %147 = vector.broadcast %146 : vector<1x8xf32> to vector<32x8xf32>
    %148 = arith.mulf %145, %147 : vector<32x8xf32>
    %c0_76 = arith.constant 0 : index
    %c0_77 = arith.constant 0 : index
    %149 = vector.load %arg8[%c0_76, %c0_77] : memref<1x8xf32, #tpu.memory_space<vmem>>, vector<1x8xf32>
    %150 = vector.broadcast %149 : vector<1x8xf32> to vector<32x8xf32>
    %151 = arith.addf %148, %150 : vector<32x8xf32>
    %cst_78 = arith.constant 0.000000e+00 : f32
    %152 = vector.broadcast %cst_78 : f32 to vector<32x8xf32>
    %153 = arith.maximumf %151, %152 : vector<32x8xf32>
    %c0_79 = arith.constant 0 : index
    %c0_80 = arith.constant 0 : index
    %c0_81 = arith.constant 0 : index
    %154 = vector.load %arg9[%c0_79, %c0_80, %c0_81] : memref<1x32x8xf32, #tpu.memory_space<vmem>>, vector<1x32x8xf32>
    %155 = vector.shape_cast %154 : vector<1x32x8xf32> to vector<32x8xf32>
    %156 = vector.shape_cast %153 : vector<32x8xf32> to vector<1x32x8xf32>
    tpu.vector_store %arg9[%c0_79, %c0_80, %c0_81], %156 {strides = array<i32>} : memref<1x32x8xf32, #tpu.memory_space<vmem>>, vector<1x32x8xf32>,
    return
  }
  func.func @transform_0(%arg0: i32, %arg1: i32) -> (i32, i32, i32, i32) {
    %c0_i32 = arith.constant 0 : i32
    %c0_i32_0 = arith.constant 0 : i32
    %c0_i32_1 = arith.constant 0 : i32
    return %arg0, %arg1, %c0_i32, %c0_i32_0 : i32, i32, i32, i32
  }
  func.func @transform_1(%arg0: i32, %arg1: i32) -> (i32, i32) {
    %c0_i32 = arith.constant 0 : i32
    %c0_i32_0 = arith.constant 0 : i32
    %c0_i32_1 = arith.constant 0 : i32
    return %c0_i32, %c0_i32_0 : i32, i32
  }
  func.func @transform_2(%arg0: i32, %arg1: i32) -> (i32, i32) {
    %c0_i32 = arith.constant 0 : i32
    %c0_i32_0 = arith.constant 0 : i32
    %c0_i32_1 = arith.constant 0 : i32
    return %c0_i32, %c0_i32_0 : i32, i32
  }
  func.func @transform_3(%arg0: i32, %arg1: i32) -> (i32, i32) {
    %c0_i32 = arith.constant 0 : i32
    %c0_i32_0 = arith.constant 0 : i32
    %c0_i32_1 = arith.constant 0 : i32
    return %c0_i32, %c0_i32_0 : i32, i32
  }
  func.func @transform_4(%arg0: i32, %arg1: i32) -> (i32, i32) {
    %c0_i32 = arith.constant 0 : i32
    %c0_i32_0 = arith.constant 0 : i32
    %c0_i32_1 = arith.constant 0 : i32
    return %c0_i32, %c0_i32_0 : i32, i32
  }
  func.func @transform_5(%arg0: i32, %arg1: i32) -> (i32, i32) {
    %c0_i32 = arith.constant 0 : i32
    %c0_i32_0 = arith.constant 0 : i32
    %c0_i32_1 = arith.constant 0 : i32
    return %c0_i32, %c0_i32_0 : i32, i32
  }
  func.func @transform_6(%arg0: i32, %arg1: i32) -> (i32, i32) {
    %c0_i32 = arith.constant 0 : i32
    %c0_i32_0 = arith.constant 0 : i32
    %c0_i32_1 = arith.constant 0 : i32
    return %c0_i32, %c0_i32_0 : i32, i32
  }
  func.func @transform_7(%arg0: i32, %arg1: i32) -> (i32, i32, i32) {
    %c0_i32 = arith.constant 0 : i32
    %c0_i32_0 = arith.constant 0 : i32
    return %arg0, %arg1, %c0_i32 : i32, i32, i32
  }
}

</mosaic_0001>

<bundles_post_ra>
// kernel: tpu_custom_call.1
= control target key start
LH: loop header
LB: loop body
LE: loop exit
PB: predicated region body
PF: predicated region fallthrough
CT: control target
= control target key end

     0   :  { %s2009_s24 = smov 0   ;;  %s2011_s25 = smov 0   ;;  %s2801_s0 = inlined_call_operand.vmem [shape: bf16[2,2,64,4], index: 0, kind: input, shape index: {}]   ;;  %s2802_s1 = inlined_call_operand.vmem [shape: bf16[36,8], index: 1, kind: input, shape index: {}]   ;;  %s2803_s2 = inlined_call_operand.vmem [shape: f32[1,8], index: 2, kind: input, shape index: {}]   ;;  %s2804_s3 = inlined_call_operand.vmem [shape: f32[1,8], index: 3, kind: input, shape index: {}]   ;;  %s2805_s4 = inlined_call_operand.vmem [shape: bf16[72,8], index: 4, kind: input, shape index: {}]   ;;  %s2806_s5 = inlined_call_operand.vmem [shape: f32[1,8], index: 5, kind: input, shape index: {}]   ;;  %s2807_s6 = inlined_call_operand.vmem [shape: f32[1,8], index: 6, kind: input, shape index: {}]   ;;  %s2808_s7 = inlined_call_operand.vmem [shape: f32[2,64,8], index: 7, kind: output, shape index: {}]  }
   0x1   :  { %s2013_s26 = smov 0   ;;  %s2015_s27 = smov 0  }
   0x2   :  { %s2017_s28 = smov 0  }
   0x3 LB: > { %s26_s29 = sadd.s32 1, %s1944_s26  ;;  %s29_s30 = sadd.s32 1, %s1948_s27  ;;  %s1952_s28 = sphi %s2017_s28, %s17_s28   ;;  %s1948_s27 = sphi %s2015_s27, %s2884_s27   ;;  %s1944_s26 = sphi %s2013_s26, %s2883_s26   ;;  %s1940_s25 = sphi %s2011_s25, %s2882_s25   ;;  %s1936_s24 = sphi %s2009_s24, %s2881_s24  }
   0x4   : > { %p27_p0 = scmp.ge.s32.totalorder %s26_s29, 2  ;;  %p1700_p1 = scmp.ge.s32.totalorder %s1952_s28, 1 }
   0x5   : > { %p257_p2 = scmp.lt.s32.totalorder %s1952_s28, 5 }
   0x6   : > { %s2886_s29 = smov (%p27_p0, %s26_s29), 0  ;;  %s2888_s30 = smov (!%p27_p0, %s29_s30), %s1948_s27 }
   0x7   : > { %p258_p3 = pnand %p1700_p1, %p257_p2  ;;  %p31_p4 = scmp.ge.s32.totalorder %s2888_s30, 2 }
   0x8   : > { %p297_p5 = scmp.lt.s32.totalorder (!%p258_p3), %s1940_s25, 1  ;;  %p299_p6 = scmp.lt.s32.totalorder (!%p258_p3), %s1936_s24, 1  ;;  %v319_v0 = vlaneseq (!%p258_p3)  ;;  %vm2810_vm0 = vsmask.f32 (!%p258_p3), 256  ;;  %vm407_vm1 = vsmask.f32 (!%p258_p3), 4368 }
   0x9   : > { %s2890_s30 = smov (%p31_p4, %s2888_s30), 0  ;;  %261 = sbr.rel (%p258_p3) target bundleno = 828 (0x33c), region = 48 }
   0xa   : > { %s1704_s8 = sshll.u32 (!%p258_p3), %s1936_s24, 2  ;;  %v2045_v1 = vshrl.u32 (!%p258_p3), %v319_v0, 7  ;;  %vm489_vm2 = vcmask (!%p258_p3), 27648   ;;  %vm2809_vm3 = vsmask.f32 (!%p258_p3), 7938  ;;  %vm576_vm4 = vcmask (!%p258_p3), 1040384   ;;  %vm2123_vm13 = vmor (!%p258_p3), %vm2810_vm0, %vm407_vm1 }
   0xb   : > { %p2057_p7 = scmp.lt.s32.totalorder (!%p258_p3), %s1704_s8, 7  ;;  %vm577_vm5 = vcmask (!%p258_p3), 1044484   ;;  %v1954_v31 = vmov (!%p258_p3), 0   ;;  %v492_v49 = vld [vmem:[#allocation2] sm:$0xf] (!%p258_p3)  ;;  %s1960_s12 = smov (!%p258_p3), 4  }
   0xc   : > { %v322_v2 = vadd.s32 (!%p258_p3), 16, %v2045_v1  ;;  %v323_v3 = vadd.s32 (!%p258_p3), 24, %v2045_v1  ;;  %v2052_v4 = vadd.s32 (!%p258_p3), 8, %v2045_v1  ;;  %v330_v5 = vand.u32 (!%p258_p3), 7, %v2045_v1  ;;  %vm2137_vm15 = vmor (!%p258_p3), %vm576_vm4, %vm577_vm5  ;;  %p1752_p8 = scmp.ne.s32.totalorder (!%p258_p3), %s1936_s24, 0 }
   0xd   : > { %v2062_v6 = vadd.s32 (!%p258_p3), 32, %v2045_v1  ;;  %v2065_v7 = vadd.s32 (!%p258_p3), 40, %v2045_v1  ;;  %vm2159_vm5 = vmand (!%p258_p3), %vm489_vm2, %vm2809_vm3  ;;  %vm2812_vm3 = vcmask (!%p258_p3), 1046528  }
   0xe   : > { %v344_v8 = vand.u32 (!%p258_p3), 7, %v322_v2  ;;  %v351_v9 = vand.u32 (!%p258_p3), 7, %v323_v3  ;;  %v337_v10 = vand.u32 (!%p258_p3), 7, %v2052_v4  ;;  %vm2080_vm7 = vcmp.ne.s32.totalorder (!%p258_p3), %v330_v5, 7 }
   0xf   : > { %v358_v13 = vand.u32 (!%p258_p3), 7, %v2062_v6  ;;  %v365_v14 = vand.u32 (!%p258_p3), 7, %v2065_v7  ;;  %vm564_vm1 = vmpackc.low (!%p258_p3), %vm2080_vm7, %vm2080_vm7  ;;  %vm2149_vm4 = vcmp.ne.s32.totalorder (!%p258_p3), %v330_v5, 0 }
  0x10   : > { %s2892_s25 = smov (!%p297_p5, %s1940_s25), 1  ;;  %vm2074_vm6 = vcmp.ne.s32.totalorder %v344_v8, 7  ;;  %s2894_s8 = smov (!%p2057_p7, %s1704_s8), 7  ;;  %vm2092_vm8 = vcmp.ne.s32.totalorder %v351_v9, 7  ;;  %vm2097_vm9 = vcmp.ne.s32.totalorder %v344_v8, 0  ;;  %vm2106_vm11 = vcmp.ne.s32.totalorder %v351_v9, 0 }
  0x11   : > { %s300_s9 = scalar_select %p299_p6, %s1936_s24, 1  ;;  %vm566_vm10 = vmpackc.low %vm2074_vm6, %vm2074_vm6  ;;  %vm2131_vm14 = vcmp.ne.s32.totalorder %v337_v10, 0  ;;  %vm515_vm6 = vcmp.ne.s32.totalorder %v337_v10, 7  ;;  %v570_v60 = vsel %vm564_vm1, 65537, %v1954_v31 }
  0x12   : > { %s1702_s10 = sshll.u32 %s2892_s25, 4  ;;  %s1705_s18 = sshll.u32 %s2892_s25, 3  ;;  %vm567_vm12 = vmpackc.low %vm2092_vm8, %vm2092_vm8  ;;  %v2114_v32 = vsel %vm566_vm10, 65537, %v1954_v31  ;;  %v579_v2 = vrot.slane %v570_v60, 7 }
  0x13   : > { %s1701_s11 = sshll.u32 %s300_s9, 3  ;;  %s312_s19 = sadd.s32 %s1705_s18, %s2894_s8  ;;  %v573_v36 = vsel %vm567_vm12, 65537, %v1954_v31  ;;  %v584_v37 = vrot.slane %v2114_v32, 7  ;;  %vm565_vm8 = vmpackc.low %vm515_vm6, %vm515_vm6 }
  0x14   : > { %s303_s13 = sadd.s32 %s1702_s10, %s1701_s11  ;;  %s1706_s20 = sshll.u32 %s312_s19, 3  ;;  %v587_v42 = vrot.slane %v573_v36, 7  ;;  %v571_v1 = vsel %vm565_vm8, 65537, %v1954_v31  ;;  %v580_v10 = vrot.slane %v579_v2, 4  ;;  %vm2190_vm10 = vmpackc.low %vm2097_vm9, %vm2097_vm9  ;;  %vm2195_vm12 = vcmp.ne.s16.totalorder %v579_v2, 0 }
  0x15   : > { %s1703_s14 = sshll.u32 %s303_s13, 2  ;;  %s2119_s23 = scalar_lea.vmem %s2808_s7, %s1706_s20  ;;  %v586_v46 = vrot.slane %v584_v37, 4  ;;  %v581_v5 = vrot.slane %v571_v1, 7  ;;  %vm2205_vm1 = vmpackc.low %vm2106_vm11, %vm2106_vm11  ;;  %vm2217_vm9 = vcmp.ne.s32.totalorder %v358_v13, 7 }
  0x16   : > { %s2071_s17 = scalar_lea.vmem %s2801_s0, %s1703_s14  ;;  %v2178_v4 = vrot.slane %v587_v42, 4  ;;  %vm2247_vm6 = vmpackc.low %vm2131_vm14, %vm2131_vm14  ;;  %s1955_s25 = smov 12  }
  0x17   : > { %v400_v15 = vld [vmem:[%s2071_s17 + $0x8] sm:$0xf]  ;;  %v401_v16 = vld [vmem:[%s2071_s17 + $0xc] sm:$0xf]  ;;  %v402_v18 = vld [vmem:[%s2071_s17 + $0x10] sm:$0xf]  ;;  %v2172_v62 = vsel %vm2137_vm15, %v586_v46, %v587_v42 }
  0x18   : > { %v427_v19 = vshrl.u32 %v400_v15, 16  ;;  %v430_v20 = vshll.u32 %v400_v15, 16  ;;  %v436_v21 = vshrl.u32 %v401_v16, 16  ;;  %v439_v22 = vshll.u32 %v401_v16, 16  ;;  %v399_v26 = vld [vmem:[%s2071_s17 + $0x4] sm:$0xf]  ;;  %vm2268_vm14 = vmpackc.low %vm2149_vm4, %vm2149_vm4 }
  0x19   : > { %v445_v23 = vshrl.u32 %v402_v18, 16  ;;  %v448_v24 = vshll.u32 %v402_v18, 16  ;;  %v398_v27 = vld [vmem:[%s2071_s17] sm:$0xf]  ;;  %v418_v33 = vshrl.u32 %v399_v26, 16  ;;  %v421_v57 = vshll.u32 %v399_v26, 16  ;;  %vm568_vm4 = vmpackc.low %vm2217_vm9, %vm2217_vm9 }
  0x1a   : > { %v429_v28 = vrot.slane %v427_v19, 7  ;;  %v438_v29 = vrot.slane %v436_v21, 7  ;;  %v410_v38 = vshrl.u32 %v398_v27, 16  ;;  %v413_v52 = vshll.u32 %v398_v27, 16  ;;  %v403_v54 = vld [vmem:[%s2071_s17 + $0x14] sm:$0xf] }
  0x1b   : > { %v2127_v35 = vrot.slane %v445_v23, 7  ;;  %v420_v47 = vrot.slane %v418_v33, 7  ;;  %v404_v3 = vld [vmem:[%s2071_s17 + $0x18] sm:$0xf]  ;;  %vm2813_vm7 = vcmp.ne.s16.totalorder %v2172_v62, 0  ;;  %v454_v12 = vshrl.u32 %v403_v54, 16 }
  0x1c   : > { %v434_v39 = vrot.slane %v429_v28, 4  ;;  %v441_v40 = vor.u32 %v439_v22, %v438_v29  ;;  %v443_v41 = vrot.slane %v438_v29, 4  ;;  %v432_v48 = vor.u32 %v430_v20, %v429_v28  ;;  %v2200_v20 = vld [vmem:[%s2071_s17 + $0x1c] sm:$0xf]  ;;  %s1956_s8 = smov 24   ;;  %s1957_s9 = smov 8  }
  0x1d   : > { %v450_v45 = vor.u32 %v448_v24, %v2127_v35  ;;  %v412_v51 = vrot.slane %v410_v38, 7  ;;  %v425_v56 = vrot.slane %v420_v47, 4  ;;  %v423_v0 = vor.u32 %v421_v57, %v420_v47  ;;  %s1958_s10 = smov 20   ;;  %s1959_s11 = smov 32  }
  0x1e   : > { %v442_v50 = vsel %vm2123_vm13, %v434_v39, %v441_v40  ;;  %v452_v11 = vrot.slane %v2127_v35, 4  ;;  %v583_v16 = vrot.slane %v581_v5, 4  ;;  %v457_v18 = vshll.u32 %v403_v54, 16  ;;  %s1961_s13 = smov 28   ;;  %s1963_s20 = smov 16  }
  0x1f   : > { %v451_v55 = vsel %vm2123_vm13, %v443_v41, %v450_v45  ;;  %498 = vst.msk [vmem:[#allocation2 + $0xc] sm:$0xf] %vm489_vm2, %v442_v50  ;;  %v416_v59 = vrot.slane %v412_v51, 4  ;;  %v415_v61 = vor.u32 %v413_v52, %v412_v51  ;;  %v433_v63 = vsel %vm2123_vm13, %v425_v56, %v432_v48 }
  0x20   : > { %499 = vst.msk [vmem:[#allocation2 + $0x10] sm:$0xf] %vm489_vm2, %v451_v55  ;;  %497 = vst.msk [vmem:[#allocation2 + $0x8] sm:$0xf] %vm489_vm2, %v433_v63  ;;  %v463_v19 = vshrl.u32 %v404_v3, 16  ;;  %v2211_v22 = vsel %vm2137_vm15, %v580_v10, %v581_v5  ;;  %v2213_v23 = vrot.slane %v454_v12, 7  ;;  %v2225_v27 = vsel %vm2137_vm15, %v583_v16, %v584_v37 }
  0x21   : > { %v493_v8 = vsel %vm2159_vm5, %v415_v61, %v492_v49  ;;  %v424_v9 = vsel %vm2123_vm13, %v416_v59, %v423_v0  ;;  %v466_v24 = vshll.u32 %v404_v3, 16  ;;  %vm2815_vm11 = vcmp.ne.s16.totalorder %v2211_v22, 0 }
  0x22   : > { %494 = vst [vmem:[#allocation2] sm:$0xf] %v493_v8  ;;  %496 = vst.msk [vmem:[#allocation2 + $0x4] sm:$0xf] %vm489_vm2, %v424_v9  ;;  %v2228_v28 = vrot.slane %v463_v19, 7  ;;  %vm2232_vm5 = vcmp.ne.s32.totalorder %v365_v14, 7  ;;  %v459_v40 = vor.u32 %v457_v18, %v2213_v23 }
  0x23   : > { %vm2814_vm8 = vcmp.ne.s16.totalorder %v2225_v27, 0  ;;  %v472_v36 = vshrl.u32 %v2200_v20, 16  ;;  %vm569_vm0 = vmpackc.low %vm2232_vm5, %vm2232_vm5  ;;  %v461_v19 = vrot.slane %v2213_v23, 4  ;;  %v574_v29 = vsel %vm568_vm4, 65537, %v1954_v31 }
  0x24   : > { %v460_v57 = vsel %vm2123_vm13, %v452_v11, %v459_v40  ;;  %v468_v58 = vor.u32 %v466_v24, %v2228_v28  ;;  %v590_v40 = vrot.slane %v574_v29, 7  ;;  %vm503_vm5 = vcmask 24576  }
  0x25   : > { %500 = vst.msk [vmem:[#allocation2 + $0x14] sm:$0xf] %vm489_vm2, %v460_v57  ;;  %v2383_v44 = vrot.slane %v472_v36, 7  ;;  %vm2851_vm4 = vsmask.f32 256 }
  0x26   : > { %v2221_v26 = vld [vmem:[#allocation2 + $0xc] sm:$0xf] }
  0x27   : > { %v2236_v30 = vld [vmem:[#allocation2 + $0x10] sm:$0xf]  ;;  %v613_v32 = vsel %vm2190_vm10, %v2221_v26, 0  ;;  %v547_v33 = vsel %vm2205_vm1, %v2221_v26, 0  ;;  %v628_v38 = vsel %vm2247_vm6, %v2221_v26, 0  ;;  %v606_v39 = vsel %vm2813_vm7, %v2221_v26, 0 }
  0x28   : > { %v614_v37 = vsel %vm2205_vm1, %v2236_v30, 0  ;;  %v2263_v42 = vld [vmem:[#allocation2 + $0x8] sm:$0xf]  ;;  %v621_v45 = vsel %vm2814_vm8, %v2221_v26, 0  ;;  %v622_v46 = vsel %vm2813_vm7, %v2236_v30, 0  ;;  %v636_v18 = vsel %vm2815_vm11, %v2221_v26, 0 }
  0x29   : > { %v1719_v41 = vcombine.low %v613_v32, %v614_v37  ;;  %v634_v47 = vld [vmem:[#allocation2 + $0x8] sm:$0xe]  ;;  %v546_v48 = vsel %vm2190_vm10, %v2263_v42, 0  ;;  %v612_v49 = vsel %vm2247_vm6, %v2263_v42, 0  ;;  %v2284_v50 = vld [vmem:[#allocation2] sm:$0xf]  ;;  %v1726_v10 = vcombine.low %v621_v45, %v622_v46 }
  0x2a   : > { %v627_v51 = vsel %vm2268_vm14, %v2263_v42, 0  ;;  %v605_v52 = vsel %vm2814_vm8, %v2263_v42, 0  ;;  %v2293_v53 = vld [vmem:[#allocation2 + $0x4] sm:$0xf]  ;;  %v544_v54 = vsel %vm2268_vm14, %v2284_v50, 0  ;;  %v620_v9 = vsel %vm2815_vm11, %v2263_v42, 0 }
  0x2b   : > { %759 = vrot.lane.b32.xlu0 %v1719_v41, %s1955_s25  ;;  %v551_v55 = vld [vmem:[#allocation2] sm:$0xe]  ;;  %v1715_v56 = vcombine.low %v605_v52, %v606_v39  ;;  %v611_v59 = vsel %vm2268_vm14, %v2293_v53, 0  ;;  %v545_v60 = vsel %vm2247_vm6, %v2293_v53, 0  ;;  %v1729_v61 = vcombine.low %v627_v51, %v628_v38  ;;  %v618_v0 = vld [vmem:[#allocation2 + $0x4] sm:$0xe] }
  0x2c   : > { %v603_v63 = vsel %vm2195_vm12, %v551_v55, 0  ;;  %v1718_v1 = vcombine.low %v611_v59, %v612_v49  ;;  %v604_v2 = vsel %vm2815_vm11, %v2293_v53, 0  ;;  %v619_v5 = vsel %vm2195_vm12, %v618_v0, 0 }
  0x2d   : > { %v2313_v3 = vrot.slane %v1715_v56, 1  ;;  %v1714_v8 = vcombine.low %v603_v63, %v604_v2  ;;  %v635_v11 = vsel %vm2195_vm12, %v634_v47, 0  ;;  %v2331_v12 = vcombine.low %v2284_v50, %v2293_v53 }
  0x2e   : > { %757 = vrot.lane.b32.xlu1 %v1718_v1, %s1955_s25  ;;  %v1725_v16 = vcombine.low %v619_v5, %v620_v9  ;;  %v2337_v25 = vrot.slane %v1726_v10, 1  ;;  %v1734_v32 = vcombine.low %v635_v11, %v636_v18  ;;  %v469_v38 = vsel %vm2123_vm13, %v461_v19, %v468_v58 }
  0x2f   : > { %v729_v24 = vrot.slane %v1714_v8, 1  ;;  %v575_v39 = vsel %vm569_vm0, 65537, %v1954_v31  ;;  %v629_v23 = vsel %vm2190_vm10, %v2236_v30, 0  ;;  %v637_v45 = vsel %vm2814_vm8, %v2236_v30, 0  ;;  %501 = vst.msk [vmem:[#allocation2 + $0x18] sm:$0xf] %vm489_vm2, %v469_v38 }
  0x30   : > { %v823_v37 = vrot.slane %v1725_v16, 1  ;;  %v593_v46 = vrot.slane %v575_v39, 7  ;;  %v2354_v31 = vld [vmem:[#allocation2 + $0x14] sm:$0xf]  ;;  %v900_v47 = vrot.slane %v1734_v32, 1  ;;  %v591_v49 = vsel %vm2137_vm15, %v2178_v4, %v590_v40 }
  0x31   : > { %v731_v41 = vsel %vm2812_vm3, %v729_v24, %v2313_v3  ;;  %v592_v51 = vrot.slane %v590_v40, 4  ;;  %v1711_v52 = vcombine.low %v2263_v42, %v2221_v26  ;;  %v630_v55 = vsel %vm2205_vm1, %v2354_v31, 0 }
  0x32   : > { %851 = vrot.lane.b32.xlu1 %v1729_v61, %s1956_s8  ;;  %736 = vrot.lane.b32.xlu0 %v731_v41, %s1957_s9  ;;  %v825_v56 = vsel %vm2812_vm3, %v823_v37, %v2337_v25  ;;  %v638_v57 = vsel %vm2813_vm7, %v2354_v31, 0  ;;  %vm600_vm0 = vcmp.ne.s16.totalorder %v591_v49, 0  ;;  %v1730_v58 = vcombine.low %v629_v23, %v630_v55 }
  0x33   : > { %v1735_v59 = vcombine.low %v637_v45, %v638_v57  ;;  %v594_v61 = vsel %vm2137_vm15, %v592_v51, %v593_v46  ;;  %v679_v63 = vshll.u32 %v2331_v12, 16  ;;  %v607_v0 = vsel %vm600_vm0, %v2236_v30, 0 }
  0x34   : > { %vm601_vm9 = vcmp.ne.s16.totalorder %v594_v61, 0  ;;  %v677_v5 = vshrl.u32 %v2331_v12, 16  ;;  %v623_v8 = vsel %vm600_vm0, %v2354_v31, 0  ;;  %v470_v10 = vrot.slane %v2228_v28, 4  ;;  %v505_v61 = vld [vmem:[#allocation2 + $0x20] sm:$0x1] }
  0x35   : > { %v2376_v1 = vrot.slane %v1735_v59, 1  ;;  %v608_v2 = vsel %vm601_vm9, %v2354_v31, 0  ;;  %v475_v11 = vshll.u32 %v2200_v20, 16  ;;  %v681_v19 = vrot.slane %v679_v63, 1 }
  0x36   : > { %853 = vrot.lane.b32.xlu1 %v1730_v58, %s1956_s8  ;;  %830 = vrot.lane.b32.xlu0 %v825_v56, %s1958_s10  ;;  %v1716_v9 = vcombine.low %v607_v0, %v608_v2  ;;  %v2391_v18 = vld [vmem:[#allocation2 + $0x18] sm:$0xf]  ;;  %v684_v24 = vshll.u32 %v1711_v52, 16  ;;  %v1712_v12 = vcombine.low %v2236_v30, %v2354_v31  ;;  %v688_v28 = vshrl.u32 %v1711_v52, 16 }
  0x37   : > { %v902_v16 = vsel %vm2812_vm3, %v900_v47, %v2376_v1  ;;  %v624_v36 = vsel %vm601_vm9, %v2391_v18, 0  ;;  %v477_v29 = vor.u32 %v475_v11, %v2383_v44  ;;  %v1721_v40 = vcombine.low %v2293_v53, %v2263_v42  ;;  %v550_v58 = vld [vmem:[#allocation2 + $0x18] sm:$0x1] }
  0x38   : > { %v2397_v32 = vrot.slane %v1716_v9, 1  ;;  %v1727_v20 = vcombine.low %v623_v8, %v624_v36  ;;  %v692_v39 = vshll.u32 %v1712_v12, 16  ;;  %v682_v23 = vor.u32 %v681_v19, %v677_v5 }
  0x39   : > { %v478_v38 = vsel %vm2123_vm13, %v470_v10, %v477_v29  ;;  %v686_v45 = vrot.slane %v684_v24, 1  ;;  %vm2811_vm15 = vsmask.f32 7424  ;;  %v2411_v47 = vrot.slane %v593_v46, 4 }
  0x3a   : > { %907 = vrot.lane.b32.xlu1 %v902_v16, %s1959_s11  ;;  %v733_v37 = vsel %vm2812_vm3, %v2313_v3, %v2397_v32  ;;  %v2408_v41 = vrot.slane %v1727_v20, 1  ;;  %502 = vst.msk [vmem:[#allocation2 + $0x1c] sm:$0xf] %vm489_vm2, %v478_v38  ;;  %v1722_v51 = vcombine.low %v2221_v26, %v2236_v30  ;;  %v694_v55 = vrot.slane %v692_v39, 1 }
  0x3b   : > { %v690_v52 = vor.u32 %v688_v28, %v686_v45  ;;  %v774_v56 = vshll.u32 %v1721_v40, 16  ;;  %v687_v57 = vsel %vm2811_vm15, %v682_v23, %v686_v45  ;;  %vm602_vm2 = vcmp.ne.s16.totalorder %v2411_v47, 0  ;;  %v1900_v26 = vld [vmem:[%s2802_s1 + $0x10] ss:$0 sps:$4 sm:$0x33]  }
  0x3c   : > { %v827_v3 = vsel %vm2812_vm3, %v2337_v25, %v2408_v41  ;;  %v639_v46 = vsel %vm600_vm0, %v2391_v18, 0  ;;  %v779_v59 = vshll.u32 %v1722_v51, 16  ;;  %v772_v0 = vshrl.u32 %v1721_v40, 16  ;;  %vm504_vm0 = vmand %vm503_vm5, %vm2851_vm4 }
  0x3d   : > { %832 = vrot.lane.b32.xlu0 %v827_v3, %s1958_s10  ;;  %v695_v63 = vsel %vm2811_vm15, %v690_v52, %v694_v55  ;;  %v776_v2 = vrot.slane %v774_v56, 1  ;;  %v696_v5 = vshrl.u32 %v1712_v12, 16  ;;  %v609_v9 = vsel %vm602_vm2, %v550_v58, 0  ;;  %v1898_v3 = vld [vmem:[%s2802_s1] sm:$0xff]   ;;  %v1899_v56 = vld [vmem:[%s2802_s1 + $0x8] sm:$0xff]  }
  0x3e   : > { %738 = vrot.lane.b32.xlu1 %v733_v37, %s1957_s9  ;;  %v1713_v10 = vcombine.low %v550_v58, %v550_v58  ;;  %v781_v16 = vrot.slane %v779_v59, 1  ;;  %v2439_v24 = vcombine.low %v2354_v31, %v2391_v18  ;;  %v1717_v29 = vcombine.low %v609_v9, %v609_v9 }
  0x3f   : > { %v777_v36 = vor.u32 %v776_v2, %v772_v0  ;;  %v479_v20 = vrot.slane %v2383_v44, 4  ;;  %v698_v28 = vor.u32 %v696_v5, %v694_v55  ;;  %v783_v23 = vshrl.u32 %v1722_v51, 16 }
  0x40   : > { %v700_v38 = vshll.u32 %v1713_v10, 16  ;;  %v787_v44 = vshll.u32 %v2439_v24, 16  ;;  %vm513_vm5 = vcmp.ne.s32.totalorder %v365_v14, 0  ;;  %v2469_v6 = vcombine.low %v544_v54, %v545_v60 }
  0x41   : > { %704 = vrot.lane.b32.xlu0 %v687_v57, %s1960_s12  ;;  %v2425_v25 = vld [vmem:[#allocation2 + $0x1c] sm:$0xf]  ;;  %v506_v45 = vsel %vm504_vm0, %v479_v20, %v505_v61  ;;  %v1962_v53 = vmov 0.0   ;;  %v2488_v50 = vcombine.low %v546_v48, %v547_v33  ;;  %v785_v54 = vor.u32 %v783_v23, %v781_v16  ;;  %vm2490_vm0 = vmpackc.low %vm513_vm5, %vm513_vm5 }
  0x42   : > { %v640_v8 = vsel %vm601_vm9, %v2425_v25, 0  ;;  %v2434_v49 = vcombine.low %v2391_v18, %v2425_v25  ;;  %v617_v39 = vld [vmem:[#allocation2 + $0x1c] sm:$0x1]  ;;  %vm512_vm9 = vcmp.ne.s32.totalorder %v358_v13, 0  ;;  %507 = vst [vmem:[#allocation2 + $0x20] sm:$0x1] %v506_v45  ;;  %v782_v13 = vsel %vm2811_vm15, %v777_v36, %v781_v16  ;;  %1807 = vmatprep.subr.bf16.mxu0 %v1962_v53 }
  0x43   : > { %v1736_v11 = vcombine.low %v639_v46, %v640_v8  ;;  %v1724_v51 = vcombine.low %v617_v39, %v617_v39  ;;  %v702_v14 = vrot.slane %v700_v38, 1  ;;  %vm2475_vm4 = vmpackc.low %vm512_vm9, %vm512_vm9  ;;  %v625_v55 = vsel %vm602_vm2, %v617_v39, 0  ;;  %1808 = vmatpush3.bf16.msra.mxu0 %v1898_v3 }
  0x44   : > { %v864_v19 = vshll.u32 %v2434_v49, 16  ;;  %v789_v33 = vrot.slane %v787_v44, 1  ;;  %v791_v42 = vshrl.u32 %v2439_v24, 16  ;;  %1809 = vmatprep.subr.bf16.mxu0 %v1962_v53  ;;  %v548_v48 = vsel %vm2475_vm4, %v2236_v30, 0 }
  0x45   : > { %v2443_v12 = vrot.slane %v1736_v11, 1  ;;  %876 = vrot.lane.b32.xlu0 %v695_v63, %s1961_s13  ;;  %v549_v57 = vsel %vm2490_vm0, %v2354_v31, 0  ;;  %v795_v46 = vshll.u32 %v1724_v51, 16  ;;  %vm999_vm9 = vcmask 1041408  }
  0x46   : > { %v2447_v37 = vrot.slane %v864_v19, 1  ;;  %vm1964_vm5 = vmmov 0   ;;  %v2516_v59 = vcombine.low %v548_v48, %v549_v57  ;;  %v615_v30 = vsel %vm2475_vm4, %v2354_v31, 0 }
  0x47   : > { %v904_v40 = vsel %vm2812_vm3, %v2376_v1, %v2443_v12  ;;  %v734_v1 = vrot.slane %v1717_v29, 1  ;;  %1813 = vmatprep.mubr.msk.bf16.mxu0 %vm1964_vm5, %v1962_v53  ;;  %v1728_v0 = vcombine.low %v625_v55, %v625_v55  ;;  %1810 = vmatpush3.bf16.msra.mxu0 %v1899_v56  ;;  %v1001_v8 = vsel %vm999_vm9, %v1900_v26, 0 }
  0x48   : > { %909 = vrot.lane.b32.xlu1 %v904_v40, %s1959_s11  ;;  %v867_v7 = vsel %vm2811_vm15, %v698_v28, %v2447_v37  ;;  %1811 = vmatprep.subr.bf16.mxu0 %v1962_v53  ;;  %v790_v9 = vsel %vm2811_vm15, %v785_v54, %v789_v33  ;;  %v793_v11 = vor.u32 %v791_v42, %v789_v33  ;;  %v797_v31 = vrot.slane %v795_v46, 1 }
  0x49   : > { %706 = vrot.lane.b32.xlu0 %v695_v63, %s1960_s12  ;;  %v735_v58 = vsel %vm2812_vm3, %v2397_v32, %v734_v1  ;;  %v703_v63 = vsel %vm2811_vm15, %v698_v28, %v702_v14  ;;  %v616_v32 = vsel %vm2490_vm0, %v2391_v18, 0  ;;  %v633_v2 = vld [vmem:[#allocation2 + $0x20] sm:$0x1]  ;;  %v828_v16 = vrot.slane %v1728_v0, 1 }
  0x4a   : > { %v1733_v5 = vcombine.low %v633_v2, %v633_v2  ;;  %v1720_v10 = vcombine.low %v615_v30, %v616_v32  ;;  %v868_v19 = vshrl.u32 %v2434_v49, 16  ;;  %v641_v61 = vsel %vm602_vm2, %v633_v2, 0 }
  0x4b   : > { %1812 = vmatpush3.bf16.msra.mxu0 %v1001_v8  ;;  %v798_v36 = vsel %vm2811_vm15, %v793_v11, %v797_v31  ;;  %v631_v29 = vsel %vm2475_vm4, %v2391_v18, 0  ;;  %v632_v20 = vsel %vm2490_vm0, %v2425_v25, 0  ;;  %v1737_v49 = vcombine.low %v641_v61, %v641_v61 }
  0x4c   : > { %799 = vrot.lane.b32.xlu1 %v782_v13, %s1963_s20  ;;  %v872_v24 = vshll.u32 %v1733_v5, 16  ;;  %v829_v47 = vsel %vm2812_vm3, %v2408_v41, %v828_v16  ;;  %v870_v28 = vor.u32 %v868_v19, %v2447_v37  ;;  %v1731_v39 = vcombine.low %v631_v29, %v632_v20 }
  0x4d   : > { %878 = vrot.lane.b32.xlu0 %v867_v7, %s1961_s13  ;;  %v905_v40 = vrot.slane %v1737_v49, 1  ;;  %vm913_vm2 = vcmask 31744   ;;  %vm923_vm4 = vcmask 64512   ;;  %vm930_vm0 = vcmask 97280  }
  0x4e   : > { %v874_v38 = vrot.slane %v872_v24, 1  ;;  %vm937_vm9 = vcmask 130048   ;;  %vm958_vm7 = vcmask 228352   ;;  %vm965_vm8 = vcmask 261120  }
  0x4f   : > { %v906_v18 = vsel %vm2812_vm3, %v2443_v12, %v905_v40  ;;  %vm951_vm3 = vcmask 195584   ;;  %vm992_vm11 = vcmask 293888  }
  0x50   : > { %740 = vrot.lane.b32.xlu1 %v735_v58, %s1957_s9  ;;  %v875_v23 = vsel %vm2811_vm15, %v870_v28, %v874_v38  ;;  %vm944_vm15 = vcmask 162816   ;;  %v1744_v38 = vld [vmem:[%s2803_s2] ss:$0 sm:$0xff] }
  0x51   : > { %708 = vrot.lane.b32.xlu0 %v703_v63, %s1960_s12 }
  0x54   : > { %801 = vrot.lane.b32.xlu1 %v790_v9, %s1963_s20 }
  0x55   : > { %761 = vrot.lane.b32.xlu0 %v1720_v10, %s1955_s25 }
  0x58   : > { %803 = vrot.lane.b32.xlu1 %v798_v36, %s1963_s20 }
  0x59   : > { %834 = vrot.lane.b32.xlu0 %v829_v47, %s1958_s10 }
  0x5c   : > { %855 = vrot.lane.b32.xlu1 %v1731_v39, %s1956_s8 }
  0x5d   : > { %880 = vrot.lane.b32.xlu0 %v875_v23, %s1961_s13 }
  0x60   : > { %911 = vrot.lane.b32.xlu1 %v906_v18, %s1959_s11 }
  0x9d   : > { %v760_v41 = vpop.permute.xlu0 %759 }
  0xa0   : > { %v758_v25 = vpop.permute.xlu1 %757 }
  0xa4   : > { %v852_v37 = vpop.permute.xlu1 %851  ;;  %v737_v45 = vpop.permute.xlu0 %736 }
  0xa8   : > { %v854_v3 = vpop.permute.xlu1 %853  ;;  %v831_v44 = vpop.permute.xlu0 %830 }
  0xac   : > { %v908_v13 = vpop.permute.xlu1 %907 }
  0xaf   : > { %v833_v1 = vpop.permute.xlu0 %832 }
  0xb0   : > { %v739_v7 = vpop.permute.xlu1 %738 }
  0xb3   : > { %v705_v51 = vpop.permute.xlu0 %704 }
  0xb4   : > { %v916_v52 = vsel %vm913_vm2, %v2469_v6, %v705_v51 }
  0xb5   : > { %v925_v12 = vsel %vm923_vm4, %v916_v52, %v737_v45 }
  0xb6   : > { %v932_v56 = vsel %vm930_vm0, %v925_v12, %v758_v25 }
  0xb7   : > { %v877_v14 = vpop.permute.xlu0 %876 }
  0xba   : > { %v910_v54 = vpop.permute.xlu1 %909 }
  0xbb   : > { %v707_v60 = vpop.permute.xlu0 %706 }
  0xbc   : > { %v919_v6 = vsel %vm913_vm2, %v2488_v50, %v707_v60 }
  0xbd   : > { %v927_v46 = vsel %vm923_vm4, %v919_v6, %v739_v7 }
  0xbe   : > { %v800_v55 = vpop.permute.xlu1 %799  ;;  %v934_v0 = vsel %vm930_vm0, %v927_v46, %v760_v41 }
  0xbf   : > { %v939_v26 = vsel %vm937_vm9, %v932_v56, %v800_v55  ;;  %v879_v33 = vpop.permute.xlu0 %878 }
  0xc0   : > { %v946_v42 = vsel %vm944_vm15, %v939_v26, %v831_v44 }
  0xc1   : > { %v953_v48 = vsel %vm951_vm3, %v946_v42, %v852_v37  ;;  %v1172_v42 = vld [vmem:[#allocation3] sm:$0xf] }
  0xc2   : > { %v741_v57 = vpop.permute.xlu1 %740  ;;  %v960_v58 = vsel %vm958_vm7, %v953_v48, %v877_v14 }
  0xc3   : > { %v967_v63 = vsel %vm965_vm8, %v960_v58, %v908_v13  ;;  %v709_v30 = vpop.permute.xlu0 %708 }
  0xc4   : > { %1814 = vmatmul.mubr.msk.bf16.vlgmr.msra.gmra.mrb[0].mxu0 %vm992_vm11, %v967_v63  ;;  %v922_v32 = vsel %vm913_vm2, %v2516_v59, %v709_v30  ;;  %vm2859_vm2 = vsmask.f32 256 }
  0xc5   : > { %1817 = vmatprep.mubr.msk.bf16.mxu0 %vm1964_vm5, %v1962_v53  ;;  %v929_v5 = vsel %vm923_vm4, %v922_v32, %v741_v57 }
  0xc6   : > { %v802_v50 = vpop.permute.xlu1 %801 }
  0xc7   : > { %v941_v2 = vsel %vm937_vm9, %v934_v0, %v802_v50  ;;  %v762_v8 = vpop.permute.xlu0 %761 }
  0xc8   : > { %v948_v9 = vsel %vm944_vm15, %v941_v2, %v833_v1  ;;  %v936_v10 = vsel %vm930_vm0, %v929_v5, %v762_v8 }
  0xc9   : > { %v955_v11 = vsel %vm951_vm3, %v948_v9, %v854_v3 }
  0xca   : > { %v804_v31 = vpop.permute.xlu1 %803  ;;  %v962_v59 = vsel %vm958_vm7, %v955_v11, %v879_v33 }
  0xcb   : > { %v943_v16 = vsel %vm937_vm9, %v936_v10, %v804_v31  ;;  %v969_v19 = vsel %vm965_vm8, %v962_v59, %v910_v54  ;;  %v835_v24 = vpop.permute.xlu0 %834 }
  0xcc   : > { %1818 = vmatmul.mubr.msk.bf16.gmra.mrb[4].mxu0 %vm992_vm11, %v969_v19  ;;  %v950_v61 = vsel %vm944_vm15, %v943_v16, %v835_v24 }
  0xcd   : > { %1821 = vmatprep.mubr.msk.bf16.mxu0 %vm1964_vm5, %v1962_v53  ;;  %v1745_v53 = vld [vmem:[%s2804_s3] ss:$0 sm:$0xff]  ;;  %vm1181_vm5 = vcmask 57344  }
  0xce   : > { %v856_v36 = vpop.permute.xlu1 %855  ;;  %vm2610_vm0 = vmand %vm1181_vm5, %vm2859_vm2 }
  0xcf   : > { %v957_v29 = vsel %vm951_vm3, %v950_v61, %v856_v36  ;;  %v881_v20 = vpop.permute.xlu0 %880 }
  0xd0   : > { %v964_v49 = vsel %vm958_vm7, %v957_v29, %v881_v20  ;;  %vm1170_vm7 = vcmask 60416  }
  0xd2   : > { %v912_v47 = vpop.permute.xlu1 %911 }
  0xd3   : > { %v971_v28 = vsel %vm965_vm8, %v964_v49, %v912_v47 }
  0xd4   : > { %1822 = vmatmul.mubr.msk.bf16.gmra.mrb[8].mxu0 %vm992_vm11, %v971_v28  ;;  %vm2856_vm11 = vsmask.f32 7938 }
  0xd5   : > { %vm2594_vm15 = vmand %vm1170_vm7, %vm2856_vm11 }
 0x197   : > { %v1037_v39 = vpop.f32.mrb[0].mxu0 }
 0x198   : > { %v1067_v40 = vmul.f32 %v1744_v38, %v1037_v39  ;;  %v1815_v23 = vpop.f32.mrb[1].mxu0 }
 0x199   : > { %v1040_v18 = vpop.f32.mrb[2].mxu0 }
 0x19a   : > { %v1080_v41 = vadd.f32 %v1745_v53, %v1067_v40  ;;  %v1068_v25 = vmul.f32 %v1744_v38, %v1040_v18  ;;  %v1816_v37 = vpop.f32.mrb[3].mxu0 }
 0x19c   : > { %v1086_v45 = vmax.f32 %v1080_v41, 0.0  ;;  %v1081_v3 = vadd.f32 %v1745_v53, %v1068_v25 }
 0x19e   : > { %v1788_v44 = vpack.c.bf16 %v1086_v45, %v1086_v45  ;;  %v1087_v13 = vmax.f32 %v1081_v3, 0.0 }
 0x19f   : > { %v1045_v1 = vpop.f32.mrb[4].mxu0 }
 0x1a0   : > { %v1111_v51 = vshrl.u32 %v1788_v44, 16  ;;  %v1789_v7 = vpack.c.bf16 %v1087_v13, %v1087_v13  ;;  %v1069_v14 = vmul.f32 %v1744_v38, %v1045_v1  ;;  %v1819_v52 = vpop.f32.mrb[5].mxu0  ;;  %v1114_v60 = vshll.u32 %v1788_v44, 16 }
 0x1a1   : > { %v1048_v54 = vpop.f32.mrb[6].mxu0 }
 0x1a2   : > { %v1113_v12 = vrot.slane %v1111_v51, 7  ;;  %v1119_v55 = vshrl.u32 %v1789_v7, 16  ;;  %v1082_v56 = vadd.f32 %v1745_v53, %v1069_v14  ;;  %v1820_v26 = vpop.f32.mrb[7].mxu0  ;;  %v1070_v6 = vmul.f32 %v1744_v38, %v1048_v54  ;;  %v1183_v54 = vld [vmem:[#allocation3 + $0x18] sm:$0x1] }
 0x1a3   : > { %v1122_v58 = vshll.u32 %v1789_v7, 16 }
 0x1a4   : > { %v1116_v48 = vor.u32 %v1114_v60, %v1113_v12  ;;  %v1121_v57 = vrot.slane %v1119_v55, 7  ;;  %v1088_v46 = vmax.f32 %v1082_v56, 0.0  ;;  %v1083_v63 = vadd.f32 %v1745_v53, %v1070_v6 }
 0x1a5   : > { %v1117_v30 = vrot.slane %v1113_v12, 4 }
 0x1a6   : > { %v1173_v32 = vsel %vm2594_vm15, %v1116_v48, %v1172_v42  ;;  %v1124_v50 = vor.u32 %v1122_v58, %v1121_v57  ;;  %v1790_v0 = vpack.c.bf16 %v1088_v46, %v1088_v46  ;;  %v1089_v2 = vmax.f32 %v1083_v63, 0.0 }
 0x1a7   : > { %1174 = vst [vmem:[#allocation3] sm:$0xf] %v1173_v32  ;;  %v1053_v5 = vpop.f32.mrb[8].mxu0  ;;  %v1126_v20 = vrot.slane %v1121_v57, 4 }
 0x1a8   : > { %v1125_v8 = vsel %vm2123_vm13, %v1117_v30, %v1124_v50  ;;  %v1128_v9 = vshrl.u32 %v1790_v0, 16  ;;  %v1071_v10 = vmul.f32 %v1744_v38, %v1053_v5  ;;  %v1823_v11 = vpop.f32.mrb[9].mxu0  ;;  %v1791_v31 = vpack.c.bf16 %v1089_v2, %v1089_v2 }
 0x1a9   : > { %1176 = vst.msk [vmem:[#allocation3 + $0x4] sm:$0xf] %vm1170_vm7, %v1125_v8  ;;  %v1056_v59 = vpop.f32.mrb[10].mxu0  ;;  %v1131_v19 = vshll.u32 %v1790_v0, 16 }
 0x1aa   : > { %v1130_v16 = vrot.slane %v1128_v9, 7  ;;  %v1084_v24 = vadd.f32 %v1745_v53, %v1071_v10  ;;  %v1072_v61 = vmul.f32 %v1744_v38, %v1056_v59  ;;  %v1824_v36 = vpop.f32.mrb[11].mxu0  ;;  %v1137_v29 = vshrl.u32 %v1791_v31, 16 }
 0x1ab   : > { %v1140_v40 = vshll.u32 %v1791_v31, 16 }
 0x1ac   : > { %v1133_v49 = vor.u32 %v1131_v19, %v1130_v16  ;;  %v1090_v47 = vmax.f32 %v1084_v24, 0.0  ;;  %v1085_v28 = vadd.f32 %v1745_v53, %v1072_v61  ;;  %v1139_v39 = vrot.slane %v1137_v29, 7 }
 0x1ad   : > { %v1135_v25 = vrot.slane %v1130_v16, 4 }
 0x1ae   : > { %v1134_v23 = vsel %vm2123_vm13, %v1126_v20, %v1133_v49  ;;  %v1792_v18 = vpack.c.bf16 %v1090_v47, %v1090_v47  ;;  %v1091_v41 = vmax.f32 %v1085_v28, 0.0  ;;  %v1142_v37 = vor.u32 %v1140_v40, %v1139_v39  ;;  %v1190_v6 = vld [vmem:[#allocation3] sm:$0xf] (!%p1752_p8) }
 0x1af   : > { %1177 = vst.msk [vmem:[#allocation3 + $0x8] sm:$0xf] %vm1170_vm7, %v1134_v23  ;;  %v1144_v1 = vrot.slane %v1139_v39, 4  ;;  %v1191_v57 = vsel (!%p1752_p8), %vm2594_vm15, 0, %v1190_v6 }
 0x1b0   : > { %v1146_v45 = vshrl.u32 %v1792_v18, 16  ;;  %v1793_v3 = vpack.c.bf16 %v1091_v41, %v1091_v41  ;;  %v1143_v38 = vsel %vm2123_vm13, %v1135_v25, %v1142_v37  ;;  %v1149_v53 = vshll.u32 %v1792_v18, 16  ;;  %v1193_v48 = vld [vmem:[#allocation3 + $0x4] sm:$0x1] (!%p1752_p8)  ;;  %1192 = vst [vmem:[#allocation3] sm:$0xf] (!%p1752_p8), %v1191_v57 }
 0x1b1   : > { %1178 = vst.msk [vmem:[#allocation3 + $0xc] sm:$0xf] %vm1170_vm7, %v1143_v38  ;;  %v1194_v58 = vsel (!%p1752_p8), %vm2610_vm0, 0, %v1193_v48 }
 0x1b2   : > { %v1148_v44 = vrot.slane %v1146_v45, 7  ;;  %v1155_v13 = vshrl.u32 %v1793_v3, 16  ;;  %v1158_v14 = vshll.u32 %v1793_v3, 16  ;;  %1195 = vst [vmem:[#allocation3 + $0x4] sm:$0x1] (!%p1752_p8), %v1194_v58 }
 0x1b3   : > { %1189 = sbr.rel (%p1752_p8) target bundleno = 442 (0x1ba), region = 52 }
 0x1b4   : > { %v1151_v51 = vor.u32 %v1149_v53, %v1148_v44  ;;  %v1157_v7 = vrot.slane %v1155_v13, 7  ;;  %v1153_v60 = vrot.slane %v1148_v44, 4 }
 0x1b6   : > { %v1152_v12 = vsel %vm2123_vm13, %v1144_v1, %v1151_v51  ;;  %v1160_v55 = vor.u32 %v1158_v14, %v1157_v7  ;;  %v1162_v56 = vrot.slane %v1157_v7, 4 }
 0x1b7   : > { %1179 = vst.msk [vmem:[#allocation3 + $0x10] sm:$0xf] %vm1170_vm7, %v1152_v12 }
 0x1b8   : > { %v1161_v26 = vsel %vm2123_vm13, %v1153_v60, %v1160_v55  ;;  %v1184_v42 = vsel %vm2610_vm0, %v1162_v56, %v1183_v54 }
 0x1b9   : > { %1180 = vst.msk [vmem:[#allocation3 + $0x14] sm:$0xf] %vm1170_vm7, %v1161_v26  ;;  %1185 = vst [vmem:[#allocation3 + $0x18] sm:$0x1] %v1184_v42 }
 0x1ba PF: > { %p1753_p9 = scmp.ne.s32.totalorder %s1936_s24, 1 }
 0x1bc   : > { %1199 = sbr.rel (%p1753_p9) target bundleno = 451 (0x1c3), region = 56 }
 0x1c0   : > { %v1200_v34 = vld [vmem:[#allocation3 + $0x14] sm:$0xf] (!%p1753_p9)  ;;  %v1203_v46 = vld [vmem:[#allocation3 + $0x18] sm:$0x1] (!%p1753_p9) }
 0x1c1   : > { %v1201_v63 = vsel (!%p1753_p9), %vm2594_vm15, 0, %v1200_v34  ;;  %v1204_v30 = vsel (!%p1753_p9), %vm2610_vm0, 0, %v1203_v46 }
 0x1c2   : > { %1202 = vst [vmem:[#allocation3 + $0x14] sm:$0xf] (!%p1753_p9), %v1201_v63  ;;  %1205 = vst [vmem:[#allocation3 + $0x18] sm:$0x1] (!%p1753_p9), %v1204_v30 }
 0x1c3 PF: > { %v2632_v32 = vld [vmem:[#allocation3 + $0x4] sm:$0xf]  ;;  %v2634_v50 = vld [vmem:[#allocation3 + $0x8] sm:$0xf]  ;;  %v2636_v0 = vld [vmem:[#allocation3 + $0xc] sm:$0xf] }
 0x1c4   : > { %v1223_v2 = vsel %vm2268_vm14, %v2632_v32, 0  ;;  %v1224_v33 = vsel %vm2247_vm6, %v2634_v50, 0  ;;  %v1215_v5 = vld [vmem:[#allocation3] sm:$0xe]  ;;  %vm2862_vm13 = vcmp.ne.s16.totalorder %v2211_v22, 0  ;;  %vm2863_vm7 = vcmp.ne.s16.totalorder %v2225_v27, 0 }
 0x1c5   : > { %v1218_v8 = vsel %vm2862_vm13, %v2632_v32, 0  ;;  %v1219_v9 = vsel %vm2863_vm7, %v2634_v50, 0  ;;  %v1762_v10 = vcombine.low %v1223_v2, %v1224_v33  ;;  %v1217_v11 = vsel %vm2195_vm12, %v1215_v5, 0  ;;  %v2655_v59 = vld [vmem:[#allocation3] sm:$0xf]  ;;  %v1910_v57 = vld [vmem:[%s2805_s4 + $0x8] sm:$0xff]  }
 0x1c6   : > { %vm2864_vm11 = vcmp.ne.s16.totalorder %v2172_v62, 0  ;;  %v1757_v16 = vcombine.low %v2634_v50, %v2636_v0  ;;  %v1214_v19 = vld [vmem:[#allocation3 + $0x10] sm:$0x1]  ;;  %v1759_v24 = vcombine.low %v1217_v11, %v1218_v8  ;;  %v1756_v36 = vcombine.low %v2655_v59, %v2632_v32  ;;  %v1228_v1 = vld [vmem:[#allocation3 + $0x4] sm:$0xe]  ;;  %v1909_v51 = vld [vmem:[%s2805_s4] sm:$0xff]  }
 0x1c7   : > { %v1220_v31 = vsel %vm2864_vm11, %v2636_v0, 0  ;;  %vm1216_vm15 = vcmp.ne.s16.totalorder %v2178_v4, 0  ;;  %1325 = vrot.lane.b32.xlu0 %v1762_v10, %s1956_s8  ;;  %v1758_v49 = vcombine.low %v1214_v19, %v1214_v19  ;;  %v2665_v18 = vld [vmem:[#allocation3 + $0x10] sm:$0xf]  ;;  %v1225_v45 = vsel %vm2190_vm10, %v2636_v0, 0  ;;  %1825 = vmatprep.subr.bf16.mxu1 %v1909_v51  ;;  %s1966_s19 = smov 48  }
 0x1c8   : > { %v1760_v61 = vcombine.low %v1219_v9, %v1220_v31  ;;  %v1277_v29 = vshll.u32 %v1757_v16, 16  ;;  %v1221_v20 = vsel %vm1216_vm15, %v1214_v19, 0  ;;  %v1281_v47 = vshrl.u32 %v1757_v16, 16  ;;  %1826 = vmatpush3.bf16.msra.mxu1 %v1909_v51  ;;  %v1911_v30 = vld [vmem:[%s2805_s4 + $0x10] sm:$0xff]   ;;  %s1968_s21 = smov 64  }
 0x1c9   : > { %v1306_v28 = vrot.slane %v1759_v24, 1  ;;  %v1270_v40 = vshrl.u32 %v1756_v36, 16  ;;  %v1272_v23 = vshll.u32 %v1756_v36, 16  ;;  %v1761_v25 = vcombine.low %v1221_v20, %v1221_v20  ;;  %v1227_v3 = vld [vmem:[#allocation3 + $0x14] sm:$0x1]  ;;  %1827 = vmatprep.subr.bf16.mxu1 %v1910_v57 }
 0x1ca   : > { %v1307_v39 = vrot.slane %v1760_v61, 1  ;;  %v1279_v41 = vrot.slane %v1277_v29, 1  ;;  %v1285_v37 = vshll.u32 %v1758_v49, 16  ;;  %vm2865_vm5 = vcmask 1046528   ;;  %v1234_v24 = vld [vmem:[#allocation3 + $0x14] sm:$0xf] }
 0x1cb   : > { %v1274_v44 = vrot.slane %v1272_v23, 1  ;;  %v1226_v53 = vsel %vm2205_vm1, %v2665_v18, 0  ;;  %v1764_v13 = vcombine.low %v2632_v32, %v2634_v50  ;;  %v1309_v7 = vrot.slane %v1761_v25, 1  ;;  %vm2866_vm2 = vmmov %vm2865_vm5  ;;  %v1239_v20 = vld [vmem:[#allocation3 + $0x18] sm:$0x1] }
 0x1cc   : > { %v1308_v38 = vsel %vm2865_vm5, %v1306_v28, %v1307_v39  ;;  %v2680_v14 = vor.u32 %v1281_v47, %v1279_v41  ;;  %v1287_v52 = vrot.slane %v1285_v37, 1  ;;  %v1763_v54 = vcombine.low %v1225_v45, %v1226_v53  ;;  %1828 = vmatpush3.bf16.msra.mxu1 %v1910_v57  ;;  %v1912_v49 = vld [vmem:[%s2805_s4 + $0x18] sm:$0xff]  }
 0x1cd   : > { %1311 = vrot.lane.b32.xlu1 %v1308_v38, %s1963_s20  ;;  %v1275_v12 = vor.u32 %v1274_v44, %v1270_v40  ;;  %v1765_v60 = vcombine.low %v2636_v0, %v2665_v18  ;;  %v1337_v55 = vshrl.u32 %v1764_v13, 16  ;;  %v1339_v56 = vshll.u32 %v1764_v13, 16  ;;  %1829 = vmatprep.subr.bf16.mxu1 %v1911_v30 }
 0x1ce   : > { %v1310_v26 = vsel %vm2866_vm2, %v1307_v39, %v1309_v7  ;;  %vm2867_vm0 = vsmask.f32 7424  ;;  %v1766_v6 = vcombine.low %v1227_v3, %v1227_v3  ;;  %v1229_v48 = vsel %vm2195_vm12, %v1228_v1, 0  ;;  %v1240_v39 = vld [vmem:[#allocation3 + $0x8] sm:$0xe] }
 0x1cf   : > { %v1288_v42 = vsel %vm2867_vm0, %v2680_v14, %v1287_v52  ;;  %vm2868_vm13 = vmmov %vm2867_vm0  ;;  %v1341_v34 = vrot.slane %v1339_v56, 1  ;;  %v1344_v46 = vshll.u32 %v1765_v60, 16  ;;  %v1348_v63 = vshrl.u32 %v1765_v60, 16 }
 0x1d0   : > { %v1280_v58 = vsel %vm2868_vm13, %v1275_v12, %v1279_v41  ;;  %v1352_v2 = vshll.u32 %v1766_v6, 16  ;;  %vm2869_vm7 = vcmp.ne.s16.totalorder %v2211_v22, 0  ;;  %vm2870_vm11 = vcmp.ne.s16.totalorder %v2225_v27, 0  ;;  %vm2872_vm2 = vmmov %vm2867_vm0  ;;  %1830 = vmatpush3.bf16.msra.mxu1 %v1911_v30 }
 0x1d1   : > { %1289 = vrot.lane.b32.xlu0 %v1280_v58, %s1957_s9  ;;  %1313 = vrot.lane.b32.xlu1 %v1310_v26, %s1963_s20  ;;  %v1230_v33 = vsel %vm2869_vm7, %v2634_v50, 0  ;;  %v1231_v5 = vsel %vm2870_vm11, %v2636_v0, 0  ;;  %vm2871_vm5 = vcmp.ne.s16.totalorder %v2172_v62, 0  ;;  %v1342_v9 = vor.u32 %v1341_v34, %v1337_v55  ;;  %s1967_s20 = smov 56  }
 0x1d2   : > { %v1232_v8 = vsel %vm2871_vm5, %v2665_v18, 0  ;;  %v1346_v10 = vrot.slane %v1344_v46, 1  ;;  %v1767_v11 = vcombine.low %v1229_v48, %v1230_v33  ;;  %v1354_v16 = vrot.slane %v1352_v2, 1  ;;  %1831 = vmatprep.subr.bf16.mxu1 %v1912_v49 }
 0x1d3   : > { %v1768_v31 = vcombine.low %v1231_v5, %v1232_v8  ;;  %v1233_v19 = vsel %vm1216_vm15, %v1227_v3, 0  ;;  %v1235_v28 = vsel %vm2268_vm14, %v2634_v50, 0  ;;  %v1236_v41 = vsel %vm2247_vm6, %v2636_v0, 0 }
 0x1d4   : > { %v1350_v61 = vor.u32 %v1348_v63, %v1346_v10  ;;  %v1373_v36 = vrot.slane %v1767_v11, 1  ;;  %v1769_v47 = vcombine.low %v1233_v19, %v1233_v19  ;;  %v1347_v40 = vsel %vm2872_vm2, %v1342_v9, %v1346_v10  ;;  %1832 = vmatpush3.bf16.msra.mxu1 %v1912_v49 }
 0x1d5   : > { %v1374_v29 = vrot.slane %v1768_v31, 1  ;;  %1291 = vrot.lane.b32.xlu0 %v1288_v42, %s1957_s9  ;;  %1327 = vrot.lane.b32.xlu1 %v1763_v54, %s1956_s8  ;;  %v1772_v25 = vcombine.low %v2665_v18, %v1234_v24  ;;  %v1237_v45 = vsel %vm2190_vm10, %v2665_v18, 0  ;;  %v1238_v3 = vsel %vm2205_vm1, %v1234_v24, 0 }
 0x1d6   : > { %v1355_v23 = vsel %vm2867_vm0, %v1350_v61, %v1354_v16  ;;  %v1376_v37 = vrot.slane %v1769_v47, 1  ;;  %v1773_v38 = vcombine.low %v1239_v20, %v1239_v20  ;;  %vm2873_vm13 = vcmask 1046528  }
 0x1d7   : > { %v1375_v44 = vsel %vm2873_vm13, %v1373_v36, %v1374_v29  ;;  %v1403_v53 = vshll.u32 %v1772_v25, 16  ;;  %v1241_v13 = vsel %vm2195_vm12, %v1240_v39, 0  ;;  %v1242_v1 = vsel %vm2869_vm7, %v2636_v0, 0  ;;  %vm2874_vm11 = vmmov %vm2873_vm13 }
 0x1d8   : > { %v1377_v51 = vsel %vm2874_vm11, %v1374_v29, %v1376_v37  ;;  %v1407_v7 = vshrl.u32 %v1772_v25, 16  ;;  %vm2875_vm5 = vcmp.ne.s16.totalorder %v2225_v27, 0  ;;  %vm2876_vm2 = vcmp.ne.s16.totalorder %v2172_v62, 0 }
 0x1d9   : > { %1356 = vrot.lane.b32.xlu0 %v1347_v40, %s1959_s11  ;;  %1358 = vrot.lane.b32.xlu1 %v1355_v23, %s1959_s11  ;;  %v1243_v52 = vsel %vm2875_vm5, %v2665_v18, 0  ;;  %v1244_v17 = vsel %vm2876_vm2, %v1234_v24, 0  ;;  %v1405_v54 = vrot.slane %v1403_v53, 1  ;;  %v1411_v12 = vshll.u32 %v1773_v38, 16  ;;  %v1913_v18 = vld [vmem:[%s2805_s4 + $0x20] ss:$0 sps:$4 sm:$0xff]  }
 0x1da   : > { %v1211_v22 = vsel %vm2247_vm6, %v2632_v32, 0  ;;  %v1210_v60 = vsel %vm2268_vm14, %v2655_v59, 0  ;;  %v1245_v55 = vsel %vm1216_vm15, %v1239_v20, 0  ;;  %v1770_v56 = vcombine.low %v1235_v28, %v1236_v41  ;;  %s1965_s11 = smov 40   ;;  %vm2878_vm6 = vmmov %vm2867_vm0  ;;  %v1784_v53 = vld [vmem:[%s2806_s5] ss:$0 sm:$0xff] }
 0x1db   : > { %v1754_v27 = vcombine.low %v1210_v60, %v1211_v22  ;;  %v1212_v62 = vsel %vm2190_vm10, %v2634_v50, 0  ;;  %v1771_v35 = vcombine.low %v1237_v45, %v1238_v3  ;;  %v1774_v43 = vcombine.low %v1241_v13, %v1242_v1  ;;  %vm2877_vm10 = vmmov %vm2867_vm0  ;;  %v1785_v1 = vld [vmem:[%s2807_s6] ss:$0 sm:$0xff] }
 0x1dc   : > { %v1775_v32 = vcombine.low %v1243_v52, %v1244_v17  ;;  %v1213_v4 = vsel %vm2205_vm1, %v2636_v0, 0  ;;  %v1409_v59 = vor.u32 %v1407_v7, %v1405_v54  ;;  %v1413_v26 = vrot.slane %v1411_v12, 1  ;;  %vm2879_vm1 = vmmov %vm2874_vm11 }
 0x1dd   : > { %1378 = vrot.lane.b32.xlu0 %v1375_v44, %s1965_s11  ;;  %1380 = vrot.lane.b32.xlu1 %v1377_v51, %s1965_s11  ;;  %v1776_v42 = vcombine.low %v1245_v55, %v1245_v55  ;;  %v1755_v6 = vcombine.low %v1212_v62, %v1213_v4  ;;  %vm1520_vm12 = vcmask 1043456   ;;  %v1432_v50 = vrot.slane %v1774_v43, 1  ;;  %vm2880_vm14 = vmmov %vm2879_vm1 }
 0x1de   : > { %1839 = vmatprep.subr.msk.bf16.mxu1 %vm1520_vm12, %v1913_v18  ;;  %v1522_v15 = vsel %vm1520_vm12, %v1913_v18, 0  ;;  %v1406_v48 = vsel %vm2877_vm10, %v2680_v14, %v1405_v54  ;;  %v1414_v57 = vsel %vm2878_vm6, %v1409_v59, %v1413_v26  ;;  %v1433_v58 = vrot.slane %v1775_v32, 1 }
 0x1df   : > { %v1435_v34 = vrot.slane %v1776_v42, 1  ;;  %1834 = vmatpush3.bf16.msra.mxu1 %v1522_v15  ;;  %vm1459_vm15 = vcmask 326656   ;;  %vm1464_vm0 = vcmask 392192   ;;  %vm1469_vm13 = vcmask 457728  }
 0x1e0   : > { %v1434_v21 = vsel %vm2879_vm1, %v1432_v50, %v1433_v58  ;;  %vm1474_vm7 = vcmask 523264   ;;  %vm1515_vm11 = vcmask 588800  }
 0x1e1   : > { %1392 = vrot.lane.b32.xlu0 %v1770_v56, %s1966_s19  ;;  %1394 = vrot.lane.b32.xlu1 %v1771_v35, %s1966_s19  ;;  %v1436_v0 = vsel %vm2880_vm14, %v1433_v58, %v1435_v34 }
 0x1e5   : > { %1415 = vrot.lane.b32.xlu0 %v1406_v48, %s1967_s20  ;;  %1417 = vrot.lane.b32.xlu1 %v1414_v57, %s1967_s20 }
 0x1e9   : > { %1437 = vrot.lane.b32.xlu0 %v1434_v21, %s1968_s21  ;;  %1439 = vrot.lane.b32.xlu1 %v1436_v0, %s1968_s21 }
 0x239   : > { %v1326_v46 = vpop.permute.xlu0 %1325 }
 0x23f   : > { %v1312_v63 = vpop.permute.xlu1 %1311 }
 0x243   : > { %v1290_v30 = vpop.permute.xlu0 %1289  ;;  %v1314_v2 = vpop.permute.xlu1 %1313 }
 0x244   : > { %v1443_v11 = vsel %vm923_vm4, %v1754_v27, %v1290_v30 }
 0x245   : > { %v1448_v24 = vsel %vm937_vm9, %v1443_v11, %v1312_v63 }
 0x246   : > { %v1452_v29 = vsel %vm951_vm3, %v1448_v24, %v1326_v46 }
 0x247   : > { %v1292_v14 = vpop.permute.xlu0 %1291  ;;  %v1328_v33 = vpop.permute.xlu1 %1327 }
 0x248   : > { %v1446_v31 = vsel %vm923_vm4, %v1755_v6, %v1292_v14 }
 0x249   : > { %v1450_v61 = vsel %vm937_vm9, %v1446_v31, %v1314_v2 }
 0x24a   : > { %v1454_v36 = vsel %vm951_vm3, %v1450_v61, %v1328_v33 }
 0x24b   : > { %v1357_v5 = vpop.permute.xlu0 %1356  ;;  %v1359_v8 = vpop.permute.xlu1 %1358 }
 0x24c   : > { %v1456_v47 = vsel %vm965_vm8, %v1452_v29, %v1357_v5  ;;  %v1458_v28 = vsel %vm965_vm8, %v1454_v36, %v1359_v8 }
 0x24f   : > { %v1379_v9 = vpop.permute.xlu0 %1378  ;;  %v1381_v10 = vpop.permute.xlu1 %1380 }
 0x250   : > { %v1461_v39 = vsel %vm1459_vm15, %v1456_v47, %v1379_v9  ;;  %v1463_v40 = vsel %vm1459_vm15, %v1458_v28, %v1381_v10 }
 0x253   : > { %v1393_v16 = vpop.permute.xlu0 %1392  ;;  %v1395_v19 = vpop.permute.xlu1 %1394 }
 0x254   : > { %v1466_v23 = vsel %vm1464_vm0, %v1461_v39, %v1393_v16  ;;  %v1468_v41 = vsel %vm1464_vm0, %v1463_v40, %v1395_v19 }
 0x257   : > { %v1416_v20 = vpop.permute.xlu0 %1415  ;;  %v1418_v49 = vpop.permute.xlu1 %1417 }
 0x258   : > { %v1471_v25 = vsel %vm1469_vm13, %v1466_v23, %v1416_v20  ;;  %v1473_v37 = vsel %vm1469_vm13, %v1468_v41, %v1418_v49 }
 0x25b   : > { %v1438_v45 = vpop.permute.xlu0 %1437  ;;  %v1440_v3 = vpop.permute.xlu1 %1439 }
 0x25c   : > { %v1478_v38 = vsel %vm1474_vm7, %v1473_v37, %v1440_v3  ;;  %v1476_v44 = vsel %vm1474_vm7, %v1471_v25, %v1438_v45 }
 0x25d   : > { %1835 = vmatprep.mubr.msk.bf16.mxu1 %vm1515_vm11, %v1476_v44 }
 0x25e   : > { %1836 = vmatmul.mubr.msk.bf16.vlgmr.msra.gmra.mrb[0].mxu1 %vm1515_vm11, %v1478_v38 }
 0x331   : > { %v1837_v13 = vpop.f32.mrb[0].mxu1 }
 0x332   : > { %v1582_v51 = vmul.f32 %v1837_v13, %v1784_v53  ;;  %v1558_v7 = vpop.f32.mrb[1].mxu1 }
 0x333   : > { %v1580_v52 = vmul.f32 %v1784_v53, %v1558_v7  ;;  %v1838_v17 = vpop.f32.mrb[2].mxu1 }
 0x334   : > { %v1593_v54 = vadd.f32 %v1785_v1, %v1582_v51  ;;  %v1583_v12 = vmul.f32 %v1838_v17, %v1784_v53  ;;  %v1561_v22 = vpop.f32.mrb[3].mxu1 }
 0x335   : > { %v1591_v60 = vadd.f32 %v1785_v1, %v1580_v52  ;;  %v1581_v55 = vmul.f32 %v1784_v53, %v1561_v22 }
 0x336   : > { %v1597_v56 = vmax.f32 %v1593_v54, 0.0  ;;  %v1594_v27 = vadd.f32 %v1785_v1, %v1583_v12 }
 0x337   : > { %v1595_v62 = vmax.f32 %v1591_v60, 0.0  ;;  %v1592_v18 = vadd.f32 %v1785_v1, %v1581_v55 }
 0x338   : > { %1601 = vst.msk [vmem:[%s2119_s23 + $0x10] sm:$0xff] %vm923_vm4, %v1597_v56  ;;  %v1598_v35 = vmax.f32 %v1594_v27, 0.0 }
 0x339   : > { %1599 = vst.msk [vmem:[%s2119_s23] sm:$0xff] %vm923_vm4, %v1595_v62  ;;  %v1596_v43 = vmax.f32 %v1592_v18, 0.0 }
 0x33a   : > { %1602 = vst.msk [vmem:[%s2119_s23 + $0x18] sm:$0xff] %vm923_vm4, %v1598_v35 }
 0x33b   : > { %1600 = vst.msk [vmem:[%s2119_s23 + $0x8] sm:$0xff] %vm923_vm4, %v1596_v43 }
 0x33c PF: > { %s17_s28 = sadd.s32 1, %s1952_s28   ;;  %s2881_s24 = smov %s1944_s26 }
 0x33d   : > { %p14_p10 = scmp.ge.s32.totalorder %s17_s28, 6   ;;  %s2882_s25 = smov %s1948_s27 }
 0x33e   : > { %s2883_s26 = smov %s2886_s29  ;;  %s2884_s27 = smov %s2890_s30 }
 0x33f   :  { %16 = sbr.rel (!%p14_p10) target bundleno = 3 (0x3), region = 86 }

// kernel: tpu_custom_call.1
= control target key start
LH: loop header
LB: loop body
LE: loop exit
PB: predicated region body
PF: predicated region fallthrough
CT: control target
= control target key end

     0   :  { %s2009_s24 = smov 0   ;;  %s2011_s25 = smov 0   ;;  %s2801_s0 = inlined_call_operand.vmem [shape: bf16[2,2,64,4], index: 0, kind: input, shape index: {}]   ;;  %s2802_s1 = inlined_call_operand.vmem [shape: bf16[36,8], index: 1, kind: input, shape index: {}]   ;;  %s2803_s2 = inlined_call_operand.vmem [shape: f32[1,8], index: 2, kind: input, shape index: {}]   ;;  %s2804_s3 = inlined_call_operand.vmem [shape: f32[1,8], index: 3, kind: input, shape index: {}]   ;;  %s2805_s4 = inlined_call_operand.vmem [shape: bf16[72,8], index: 4, kind: input, shape index: {}]   ;;  %s2806_s5 = inlined_call_operand.vmem [shape: f32[1,8], index: 5, kind: input, shape index: {}]   ;;  %s2807_s6 = inlined_call_operand.vmem [shape: f32[1,8], index: 6, kind: input, shape index: {}]   ;;  %s2808_s7 = inlined_call_operand.vmem [shape: f32[2,64,8], index: 7, kind: output, shape index: {}]  }
   0x1   :  { %s2013_s26 = smov 0   ;;  %s2015_s27 = smov 0  }
   0x2   :  { %s2017_s28 = smov 0  }
   0x3 LB: > { %s26_s29 = sadd.s32 1, %s1944_s26  ;;  %s29_s30 = sadd.s32 1, %s1948_s27  ;;  %s1952_s28 = sphi %s2017_s28, %s17_s28   ;;  %s1948_s27 = sphi %s2015_s27, %s2884_s27   ;;  %s1944_s26 = sphi %s2013_s26, %s2883_s26   ;;  %s1940_s25 = sphi %s2011_s25, %s2882_s25   ;;  %s1936_s24 = sphi %s2009_s24, %s2881_s24  }
   0x4   : > { %p27_p0 = scmp.ge.s32.totalorder %s26_s29, 2  ;;  %p1700_p1 = scmp.ge.s32.totalorder %s1952_s28, 1 }
   0x5   : > { %p257_p2 = scmp.lt.s32.totalorder %s1952_s28, 5 }
   0x6   : > { %s2886_s29 = smov (%p27_p0, %s26_s29), 0  ;;  %s2888_s30 = smov (!%p27_p0, %s29_s30), %s1948_s27 }
   0x7   : > { %p258_p3 = pnand %p1700_p1, %p257_p2  ;;  %p31_p4 = scmp.ge.s32.totalorder %s2888_s30, 2 }
   0x8   : > { %p297_p5 = scmp.lt.s32.totalorder (!%p258_p3), %s1940_s25, 1  ;;  %p299_p6 = scmp.lt.s32.totalorder (!%p258_p3), %s1936_s24, 1  ;;  %v319_v0 = vlaneseq (!%p258_p3)  ;;  %vm2810_vm0 = vsmask.f32 (!%p258_p3), 256  ;;  %vm407_vm1 = vsmask.f32 (!%p258_p3), 4368 }
   0x9   : > { %s2890_s30 = smov (%p31_p4, %s2888_s30), 0  ;;  %261 = sbr.rel (%p258_p3) target bundleno = 828 (0x33c), region = 48 }
   0xa   : > { %s1704_s8 = sshll.u32 (!%p258_p3), %s1936_s24, 2  ;;  %v2045_v1 = vshrl.u32 (!%p258_p3), %v319_v0, 7  ;;  %vm489_vm2 = vcmask (!%p258_p3), 27648   ;;  %vm2809_vm3 = vsmask.f32 (!%p258_p3), 7938  ;;  %vm576_vm4 = vcmask (!%p258_p3), 1040384   ;;  %vm2123_vm13 = vmor (!%p258_p3), %vm2810_vm0, %vm407_vm1 }
   0xb   : > { %p2057_p7 = scmp.lt.s32.totalorder (!%p258_p3), %s1704_s8, 7  ;;  %vm577_vm5 = vcmask (!%p258_p3), 1044484   ;;  %v1954_v31 = vmov (!%p258_p3), 0   ;;  %v492_v49 = vld [vmem:[#allocation2] sm:$0xf] (!%p258_p3)  ;;  %s1960_s12 = smov (!%p258_p3), 4  }
   0xc   : > { %v322_v2 = vadd.s32 (!%p258_p3), 16, %v2045_v1  ;;  %v323_v3 = vadd.s32 (!%p258_p3), 24, %v2045_v1  ;;  %v2052_v4 = vadd.s32 (!%p258_p3), 8, %v2045_v1  ;;  %v330_v5 = vand.u32 (!%p258_p3), 7, %v2045_v1  ;;  %vm2137_vm15 = vmor (!%p258_p3), %vm576_vm4, %vm577_vm5  ;;  %p1752_p8 = scmp.ne.s32.totalorder (!%p258_p3), %s1936_s24, 0 }
   0xd   : > { %v2062_v6 = vadd.s32 (!%p258_p3), 32, %v2045_v1  ;;  %v2065_v7 = vadd.s32 (!%p258_p3), 40, %v2045_v1  ;;  %vm2159_vm5 = vmand (!%p258_p3), %vm489_vm2, %vm2809_vm3  ;;  %vm2812_vm3 = vcmask (!%p258_p3), 1046528  }
   0xe   : > { %v344_v8 = vand.u32 (!%p258_p3), 7, %v322_v2  ;;  %v351_v9 = vand.u32 (!%p258_p3), 7, %v323_v3  ;;  %v337_v10 = vand.u32 (!%p258_p3), 7, %v2052_v4  ;;  %vm2080_vm7 = vcmp.ne.s32.totalorder (!%p258_p3), %v330_v5, 7 }
   0xf   : > { %v358_v13 = vand.u32 (!%p258_p3), 7, %v2062_v6  ;;  %v365_v14 = vand.u32 (!%p258_p3), 7, %v2065_v7  ;;  %vm564_vm1 = vmpackc.low (!%p258_p3), %vm2080_vm7, %vm2080_vm7  ;;  %vm2149_vm4 = vcmp.ne.s32.totalorder (!%p258_p3), %v330_v5, 0 }
  0x10   : > { %s2892_s25 = smov (!%p297_p5, %s1940_s25), 1  ;;  %vm2074_vm6 = vcmp.ne.s32.totalorder %v344_v8, 7  ;;  %s2894_s8 = smov (!%p2057_p7, %s1704_s8), 7  ;;  %vm2092_vm8 = vcmp.ne.s32.totalorder %v351_v9, 7  ;;  %vm2097_vm9 = vcmp.ne.s32.totalorder %v344_v8, 0  ;;  %vm2106_vm11 = vcmp.ne.s32.totalorder %v351_v9, 0 }
  0x11   : > { %s300_s9 = scalar_select %p299_p6, %s1936_s24, 1  ;;  %vm566_vm10 = vmpackc.low %vm2074_vm6, %vm2074_vm6  ;;  %vm2131_vm14 = vcmp.ne.s32.totalorder %v337_v10, 0  ;;  %vm515_vm6 = vcmp.ne.s32.totalorder %v337_v10, 7  ;;  %v570_v60 = vsel %vm564_vm1, 65537, %v1954_v31 }
  0x12   : > { %s1702_s10 = sshll.u32 %s2892_s25, 4  ;;  %s1705_s18 = sshll.u32 %s2892_s25, 3  ;;  %vm567_vm12 = vmpackc.low %vm2092_vm8, %vm2092_vm8  ;;  %v2114_v32 = vsel %vm566_vm10, 65537, %v1954_v31  ;;  %v579_v2 = vrot.slane %v570_v60, 7 }
  0x13   : > { %s1701_s11 = sshll.u32 %s300_s9, 3  ;;  %s312_s19 = sadd.s32 %s1705_s18, %s2894_s8  ;;  %v573_v36 = vsel %vm567_vm12, 65537, %v1954_v31  ;;  %v584_v37 = vrot.slane %v2114_v32, 7  ;;  %vm565_vm8 = vmpackc.low %vm515_vm6, %vm515_vm6 }
  0x14   : > { %s303_s13 = sadd.s32 %s1702_s10, %s1701_s11  ;;  %s1706_s20 = sshll.u32 %s312_s19, 3  ;;  %v587_v42 = vrot.slane %v573_v36, 7  ;;  %v571_v1 = vsel %vm565_vm8, 65537, %v1954_v31  ;;  %v580_v10 = vrot.slane %v579_v2, 4  ;;  %vm2190_vm10 = vmpackc.low %vm2097_vm9, %vm2097_vm9  ;;  %vm2195_vm12 = vcmp.ne.s16.totalorder %v579_v2, 0 }
  0x15   : > { %s1703_s14 = sshll.u32 %s303_s13, 2  ;;  %s2119_s23 = scalar_lea.vmem %s2808_s7, %s1706_s20  ;;  %v586_v46 = vrot.slane %v584_v37, 4  ;;  %v581_v5 = vrot.slane %v571_v1, 7  ;;  %vm2205_vm1 = vmpackc.low %vm2106_vm11, %vm2106_vm11  ;;  %vm2217_vm9 = vcmp.ne.s32.totalorder %v358_v13, 7 }
  0x16   : > { %s2071_s17 = scalar_lea.vmem %s2801_s0, %s1703_s14  ;;  %v2178_v4 = vrot.slane %v587_v42, 4  ;;  %vm2247_vm6 = vmpackc.low %vm2131_vm14, %vm2131_vm14  ;;  %s1955_s25 = smov 12  }
  0x17   : > { %v400_v15 = vld [vmem:[%s2071_s17 + $0x8] sm:$0xf]  ;;  %v401_v16 = vld [vmem:[%s2071_s17 + $0xc] sm:$0xf]  ;;  %v402_v18 = vld [vmem:[%s2071_s17 + $0x10] sm:$0xf]  ;;  %v2172_v62 = vsel %vm2137_vm15, %v586_v46, %v587_v42 }
  0x18   : > { %v427_v19 = vshrl.u32 %v400_v15, 16  ;;  %v430_v20 = vshll.u32 %v400_v15, 16  ;;  %v436_v21 = vshrl.u32 %v401_v16, 16  ;;  %v439_v22 = vshll.u32 %v401_v16, 16  ;;  %v399_v26 = vld [vmem:[%s2071_s17 + $0x4] sm:$0xf]  ;;  %vm2268_vm14 = vmpackc.low %vm2149_vm4, %vm2149_vm4 }
  0x19   : > { %v445_v23 = vshrl.u32 %v402_v18, 16  ;;  %v448_v24 = vshll.u32 %v402_v18, 16  ;;  %v398_v27 = vld [vmem:[%s2071_s17] sm:$0xf]  ;;  %v418_v33 = vshrl.u32 %v399_v26, 16  ;;  %v421_v57 = vshll.u32 %v399_v26, 16  ;;  %vm568_vm4 = vmpackc.low %vm2217_vm9, %vm2217_vm9 }
  0x1a   : > { %v429_v28 = vrot.slane %v427_v19, 7  ;;  %v438_v29 = vrot.slane %v436_v21, 7  ;;  %v410_v38 = vshrl.u32 %v398_v27, 16  ;;  %v413_v52 = vshll.u32 %v398_v27, 16  ;;  %v403_v54 = vld [vmem:[%s2071_s17 + $0x14] sm:$0xf] }
  0x1b   : > { %v2127_v35 = vrot.slane %v445_v23, 7  ;;  %v420_v47 = vrot.slane %v418_v33, 7  ;;  %v404_v3 = vld [vmem:[%s2071_s17 + $0x18] sm:$0xf]  ;;  %vm2813_vm7 = vcmp.ne.s16.totalorder %v2172_v62, 0  ;;  %v454_v12 = vshrl.u32 %v403_v54, 16 }
  0x1c   : > { %v434_v39 = vrot.slane %v429_v28, 4  ;;  %v441_v40 = vor.u32 %v439_v22, %v438_v29  ;;  %v443_v41 = vrot.slane %v438_v29, 4  ;;  %v432_v48 = vor.u32 %v430_v20, %v429_v28  ;;  %v2200_v20 = vld [vmem:[%s2071_s17 + $0x1c] sm:$0xf]  ;;  %s1956_s8 = smov 24   ;;  %s1957_s9 = smov 8  }
  0x1d   : > { %v450_v45 = vor.u32 %v448_v24, %v2127_v35  ;;  %v412_v51 = vrot.slane %v410_v38, 7  ;;  %v425_v56 = vrot.slane %v420_v47, 4  ;;  %v423_v0 = vor.u32 %v421_v57, %v420_v47  ;;  %s1958_s10 = smov 20   ;;  %s1959_s11 = smov 32  }
  0x1e   : > { %v442_v50 = vsel %vm2123_vm13, %v434_v39, %v441_v40  ;;  %v452_v11 = vrot.slane %v2127_v35, 4  ;;  %v583_v16 = vrot.slane %v581_v5, 4  ;;  %v457_v18 = vshll.u32 %v403_v54, 16  ;;  %s1961_s13 = smov 28   ;;  %s1963_s20 = smov 16  }
  0x1f   : > { %v451_v55 = vsel %vm2123_vm13, %v443_v41, %v450_v45  ;;  %498 = vst.msk [vmem:[#allocation2 + $0xc] sm:$0xf] %vm489_vm2, %v442_v50  ;;  %v416_v59 = vrot.slane %v412_v51, 4  ;;  %v415_v61 = vor.u32 %v413_v52, %v412_v51  ;;  %v433_v63 = vsel %vm2123_vm13, %v425_v56, %v432_v48 }
  0x20   : > { %499 = vst.msk [vmem:[#allocation2 + $0x10] sm:$0xf] %vm489_vm2, %v451_v55  ;;  %497 = vst.msk [vmem:[#allocation2 + $0x8] sm:$0xf] %vm489_vm2, %v433_v63  ;;  %v463_v19 = vshrl.u32 %v404_v3, 16  ;;  %v2211_v22 = vsel %vm2137_vm15, %v580_v10, %v581_v5  ;;  %v2213_v23 = vrot.slane %v454_v12, 7  ;;  %v2225_v27 = vsel %vm2137_vm15, %v583_v16, %v584_v37 }
  0x21   : > { %v493_v8 = vsel %vm2159_vm5, %v415_v61, %v492_v49  ;;  %v424_v9 = vsel %vm2123_vm13, %v416_v59, %v423_v0  ;;  %v466_v24 = vshll.u32 %v404_v3, 16  ;;  %vm2815_vm11 = vcmp.ne.s16.totalorder %v2211_v22, 0 }
  0x22   : > { %494 = vst [vmem:[#allocation2] sm:$0xf] %v493_v8  ;;  %496 = vst.msk [vmem:[#allocation2 + $0x4] sm:$0xf] %vm489_vm2, %v424_v9  ;;  %v2228_v28 = vrot.slane %v463_v19, 7  ;;  %vm2232_vm5 = vcmp.ne.s32.totalorder %v365_v14, 7  ;;  %v459_v40 = vor.u32 %v457_v18, %v2213_v23 }
  0x23   : > { %vm2814_vm8 = vcmp.ne.s16.totalorder %v2225_v27, 0  ;;  %v472_v36 = vshrl.u32 %v2200_v20, 16  ;;  %vm569_vm0 = vmpackc.low %vm2232_vm5, %vm2232_vm5  ;;  %v461_v19 = vrot.slane %v2213_v23, 4  ;;  %v574_v29 = vsel %vm568_vm4, 65537, %v1954_v31 }
  0x24   : > { %v460_v57 = vsel %vm2123_vm13, %v452_v11, %v459_v40  ;;  %v468_v58 = vor.u32 %v466_v24, %v2228_v28  ;;  %v590_v40 = vrot.slane %v574_v29, 7  ;;  %vm503_vm5 = vcmask 24576  }
  0x25   : > { %500 = vst.msk [vmem:[#allocation2 + $0x14] sm:$0xf] %vm489_vm2, %v460_v57  ;;  %v2383_v44 = vrot.slane %v472_v36, 7  ;;  %vm2851_vm4 = vsmask.f32 256 }
  0x26   : > { %v2221_v26 = vld [vmem:[#allocation2 + $0xc] sm:$0xf] }
  0x27   : > { %v2236_v30 = vld [vmem:[#allocation2 + $0x10] sm:$0xf]  ;;  %v613_v32 = vsel %vm2190_vm10, %v2221_v26, 0  ;;  %v547_v33 = vsel %vm2205_vm1, %v2221_v26, 0  ;;  %v628_v38 = vsel %vm2247_vm6, %v2221_v26, 0  ;;  %v606_v39 = vsel %vm2813_vm7, %v2221_v26, 0 }
  0x28   : > { %v614_v37 = vsel %vm2205_vm1, %v2236_v30, 0  ;;  %v2263_v42 = vld [vmem:[#allocation2 + $0x8] sm:$0xf]  ;;  %v621_v45 = vsel %vm2814_vm8, %v2221_v26, 0  ;;  %v622_v46 = vsel %vm2813_vm7, %v2236_v30, 0  ;;  %v636_v18 = vsel %vm2815_vm11, %v2221_v26, 0 }
  0x29   : > { %v1719_v41 = vcombine.low %v613_v32, %v614_v37  ;;  %v634_v47 = vld [vmem:[#allocation2 + $0x8] sm:$0xe]  ;;  %v546_v48 = vsel %vm2190_vm10, %v2263_v42, 0  ;;  %v612_v49 = vsel %vm2247_vm6, %v2263_v42, 0  ;;  %v2284_v50 = vld [vmem:[#allocation2] sm:$0xf]  ;;  %v1726_v10 = vcombine.low %v621_v45, %v622_v46 }
  0x2a   : > { %v627_v51 = vsel %vm2268_vm14, %v2263_v42, 0  ;;  %v605_v52 = vsel %vm2814_vm8, %v2263_v42, 0  ;;  %v2293_v53 = vld [vmem:[#allocation2 + $0x4] sm:$0xf]  ;;  %v544_v54 = vsel %vm2268_vm14, %v2284_v50, 0  ;;  %v620_v9 = vsel %vm2815_vm11, %v2263_v42, 0 }
  0x2b   : > { %759 = vrot.lane.b32.xlu0 %v1719_v41, %s1955_s25  ;;  %v551_v55 = vld [vmem:[#allocation2] sm:$0xe]  ;;  %v1715_v56 = vcombine.low %v605_v52, %v606_v39  ;;  %v611_v59 = vsel %vm2268_vm14, %v2293_v53, 0  ;;  %v545_v60 = vsel %vm2247_vm6, %v2293_v53, 0  ;;  %v1729_v61 = vcombine.low %v627_v51, %v628_v38  ;;  %v618_v0 = vld [vmem:[#allocation2 + $0x4] sm:$0xe] }
  0x2c   : > { %v603_v63 = vsel %vm2195_vm12, %v551_v55, 0  ;;  %v1718_v1 = vcombine.low %v611_v59, %v612_v49  ;;  %v604_v2 = vsel %vm2815_vm11, %v2293_v53, 0  ;;  %v619_v5 = vsel %vm2195_vm12, %v618_v0, 0 }
  0x2d   : > { %v2313_v3 = vrot.slane %v1715_v56, 1  ;;  %v1714_v8 = vcombine.low %v603_v63, %v604_v2  ;;  %v635_v11 = vsel %vm2195_vm12, %v634_v47, 0  ;;  %v2331_v12 = vcombine.low %v2284_v50, %v2293_v53 }
  0x2e   : > { %757 = vrot.lane.b32.xlu1 %v1718_v1, %s1955_s25  ;;  %v1725_v16 = vcombine.low %v619_v5, %v620_v9  ;;  %v2337_v25 = vrot.slane %v1726_v10, 1  ;;  %v1734_v32 = vcombine.low %v635_v11, %v636_v18  ;;  %v469_v38 = vsel %vm2123_vm13, %v461_v19, %v468_v58 }
  0x2f   : > { %v729_v24 = vrot.slane %v1714_v8, 1  ;;  %v575_v39 = vsel %vm569_vm0, 65537, %v1954_v31  ;;  %v629_v23 = vsel %vm2190_vm10, %v2236_v30, 0  ;;  %v637_v45 = vsel %vm2814_vm8, %v2236_v30, 0  ;;  %501 = vst.msk [vmem:[#allocation2 + $0x18] sm:$0xf] %vm489_vm2, %v469_v38 }
  0x30   : > { %v823_v37 = vrot.slane %v1725_v16, 1  ;;  %v593_v46 = vrot.slane %v575_v39, 7  ;;  %v2354_v31 = vld [vmem:[#allocation2 + $0x14] sm:$0xf]  ;;  %v900_v47 = vrot.slane %v1734_v32, 1  ;;  %v591_v49 = vsel %vm2137_vm15, %v2178_v4, %v590_v40 }
  0x31   : > { %v731_v41 = vsel %vm2812_vm3, %v729_v24, %v2313_v3  ;;  %v592_v51 = vrot.slane %v590_v40, 4  ;;  %v1711_v52 = vcombine.low %v2263_v42, %v2221_v26  ;;  %v630_v55 = vsel %vm2205_vm1, %v2354_v31, 0 }
  0x32   : > { %851 = vrot.lane.b32.xlu1 %v1729_v61, %s1956_s8  ;;  %736 = vrot.lane.b32.xlu0 %v731_v41, %s1957_s9  ;;  %v825_v56 = vsel %vm2812_vm3, %v823_v37, %v2337_v25  ;;  %v638_v57 = vsel %vm2813_vm7, %v2354_v31, 0  ;;  %vm600_vm0 = vcmp.ne.s16.totalorder %v591_v49, 0  ;;  %v1730_v58 = vcombine.low %v629_v23, %v630_v55 }
  0x33   : > { %v1735_v59 = vcombine.low %v637_v45, %v638_v57  ;;  %v594_v61 = vsel %vm2137_vm15, %v592_v51, %v593_v46  ;;  %v679_v63 = vshll.u32 %v2331_v12, 16  ;;  %v607_v0 = vsel %vm600_vm0, %v2236_v30, 0 }
  0x34   : > { %vm601_vm9 = vcmp.ne.s16.totalorder %v594_v61, 0  ;;  %v677_v5 = vshrl.u32 %v2331_v12, 16  ;;  %v623_v8 = vsel %vm600_vm0, %v2354_v31, 0  ;;  %v470_v10 = vrot.slane %v2228_v28, 4  ;;  %v505_v61 = vld [vmem:[#allocation2 + $0x20] sm:$0x1] }
  0x35   : > { %v2376_v1 = vrot.slane %v1735_v59, 1  ;;  %v608_v2 = vsel %vm601_vm9, %v2354_v31, 0  ;;  %v475_v11 = vshll.u32 %v2200_v20, 16  ;;  %v681_v19 = vrot.slane %v679_v63, 1 }
  0x36   : > { %853 = vrot.lane.b32.xlu1 %v1730_v58, %s1956_s8  ;;  %830 = vrot.lane.b32.xlu0 %v825_v56, %s1958_s10  ;;  %v1716_v9 = vcombine.low %v607_v0, %v608_v2  ;;  %v2391_v18 = vld [vmem:[#allocation2 + $0x18] sm:$0xf]  ;;  %v684_v24 = vshll.u32 %v1711_v52, 16  ;;  %v1712_v12 = vcombine.low %v2236_v30, %v2354_v31  ;;  %v688_v28 = vshrl.u32 %v1711_v52, 16 }
  0x37   : > { %v902_v16 = vsel %vm2812_vm3, %v900_v47, %v2376_v1  ;;  %v624_v36 = vsel %vm601_vm9, %v2391_v18, 0  ;;  %v477_v29 = vor.u32 %v475_v11, %v2383_v44  ;;  %v1721_v40 = vcombine.low %v2293_v53, %v2263_v42  ;;  %v550_v58 = vld [vmem:[#allocation2 + $0x18] sm:$0x1] }
  0x38   : > { %v2397_v32 = vrot.slane %v1716_v9, 1  ;;  %v1727_v20 = vcombine.low %v623_v8, %v624_v36  ;;  %v692_v39 = vshll.u32 %v1712_v12, 16  ;;  %v682_v23 = vor.u32 %v681_v19, %v677_v5 }
  0x39   : > { %v478_v38 = vsel %vm2123_vm13, %v470_v10, %v477_v29  ;;  %v686_v45 = vrot.slane %v684_v24, 1  ;;  %vm2811_vm15 = vsmask.f32 7424  ;;  %v2411_v47 = vrot.slane %v593_v46, 4 }
  0x3a   : > { %907 = vrot.lane.b32.xlu1 %v902_v16, %s1959_s11  ;;  %v733_v37 = vsel %vm2812_vm3, %v2313_v3, %v2397_v32  ;;  %v2408_v41 = vrot.slane %v1727_v20, 1  ;;  %502 = vst.msk [vmem:[#allocation2 + $0x1c] sm:$0xf] %vm489_vm2, %v478_v38  ;;  %v1722_v51 = vcombine.low %v2221_v26, %v2236_v30  ;;  %v694_v55 = vrot.slane %v692_v39, 1 }
  0x3b   : > { %v690_v52 = vor.u32 %v688_v28, %v686_v45  ;;  %v774_v56 = vshll.u32 %v1721_v40, 16  ;;  %v687_v57 = vsel %vm2811_vm15, %v682_v23, %v686_v45  ;;  %vm602_vm2 = vcmp.ne.s16.totalorder %v2411_v47, 0  ;;  %v1900_v26 = vld [vmem:[%s2802_s1 + $0x10] ss:$0 sps:$4 sm:$0x33]  }
  0x3c   : > { %v827_v3 = vsel %vm2812_vm3, %v2337_v25, %v2408_v41  ;;  %v639_v46 = vsel %vm600_vm0, %v2391_v18, 0  ;;  %v779_v59 = vshll.u32 %v1722_v51, 16  ;;  %v772_v0 = vshrl.u32 %v1721_v40, 16  ;;  %vm504_vm0 = vmand %vm503_vm5, %vm2851_vm4 }
  0x3d   : > { %832 = vrot.lane.b32.xlu0 %v827_v3, %s1958_s10  ;;  %v695_v63 = vsel %vm2811_vm15, %v690_v52, %v694_v55  ;;  %v776_v2 = vrot.slane %v774_v56, 1  ;;  %v696_v5 = vshrl.u32 %v1712_v12, 16  ;;  %v609_v9 = vsel %vm602_vm2, %v550_v58, 0  ;;  %v1898_v3 = vld [vmem:[%s2802_s1] sm:$0xff]   ;;  %v1899_v56 = vld [vmem:[%s2802_s1 + $0x8] sm:$0xff]  }
  0x3e   : > { %738 = vrot.lane.b32.xlu1 %v733_v37, %s1957_s9  ;;  %v1713_v10 = vcombine.low %v550_v58, %v550_v58  ;;  %v781_v16 = vrot.slane %v779_v59, 1  ;;  %v2439_v24 = vcombine.low %v2354_v31, %v2391_v18  ;;  %v1717_v29 = vcombine.low %v609_v9, %v609_v9 }
  0x3f   : > { %v777_v36 = vor.u32 %v776_v2, %v772_v0  ;;  %v479_v20 = vrot.slane %v2383_v44, 4  ;;  %v698_v28 = vor.u32 %v696_v5, %v694_v55  ;;  %v783_v23 = vshrl.u32 %v1722_v51, 16 }
  0x40   : > { %v700_v38 = vshll.u32 %v1713_v10, 16  ;;  %v787_v44 = vshll.u32 %v2439_v24, 16  ;;  %vm513_vm5 = vcmp.ne.s32.totalorder %v365_v14, 0  ;;  %v2469_v6 = vcombine.low %v544_v54, %v545_v60 }
  0x41   : > { %704 = vrot.lane.b32.xlu0 %v687_v57, %s1960_s12  ;;  %v2425_v25 = vld [vmem:[#allocation2 + $0x1c] sm:$0xf]  ;;  %v506_v45 = vsel %vm504_vm0, %v479_v20, %v505_v61  ;;  %v1962_v53 = vmov 0.0   ;;  %v2488_v50 = vcombine.low %v546_v48, %v547_v33  ;;  %v785_v54 = vor.u32 %v783_v23, %v781_v16  ;;  %vm2490_vm0 = vmpackc.low %vm513_vm5, %vm513_vm5 }
  0x42   : > { %v640_v8 = vsel %vm601_vm9, %v2425_v25, 0  ;;  %v2434_v49 = vcombine.low %v2391_v18, %v2425_v25  ;;  %v617_v39 = vld [vmem:[#allocation2 + $0x1c] sm:$0x1]  ;;  %vm512_vm9 = vcmp.ne.s32.totalorder %v358_v13, 0  ;;  %507 = vst [vmem:[#allocation2 + $0x20] sm:$0x1] %v506_v45  ;;  %v782_v13 = vsel %vm2811_vm15, %v777_v36, %v781_v16  ;;  %1807 = vmatprep.subr.bf16.mxu0 %v1962_v53 }
  0x43   : > { %v1736_v11 = vcombine.low %v639_v46, %v640_v8  ;;  %v1724_v51 = vcombine.low %v617_v39, %v617_v39  ;;  %v702_v14 = vrot.slane %v700_v38, 1  ;;  %vm2475_vm4 = vmpackc.low %vm512_vm9, %vm512_vm9  ;;  %v625_v55 = vsel %vm602_vm2, %v617_v39, 0  ;;  %1808 = vmatpush3.bf16.msra.mxu0 %v1898_v3 }
  0x44   : > { %v864_v19 = vshll.u32 %v2434_v49, 16  ;;  %v789_v33 = vrot.slane %v787_v44, 1  ;;  %v791_v42 = vshrl.u32 %v2439_v24, 16  ;;  %1809 = vmatprep.subr.bf16.mxu0 %v1962_v53  ;;  %v548_v48 = vsel %vm2475_vm4, %v2236_v30, 0 }
  0x45   : > { %v2443_v12 = vrot.slane %v1736_v11, 1  ;;  %876 = vrot.lane.b32.xlu0 %v695_v63, %s1961_s13  ;;  %v549_v57 = vsel %vm2490_vm0, %v2354_v31, 0  ;;  %v795_v46 = vshll.u32 %v1724_v51, 16  ;;  %vm999_vm9 = vcmask 1041408  }
  0x46   : > { %v2447_v37 = vrot.slane %v864_v19, 1  ;;  %vm1964_vm5 = vmmov 0   ;;  %v2516_v59 = vcombine.low %v548_v48, %v549_v57  ;;  %v615_v30 = vsel %vm2475_vm4, %v2354_v31, 0 }
  0x47   : > { %v904_v40 = vsel %vm2812_vm3, %v2376_v1, %v2443_v12  ;;  %v734_v1 = vrot.slane %v1717_v29, 1  ;;  %1813 = vmatprep.mubr.msk.bf16.mxu0 %vm1964_vm5, %v1962_v53  ;;  %v1728_v0 = vcombine.low %v625_v55, %v625_v55  ;;  %1810 = vmatpush3.bf16.msra.mxu0 %v1899_v56  ;;  %v1001_v8 = vsel %vm999_vm9, %v1900_v26, 0 }
  0x48   : > { %909 = vrot.lane.b32.xlu1 %v904_v40, %s1959_s11  ;;  %v867_v7 = vsel %vm2811_vm15, %v698_v28, %v2447_v37  ;;  %1811 = vmatprep.subr.bf16.mxu0 %v1962_v53  ;;  %v790_v9 = vsel %vm2811_vm15, %v785_v54, %v789_v33  ;;  %v793_v11 = vor.u32 %v791_v42, %v789_v33  ;;  %v797_v31 = vrot.slane %v795_v46, 1 }
  0x49   : > { %706 = vrot.lane.b32.xlu0 %v695_v63, %s1960_s12  ;;  %v735_v58 = vsel %vm2812_vm3, %v2397_v32, %v734_v1  ;;  %v703_v63 = vsel %vm2811_vm15, %v698_v28, %v702_v14  ;;  %v616_v32 = vsel %vm2490_vm0, %v2391_v18, 0  ;;  %v633_v2 = vld [vmem:[#allocation2 + $0x20] sm:$0x1]  ;;  %v828_v16 = vrot.slane %v1728_v0, 1 }
  0x4a   : > { %v1733_v5 = vcombine.low %v633_v2, %v633_v2  ;;  %v1720_v10 = vcombine.low %v615_v30, %v616_v32  ;;  %v868_v19 = vshrl.u32 %v2434_v49, 16  ;;  %v641_v61 = vsel %vm602_vm2, %v633_v2, 0 }
  0x4b   : > { %1812 = vmatpush3.bf16.msra.mxu0 %v1001_v8  ;;  %v798_v36 = vsel %vm2811_vm15, %v793_v11, %v797_v31  ;;  %v631_v29 = vsel %vm2475_vm4, %v2391_v18, 0  ;;  %v632_v20 = vsel %vm2490_vm0, %v2425_v25, 0  ;;  %v1737_v49 = vcombine.low %v641_v61, %v641_v61 }
  0x4c   : > { %799 = vrot.lane.b32.xlu1 %v782_v13, %s1963_s20  ;;  %v872_v24 = vshll.u32 %v1733_v5, 16  ;;  %v829_v47 = vsel %vm2812_vm3, %v2408_v41, %v828_v16  ;;  %v870_v28 = vor.u32 %v868_v19, %v2447_v37  ;;  %v1731_v39 = vcombine.low %v631_v29, %v632_v20 }
  0x4d   : > { %878 = vrot.lane.b32.xlu0 %v867_v7, %s1961_s13  ;;  %v905_v40 = vrot.slane %v1737_v49, 1  ;;  %vm913_vm2 = vcmask 31744   ;;  %vm923_vm4 = vcmask 64512   ;;  %vm930_vm0 = vcmask 97280  }
  0x4e   : > { %v874_v38 = vrot.slane %v872_v24, 1  ;;  %vm937_vm9 = vcmask 130048   ;;  %vm958_vm7 = vcmask 228352   ;;  %vm965_vm8 = vcmask 261120  }
  0x4f   : > { %v906_v18 = vsel %vm2812_vm3, %v2443_v12, %v905_v40  ;;  %vm951_vm3 = vcmask 195584   ;;  %vm992_vm11 = vcmask 293888  }
  0x50   : > { %740 = vrot.lane.b32.xlu1 %v735_v58, %s1957_s9  ;;  %v875_v23 = vsel %vm2811_vm15, %v870_v28, %v874_v38  ;;  %vm944_vm15 = vcmask 162816   ;;  %v1744_v38 = vld [vmem:[%s2803_s2] ss:$0 sm:$0xff] }
  0x51   : > { %708 = vrot.lane.b32.xlu0 %v703_v63, %s1960_s12 }
  0x54   : > { %801 = vrot.lane.b32.xlu1 %v790_v9, %s1963_s20 }
  0x55   : > { %761 = vrot.lane.b32.xlu0 %v1720_v10, %s1955_s25 }
  0x58   : > { %803 = vrot.lane.b32.xlu1 %v798_v36, %s1963_s20 }
  0x59   : > { %834 = vrot.lane.b32.xlu0 %v829_v47, %s1958_s10 }
  0x5c   : > { %855 = vrot.lane.b32.xlu1 %v1731_v39, %s1956_s8 }
  0x5d   : > { %880 = vrot.lane.b32.xlu0 %v875_v23, %s1961_s13 }
  0x60   : > { %911 = vrot.lane.b32.xlu1 %v906_v18, %s1959_s11 }
  0x9d   : > { %v760_v41 = vpop.permute.xlu0 %759 }
  0xa0   : > { %v758_v25 = vpop.permute.xlu1 %757 }
  0xa4   : > { %v852_v37 = vpop.permute.xlu1 %851  ;;  %v737_v45 = vpop.permute.xlu0 %736 }
  0xa8   : > { %v854_v3 = vpop.permute.xlu1 %853  ;;  %v831_v44 = vpop.permute.xlu0 %830 }
  0xac   : > { %v908_v13 = vpop.permute.xlu1 %907 }
  0xaf   : > { %v833_v1 = vpop.permute.xlu0 %832 }
  0xb0   : > { %v739_v7 = vpop.permute.xlu1 %738 }
  0xb3   : > { %v705_v51 = vpop.permute.xlu0 %704 }
  0xb4   : > { %v916_v52 = vsel %vm913_vm2, %v2469_v6, %v705_v51 }
  0xb5   : > { %v925_v12 = vsel %vm923_vm4, %v916_v52, %v737_v45 }
  0xb6   : > { %v932_v56 = vsel %vm930_vm0, %v925_v12, %v758_v25 }
  0xb7   : > { %v877_v14 = vpop.permute.xlu0 %876 }
  0xba   : > { %v910_v54 = vpop.permute.xlu1 %909 }
  0xbb   : > { %v707_v60 = vpop.permute.xlu0 %706 }
  0xbc   : > { %v919_v6 = vsel %vm913_vm2, %v2488_v50, %v707_v60 }
  0xbd   : > { %v927_v46 = vsel %vm923_vm4, %v919_v6, %v739_v7 }
  0xbe   : > { %v800_v55 = vpop.permute.xlu1 %799  ;;  %v934_v0 = vsel %vm930_vm0, %v927_v46, %v760_v41 }
  0xbf   : > { %v939_v26 = vsel %vm937_vm9, %v932_v56, %v800_v55  ;;  %v879_v33 = vpop.permute.xlu0 %878 }
  0xc0   : > { %v946_v42 = vsel %vm944_vm15, %v939_v26, %v831_v44 }
  0xc1   : > { %v953_v48 = vsel %vm951_vm3, %v946_v42, %v852_v37  ;;  %v1172_v42 = vld [vmem:[#allocation3] sm:$0xf] }
  0xc2   : > { %v741_v57 = vpop.permute.xlu1 %740  ;;  %v960_v58 = vsel %vm958_vm7, %v953_v48, %v877_v14 }
  0xc3   : > { %v967_v63 = vsel %vm965_vm8, %v960_v58, %v908_v13  ;;  %v709_v30 = vpop.permute.xlu0 %708 }
  0xc4   : > { %1814 = vmatmul.mubr.msk.bf16.vlgmr.msra.gmra.mrb[0].mxu0 %vm992_vm11, %v967_v63  ;;  %v922_v32 = vsel %vm913_vm2, %v2516_v59, %v709_v30  ;;  %vm2859_vm2 = vsmask.f32 256 }
  0xc5   : > { %1817 = vmatprep.mubr.msk.bf16.mxu0 %vm1964_vm5, %v1962_v53  ;;  %v929_v5 = vsel %vm923_vm4, %v922_v32, %v741_v57 }
  0xc6   : > { %v802_v50 = vpop.permute.xlu1 %801 }
  0xc7   : > { %v941_v2 = vsel %vm937_vm9, %v934_v0, %v802_v50  ;;  %v762_v8 = vpop.permute.xlu0 %761 }
  0xc8   : > { %v948_v9 = vsel %vm944_vm15, %v941_v2, %v833_v1  ;;  %v936_v10 = vsel %vm930_vm0, %v929_v5, %v762_v8 }
  0xc9   : > { %v955_v11 = vsel %vm951_vm3, %v948_v9, %v854_v3 }
  0xca   : > { %v804_v31 = vpop.permute.xlu1 %803  ;;  %v962_v59 = vsel %vm958_vm7, %v955_v11, %v879_v33 }
  0xcb   : > { %v943_v16 = vsel %vm937_vm9, %v936_v10, %v804_v31  ;;  %v969_v19 = vsel %vm965_vm8, %v962_v59, %v910_v54  ;;  %v835_v24 = vpop.permute.xlu0 %834 }
  0xcc   : > { %1818 = vmatmul.mubr.msk.bf16.gmra.mrb[4].mxu0 %vm992_vm11, %v969_v19  ;;  %v950_v61 = vsel %vm944_vm15, %v943_v16, %v835_v24 }
  0xcd   : > { %1821 = vmatprep.mubr.msk.bf16.mxu0 %vm1964_vm5, %v1962_v53  ;;  %v1745_v53 = vld [vmem:[%s2804_s3] ss:$0 sm:$0xff]  ;;  %vm1181_vm5 = vcmask 57344  }
  0xce   : > { %v856_v36 = vpop.permute.xlu1 %855  ;;  %vm2610_vm0 = vmand %vm1181_vm5, %vm2859_vm2 }
  0xcf   : > { %v957_v29 = vsel %vm951_vm3, %v950_v61, %v856_v36  ;;  %v881_v20 = vpop.permute.xlu0 %880 }
  0xd0   : > { %v964_v49 = vsel %vm958_vm7, %v957_v29, %v881_v20  ;;  %vm1170_vm7 = vcmask 60416  }
  0xd2   : > { %v912_v47 = vpop.permute.xlu1 %911 }
  0xd3   : > { %v971_v28 = vsel %vm965_vm8, %v964_v49, %v912_v47 }
  0xd4   : > { %1822 = vmatmul.mubr.msk.bf16.gmra.mrb[8].mxu0 %vm992_vm11, %v971_v28  ;;  %vm2856_vm11 = vsmask.f32 7938 }
  0xd5   : > { %vm2594_vm15 = vmand %vm1170_vm7, %vm2856_vm11 }
 0x197   : > { %v1037_v39 = vpop.f32.mrb[0].mxu0 }
 0x198   : > { %v1067_v40 = vmul.f32 %v1744_v38, %v1037_v39  ;;  %v1815_v23 = vpop.f32.mrb[1].mxu0 }
 0x199   : > { %v1040_v18 = vpop.f32.mrb[2].mxu0 }
 0x19a   : > { %v1080_v41 = vadd.f32 %v1745_v53, %v1067_v40  ;;  %v1068_v25 = vmul.f32 %v1744_v38, %v1040_v18  ;;  %v1816_v37 = vpop.f32.mrb[3].mxu0 }
 0x19c   : > { %v1086_v45 = vmax.f32 %v1080_v41, 0.0  ;;  %v1081_v3 = vadd.f32 %v1745_v53, %v1068_v25 }
 0x19e   : > { %v1788_v44 = vpack.c.bf16 %v1086_v45, %v1086_v45  ;;  %v1087_v13 = vmax.f32 %v1081_v3, 0.0 }
 0x19f   : > { %v1045_v1 = vpop.f32.mrb[4].mxu0 }
 0x1a0   : > { %v1111_v51 = vshrl.u32 %v1788_v44, 16  ;;  %v1789_v7 = vpack.c.bf16 %v1087_v13, %v1087_v13  ;;  %v1069_v14 = vmul.f32 %v1744_v38, %v1045_v1  ;;  %v1819_v52 = vpop.f32.mrb[5].mxu0  ;;  %v1114_v60 = vshll.u32 %v1788_v44, 16 }
 0x1a1   : > { %v1048_v54 = vpop.f32.mrb[6].mxu0 }
 0x1a2   : > { %v1113_v12 = vrot.slane %v1111_v51, 7  ;;  %v1119_v55 = vshrl.u32 %v1789_v7, 16  ;;  %v1082_v56 = vadd.f32 %v1745_v53, %v1069_v14  ;;  %v1820_v26 = vpop.f32.mrb[7].mxu0  ;;  %v1070_v6 = vmul.f32 %v1744_v38, %v1048_v54  ;;  %v1183_v54 = vld [vmem:[#allocation3 + $0x18] sm:$0x1] }
 0x1a3   : > { %v1122_v58 = vshll.u32 %v1789_v7, 16 }
 0x1a4   : > { %v1116_v48 = vor.u32 %v1114_v60, %v1113_v12  ;;  %v1121_v57 = vrot.slane %v1119_v55, 7  ;;  %v1088_v46 = vmax.f32 %v1082_v56, 0.0  ;;  %v1083_v63 = vadd.f32 %v1745_v53, %v1070_v6 }
 0x1a5   : > { %v1117_v30 = vrot.slane %v1113_v12, 4 }
 0x1a6   : > { %v1173_v32 = vsel %vm2594_vm15, %v1116_v48, %v1172_v42  ;;  %v1124_v50 = vor.u32 %v1122_v58, %v1121_v57  ;;  %v1790_v0 = vpack.c.bf16 %v1088_v46, %v1088_v46  ;;  %v1089_v2 = vmax.f32 %v1083_v63, 0.0 }
 0x1a7   : > { %1174 = vst [vmem:[#allocation3] sm:$0xf] %v1173_v32  ;;  %v1053_v5 = vpop.f32.mrb[8].mxu0  ;;  %v1126_v20 = vrot.slane %v1121_v57, 4 }
 0x1a8   : > { %v1125_v8 = vsel %vm2123_vm13, %v1117_v30, %v1124_v50  ;;  %v1128_v9 = vshrl.u32 %v1790_v0, 16  ;;  %v1071_v10 = vmul.f32 %v1744_v38, %v1053_v5  ;;  %v1823_v11 = vpop.f32.mrb[9].mxu0  ;;  %v1791_v31 = vpack.c.bf16 %v1089_v2, %v1089_v2 }
 0x1a9   : > { %1176 = vst.msk [vmem:[#allocation3 + $0x4] sm:$0xf] %vm1170_vm7, %v1125_v8  ;;  %v1056_v59 = vpop.f32.mrb[10].mxu0  ;;  %v1131_v19 = vshll.u32 %v1790_v0, 16 }
 0x1aa   : > { %v1130_v16 = vrot.slane %v1128_v9, 7  ;;  %v1084_v24 = vadd.f32 %v1745_v53, %v1071_v10  ;;  %v1072_v61 = vmul.f32 %v1744_v38, %v1056_v59  ;;  %v1824_v36 = vpop.f32.mrb[11].mxu0  ;;  %v1137_v29 = vshrl.u32 %v1791_v31, 16 }
 0x1ab   : > { %v1140_v40 = vshll.u32 %v1791_v31, 16 }
 0x1ac   : > { %v1133_v49 = vor.u32 %v1131_v19, %v1130_v16  ;;  %v1090_v47 = vmax.f32 %v1084_v24, 0.0  ;;  %v1085_v28 = vadd.f32 %v1745_v53, %v1072_v61  ;;  %v1139_v39 = vrot.slane %v1137_v29, 7 }
 0x1ad   : > { %v1135_v25 = vrot.slane %v1130_v16, 4 }
 0x1ae   : > { %v1134_v23 = vsel %vm2123_vm13, %v1126_v20, %v1133_v49  ;;  %v1792_v18 = vpack.c.bf16 %v1090_v47, %v1090_v47  ;;  %v1091_v41 = vmax.f32 %v1085_v28, 0.0  ;;  %v1142_v37 = vor.u32 %v1140_v40, %v1139_v39  ;;  %v1190_v6 = vld [vmem:[#allocation3] sm:$0xf] (!%p1752_p8) }
 0x1af   : > { %1177 = vst.msk [vmem:[#allocation3 + $0x8] sm:$0xf] %vm1170_vm7, %v1134_v23  ;;  %v1144_v1 = vrot.slane %v1139_v39, 4  ;;  %v1191_v57 = vsel (!%p1752_p8), %vm2594_vm15, 0, %v1190_v6 }
 0x1b0   : > { %v1146_v45 = vshrl.u32 %v1792_v18, 16  ;;  %v1793_v3 = vpack.c.bf16 %v1091_v41, %v1091_v41  ;;  %v1143_v38 = vsel %vm2123_vm13, %v1135_v25, %v1142_v37  ;;  %v1149_v53 = vshll.u32 %v1792_v18, 16  ;;  %v1193_v48 = vld [vmem:[#allocation3 + $0x4] sm:$0x1] (!%p1752_p8)  ;;  %1192 = vst [vmem:[#allocation3] sm:$0xf] (!%p1752_p8), %v1191_v57 }
 0x1b1   : > { %1178 = vst.msk [vmem:[#allocation3 + $0xc] sm:$0xf] %vm1170_vm7, %v1143_v38  ;;  %v1194_v58 = vsel (!%p1752_p8), %vm2610_vm0, 0, %v1193_v48 }
 0x1b2   : > { %v1148_v44 = vrot.slane %v1146_v45, 7  ;;  %v1155_v13 = vshrl.u32 %v1793_v3, 16  ;;  %v1158_v14 = vshll.u32 %v1793_v3, 16  ;;  %1195 = vst [vmem:[#allocation3 + $0x4] sm:$0x1] (!%p1752_p8), %v1194_v58 }
 0x1b3   : > { %1189 = sbr.rel (%p1752_p8) target bundleno = 442 (0x1ba), region = 52 }
 0x1b4   : > { %v1151_v51 = vor.u32 %v1149_v53, %v1148_v44  ;;  %v1157_v7 = vrot.slane %v1155_v13, 7  ;;  %v1153_v60 = vrot.slane %v1148_v44, 4 }
 0x1b6   : > { %v1152_v12 = vsel %vm2123_vm13, %v1144_v1, %v1151_v51  ;;  %v1160_v55 = vor.u32 %v1158_v14, %v1157_v7  ;;  %v1162_v56 = vrot.slane %v1157_v7, 4 }
 0x1b7   : > { %1179 = vst.msk [vmem:[#allocation3 + $0x10] sm:$0xf] %vm1170_vm7, %v1152_v12 }
 0x1b8   : > { %v1161_v26 = vsel %vm2123_vm13, %v1153_v60, %v1160_v55  ;;  %v1184_v42 = vsel %vm2610_vm0, %v1162_v56, %v1183_v54 }
 0x1b9   : > { %1180 = vst.msk [vmem:[#allocation3 + $0x14] sm:$0xf] %vm1170_vm7, %v1161_v26  ;;  %1185 = vst [vmem:[#allocation3 + $0x18] sm:$0x1] %v1184_v42 }
 0x1ba PF: > { %p1753_p9 = scmp.ne.s32.totalorder %s1936_s24, 1 }
 0x1bc   : > { %1199 = sbr.rel (%p1753_p9) target bundleno = 451 (0x1c3), region = 56 }
 0x1c0   : > { %v1200_v34 = vld [vmem:[#allocation3 + $0x14] sm:$0xf] (!%p1753_p9)  ;;  %v1203_v46 = vld [vmem:[#allocation3 + $0x18] sm:$0x1] (!%p1753_p9) }
 0x1c1   : > { %v1201_v63 = vsel (!%p1753_p9), %vm2594_vm15, 0, %v1200_v34  ;;  %v1204_v30 = vsel (!%p1753_p9), %vm2610_vm0, 0, %v1203_v46 }
 0x1c2   : > { %1202 = vst [vmem:[#allocation3 + $0x14] sm:$0xf] (!%p1753_p9), %v1201_v63  ;;  %1205 = vst [vmem:[#allocation3 + $0x18] sm:$0x1] (!%p1753_p9), %v1204_v30 }
 0x1c3 PF: > { %v2632_v32 = vld [vmem:[#allocation3 + $0x4] sm:$0xf]  ;;  %v2634_v50 = vld [vmem:[#allocation3 + $0x8] sm:$0xf]  ;;  %v2636_v0 = vld [vmem:[#allocation3 + $0xc] sm:$0xf] }
 0x1c4   : > { %v1223_v2 = vsel %vm2268_vm14, %v2632_v32, 0  ;;  %v1224_v33 = vsel %vm2247_vm6, %v2634_v50, 0  ;;  %v1215_v5 = vld [vmem:[#allocation3] sm:$0xe]  ;;  %vm2862_vm13 = vcmp.ne.s16.totalorder %v2211_v22, 0  ;;  %vm2863_vm7 = vcmp.ne.s16.totalorder %v2225_v27, 0 }
 0x1c5   : > { %v1218_v8 = vsel %vm2862_vm13, %v2632_v32, 0  ;;  %v1219_v9 = vsel %vm2863_vm7, %v2634_v50, 0  ;;  %v1762_v10 = vcombine.low %v1223_v2, %v1224_v33  ;;  %v1217_v11 = vsel %vm2195_vm12, %v1215_v5, 0  ;;  %v2655_v59 = vld [vmem:[#allocation3] sm:$0xf]  ;;  %v1910_v57 = vld [vmem:[%s2805_s4 + $0x8] sm:$0xff]  }
 0x1c6   : > { %vm2864_vm11 = vcmp.ne.s16.totalorder %v2172_v62, 0  ;;  %v1757_v16 = vcombine.low %v2634_v50, %v2636_v0  ;;  %v1214_v19 = vld [vmem:[#allocation3 + $0x10] sm:$0x1]  ;;  %v1759_v24 = vcombine.low %v1217_v11, %v1218_v8  ;;  %v1756_v36 = vcombine.low %v2655_v59, %v2632_v32  ;;  %v1228_v1 = vld [vmem:[#allocation3 + $0x4] sm:$0xe]  ;;  %v1909_v51 = vld [vmem:[%s2805_s4] sm:$0xff]  }
 0x1c7   : > { %v1220_v31 = vsel %vm2864_vm11, %v2636_v0, 0  ;;  %vm1216_vm15 = vcmp.ne.s16.totalorder %v2178_v4, 0  ;;  %1325 = vrot.lane.b32.xlu0 %v1762_v10, %s1956_s8  ;;  %v1758_v49 = vcombine.low %v1214_v19, %v1214_v19  ;;  %v2665_v18 = vld [vmem:[#allocation3 + $0x10] sm:$0xf]  ;;  %v1225_v45 = vsel %vm2190_vm10, %v2636_v0, 0  ;;  %1825 = vmatprep.subr.bf16.mxu1 %v1909_v51  ;;  %s1966_s19 = smov 48  }
 0x1c8   : > { %v1760_v61 = vcombine.low %v1219_v9, %v1220_v31  ;;  %v1277_v29 = vshll.u32 %v1757_v16, 16  ;;  %v1221_v20 = vsel %vm1216_vm15, %v1214_v19, 0  ;;  %v1281_v47 = vshrl.u32 %v1757_v16, 16  ;;  %1826 = vmatpush3.bf16.msra.mxu1 %v1909_v51  ;;  %v1911_v30 = vld [vmem:[%s2805_s4 + $0x10] sm:$0xff]   ;;  %s1968_s21 = smov 64  }
 0x1c9   : > { %v1306_v28 = vrot.slane %v1759_v24, 1  ;;  %v1270_v40 = vshrl.u32 %v1756_v36, 16  ;;  %v1272_v23 = vshll.u32 %v1756_v36, 16  ;;  %v1761_v25 = vcombine.low %v1221_v20, %v1221_v20  ;;  %v1227_v3 = vld [vmem:[#allocation3 + $0x14] sm:$0x1]  ;;  %1827 = vmatprep.subr.bf16.mxu1 %v1910_v57 }
 0x1ca   : > { %v1307_v39 = vrot.slane %v1760_v61, 1  ;;  %v1279_v41 = vrot.slane %v1277_v29, 1  ;;  %v1285_v37 = vshll.u32 %v1758_v49, 16  ;;  %vm2865_vm5 = vcmask 1046528   ;;  %v1234_v24 = vld [vmem:[#allocation3 + $0x14] sm:$0xf] }
 0x1cb   : > { %v1274_v44 = vrot.slane %v1272_v23, 1  ;;  %v1226_v53 = vsel %vm2205_vm1, %v2665_v18, 0  ;;  %v1764_v13 = vcombine.low %v2632_v32, %v2634_v50  ;;  %v1309_v7 = vrot.slane %v1761_v25, 1  ;;  %vm2866_vm2 = vmmov %vm2865_vm5  ;;  %v1239_v20 = vld [vmem:[#allocation3 + $0x18] sm:$0x1] }
 0x1cc   : > { %v1308_v38 = vsel %vm2865_vm5, %v1306_v28, %v1307_v39  ;;  %v2680_v14 = vor.u32 %v1281_v47, %v1279_v41  ;;  %v1287_v52 = vrot.slane %v1285_v37, 1  ;;  %v1763_v54 = vcombine.low %v1225_v45, %v1226_v53  ;;  %1828 = vmatpush3.bf16.msra.mxu1 %v1910_v57  ;;  %v1912_v49 = vld [vmem:[%s2805_s4 + $0x18] sm:$0xff]  }
 0x1cd   : > { %1311 = vrot.lane.b32.xlu1 %v1308_v38, %s1963_s20  ;;  %v1275_v12 = vor.u32 %v1274_v44, %v1270_v40  ;;  %v1765_v60 = vcombine.low %v2636_v0, %v2665_v18  ;;  %v1337_v55 = vshrl.u32 %v1764_v13, 16  ;;  %v1339_v56 = vshll.u32 %v1764_v13, 16  ;;  %1829 = vmatprep.subr.bf16.mxu1 %v1911_v30 }
 0x1ce   : > { %v1310_v26 = vsel %vm2866_vm2, %v1307_v39, %v1309_v7  ;;  %vm2867_vm0 = vsmask.f32 7424  ;;  %v1766_v6 = vcombine.low %v1227_v3, %v1227_v3  ;;  %v1229_v48 = vsel %vm2195_vm12, %v1228_v1, 0  ;;  %v1240_v39 = vld [vmem:[#allocation3 + $0x8] sm:$0xe] }
 0x1cf   : > { %v1288_v42 = vsel %vm2867_vm0, %v2680_v14, %v1287_v52  ;;  %vm2868_vm13 = vmmov %vm2867_vm0  ;;  %v1341_v34 = vrot.slane %v1339_v56, 1  ;;  %v1344_v46 = vshll.u32 %v1765_v60, 16  ;;  %v1348_v63 = vshrl.u32 %v1765_v60, 16 }
 0x1d0   : > { %v1280_v58 = vsel %vm2868_vm13, %v1275_v12, %v1279_v41  ;;  %v1352_v2 = vshll.u32 %v1766_v6, 16  ;;  %vm2869_vm7 = vcmp.ne.s16.totalorder %v2211_v22, 0  ;;  %vm2870_vm11 = vcmp.ne.s16.totalorder %v2225_v27, 0  ;;  %vm2872_vm2 = vmmov %vm2867_vm0  ;;  %1830 = vmatpush3.bf16.msra.mxu1 %v1911_v30 }
 0x1d1   : > { %1289 = vrot.lane.b32.xlu0 %v1280_v58, %s1957_s9  ;;  %1313 = vrot.lane.b32.xlu1 %v1310_v26, %s1963_s20  ;;  %v1230_v33 = vsel %vm2869_vm7, %v2634_v50, 0  ;;  %v1231_v5 = vsel %vm2870_vm11, %v2636_v0, 0  ;;  %vm2871_vm5 = vcmp.ne.s16.totalorder %v2172_v62, 0  ;;  %v1342_v9 = vor.u32 %v1341_v34, %v1337_v55  ;;  %s1967_s20 = smov 56  }
 0x1d2   : > { %v1232_v8 = vsel %vm2871_vm5, %v2665_v18, 0  ;;  %v1346_v10 = vrot.slane %v1344_v46, 1  ;;  %v1767_v11 = vcombine.low %v1229_v48, %v1230_v33  ;;  %v1354_v16 = vrot.slane %v1352_v2, 1  ;;  %1831 = vmatprep.subr.bf16.mxu1 %v1912_v49 }
 0x1d3   : > { %v1768_v31 = vcombine.low %v1231_v5, %v1232_v8  ;;  %v1233_v19 = vsel %vm1216_vm15, %v1227_v3, 0  ;;  %v1235_v28 = vsel %vm2268_vm14, %v2634_v50, 0  ;;  %v1236_v41 = vsel %vm2247_vm6, %v2636_v0, 0 }
 0x1d4   : > { %v1350_v61 = vor.u32 %v1348_v63, %v1346_v10  ;;  %v1373_v36 = vrot.slane %v1767_v11, 1  ;;  %v1769_v47 = vcombine.low %v1233_v19, %v1233_v19  ;;  %v1347_v40 = vsel %vm2872_vm2, %v1342_v9, %v1346_v10  ;;  %1832 = vmatpush3.bf16.msra.mxu1 %v1912_v49 }
 0x1d5   : > { %v1374_v29 = vrot.slane %v1768_v31, 1  ;;  %1291 = vrot.lane.b32.xlu0 %v1288_v42, %s1957_s9  ;;  %1327 = vrot.lane.b32.xlu1 %v1763_v54, %s1956_s8  ;;  %v1772_v25 = vcombine.low %v2665_v18, %v1234_v24  ;;  %v1237_v45 = vsel %vm2190_vm10, %v2665_v18, 0  ;;  %v1238_v3 = vsel %vm2205_vm1, %v1234_v24, 0 }
 0x1d6   : > { %v1355_v23 = vsel %vm2867_vm0, %v1350_v61, %v1354_v16  ;;  %v1376_v37 = vrot.slane %v1769_v47, 1  ;;  %v1773_v38 = vcombine.low %v1239_v20, %v1239_v20  ;;  %vm2873_vm13 = vcmask 1046528  }
 0x1d7   : > { %v1375_v44 = vsel %vm2873_vm13, %v1373_v36, %v1374_v29  ;;  %v1403_v53 = vshll.u32 %v1772_v25, 16  ;;  %v1241_v13 = vsel %vm2195_vm12, %v1240_v39, 0  ;;  %v1242_v1 = vsel %vm2869_vm7, %v2636_v0, 0  ;;  %vm2874_vm11 = vmmov %vm2873_vm13 }
 0x1d8   : > { %v1377_v51 = vsel %vm2874_vm11, %v1374_v29, %v1376_v37  ;;  %v1407_v7 = vshrl.u32 %v1772_v25, 16  ;;  %vm2875_vm5 = vcmp.ne.s16.totalorder %v2225_v27, 0  ;;  %vm2876_vm2 = vcmp.ne.s16.totalorder %v2172_v62, 0 }
 0x1d9   : > { %1356 = vrot.lane.b32.xlu0 %v1347_v40, %s1959_s11  ;;  %1358 = vrot.lane.b32.xlu1 %v1355_v23, %s1959_s11  ;;  %v1243_v52 = vsel %vm2875_vm5, %v2665_v18, 0  ;;  %v1244_v17 = vsel %vm2876_vm2, %v1234_v24, 0  ;;  %v1405_v54 = vrot.slane %v1403_v53, 1  ;;  %v1411_v12 = vshll.u32 %v1773_v38, 16  ;;  %v1913_v18 = vld [vmem:[%s2805_s4 + $0x20] ss:$0 sps:$4 sm:$0xff]  }
 0x1da   : > { %v1211_v22 = vsel %vm2247_vm6, %v2632_v32, 0  ;;  %v1210_v60 = vsel %vm2268_vm14, %v2655_v59, 0  ;;  %v1245_v55 = vsel %vm1216_vm15, %v1239_v20, 0  ;;  %v1770_v56 = vcombine.low %v1235_v28, %v1236_v41  ;;  %s1965_s11 = smov 40   ;;  %vm2878_vm6 = vmmov %vm2867_vm0  ;;  %v1784_v53 = vld [vmem:[%s2806_s5] ss:$0 sm:$0xff] }
 0x1db   : > { %v1754_v27 = vcombine.low %v1210_v60, %v1211_v22  ;;  %v1212_v62 = vsel %vm2190_vm10, %v2634_v50, 0  ;;  %v1771_v35 = vcombine.low %v1237_v45, %v1238_v3  ;;  %v1774_v43 = vcombine.low %v1241_v13, %v1242_v1  ;;  %vm2877_vm10 = vmmov %vm2867_vm0  ;;  %v1785_v1 = vld [vmem:[%s2807_s6] ss:$0 sm:$0xff] }
 0x1dc   : > { %v1775_v32 = vcombine.low %v1243_v52, %v1244_v17  ;;  %v1213_v4 = vsel %vm2205_vm1, %v2636_v0, 0  ;;  %v1409_v59 = vor.u32 %v1407_v7, %v1405_v54  ;;  %v1413_v26 = vrot.slane %v1411_v12, 1  ;;  %vm2879_vm1 = vmmov %vm2874_vm11 }
 0x1dd   : > { %1378 = vrot.lane.b32.xlu0 %v1375_v44, %s1965_s11  ;;  %1380 = vrot.lane.b32.xlu1 %v1377_v51, %s1965_s11  ;;  %v1776_v42 = vcombine.low %v1245_v55, %v1245_v55  ;;  %v1755_v6 = vcombine.low %v1212_v62, %v1213_v4  ;;  %vm1520_vm12 = vcmask 1043456   ;;  %v1432_v50 = vrot.slane %v1774_v43, 1  ;;  %vm2880_vm14 = vmmov %vm2879_vm1 }
 0x1de   : > { %1839 = vmatprep.subr.msk.bf16.mxu1 %vm1520_vm12, %v1913_v18  ;;  %v1522_v15 = vsel %vm1520_vm12, %v1913_v18, 0  ;;  %v1406_v48 = vsel %vm2877_vm10, %v2680_v14, %v1405_v54  ;;  %v1414_v57 = vsel %vm2878_vm6, %v1409_v59, %v1413_v26  ;;  %v1433_v58 = vrot.slane %v1775_v32, 1 }
 0x1df   : > { %v1435_v34 = vrot.slane %v1776_v42, 1  ;;  %1834 = vmatpush3.bf16.msra.mxu1 %v1522_v15  ;;  %vm1459_vm15 = vcmask 326656   ;;  %vm1464_vm0 = vcmask 392192   ;;  %vm1469_vm13 = vcmask 457728  }
 0x1e0   : > { %v1434_v21 = vsel %vm2879_vm1, %v1432_v50, %v1433_v58  ;;  %vm1474_vm7 = vcmask 523264   ;;  %vm1515_vm11 = vcmask 588800  }
 0x1e1   : > { %1392 = vrot.lane.b32.xlu0 %v1770_v56, %s1966_s19  ;;  %1394 = vrot.lane.b32.xlu1 %v1771_v35, %s1966_s19  ;;  %v1436_v0 = vsel %vm2880_vm14, %v1433_v58, %v1435_v34 }
 0x1e5   : > { %1415 = vrot.lane.b32.xlu0 %v1406_v48, %s1967_s20  ;;  %1417 = vrot.lane.b32.xlu1 %v1414_v57, %s1967_s20 }
 0x1e9   : > { %1437 = vrot.lane.b32.xlu0 %v1434_v21, %s1968_s21  ;;  %1439 = vrot.lane.b32.xlu1 %v1436_v0, %s1968_s21 }
 0x239   : > { %v1326_v46 = vpop.permute.xlu0 %1325 }
 0x23f   : > { %v1312_v63 = vpop.permute.xlu1 %1311 }
 0x243   : > { %v1290_v30 = vpop.permute.xlu0 %1289  ;;  %v1314_v2 = vpop.permute.xlu1 %1313 }
 0x244   : > { %v1443_v11 = vsel %vm923_vm4, %v1754_v27, %v1290_v30 }
 0x245   : > { %v1448_v24 = vsel %vm937_vm9, %v1443_v11, %v1312_v63 }
 0x246   : > { %v1452_v29 = vsel %vm951_vm3, %v1448_v24, %v1326_v46 }
 0x247   : > { %v1292_v14 = vpop.permute.xlu0 %1291  ;;  %v1328_v33 = vpop.permute.xlu1 %1327 }
 0x248   : > { %v1446_v31 = vsel %vm923_vm4, %v1755_v6, %v1292_v14 }
 0x249   : > { %v1450_v61 = vsel %vm937_vm9, %v1446_v31, %v1314_v2 }
 0x24a   : > { %v1454_v36 = vsel %vm951_vm3, %v1450_v61, %v1328_v33 }
 0x24b   : > { %v1357_v5 = vpop.permute.xlu0 %1356  ;;  %v1359_v8 = vpop.permute.xlu1 %1358 }
 0x24c   : > { %v1456_v47 = vsel %vm965_vm8, %v1452_v29, %v1357_v5  ;;  %v1458_v28 = vsel %vm965_vm8, %v1454_v36, %v1359_v8 }
 0x24f   : > { %v1379_v9 = vpop.permute.xlu0 %1378  ;;  %v1381_v10 = vpop.permute.xlu1 %1380 }
 0x250   : > { %v1461_v39 = vsel %vm1459_vm15, %v1456_v47, %v1379_v9  ;;  %v1463_v40 = vsel %vm1459_vm15, %v1458_v28, %v1381_v10 }
 0x253   : > { %v1393_v16 = vpop.permute.xlu0 %1392  ;;  %v1395_v19 = vpop.permute.xlu1 %1394 }
 0x254   : > { %v1466_v23 = vsel %vm1464_vm0, %v1461_v39, %v1393_v16  ;;  %v1468_v41 = vsel %vm1464_vm0, %v1463_v40, %v1395_v19 }
 0x257   : > { %v1416_v20 = vpop.permute.xlu0 %1415  ;;  %v1418_v49 = vpop.permute.xlu1 %1417 }
 0x258   : > { %v1471_v25 = vsel %vm1469_vm13, %v1466_v23, %v1416_v20  ;;  %v1473_v37 = vsel %vm1469_vm13, %v1468_v41, %v1418_v49 }
 0x25b   : > { %v1438_v45 = vpop.permute.xlu0 %1437  ;;  %v1440_v3 = vpop.permute.xlu1 %1439 }
 0x25c   : > { %v1478_v38 = vsel %vm1474_vm7, %v1473_v37, %v1440_v3  ;;  %v1476_v44 = vsel %vm1474_vm7, %v1471_v25, %v1438_v45 }
 0x25d   : > { %1835 = vmatprep.mubr.msk.bf16.mxu1 %vm1515_vm11, %v1476_v44 }
 0x25e   : > { %1836 = vmatmul.mubr.msk.bf16.vlgmr.msra.gmra.mrb[0].mxu1 %vm1515_vm11, %v1478_v38 }
 0x331   : > { %v1837_v13 = vpop.f32.mrb[0].mxu1 }
 0x332   : > { %v1582_v51 = vmul.f32 %v1837_v13, %v1784_v53  ;;  %v1558_v7 = vpop.f32.mrb[1].mxu1 }
 0x333   : > { %v1580_v52 = vmul.f32 %v1784_v53, %v1558_v7  ;;  %v1838_v17 = vpop.f32.mrb[2].mxu1 }
 0x334   : > { %v1593_v54 = vadd.f32 %v1785_v1, %v1582_v51  ;;  %v1583_v12 = vmul.f32 %v1838_v17, %v1784_v53  ;;  %v1561_v22 = vpop.f32.mrb[3].mxu1 }
 0x335   : > { %v1591_v60 = vadd.f32 %v1785_v1, %v1580_v52  ;;  %v1581_v55 = vmul.f32 %v1784_v53, %v1561_v22 }
 0x336   : > { %v1597_v56 = vmax.f32 %v1593_v54, 0.0  ;;  %v1594_v27 = vadd.f32 %v1785_v1, %v1583_v12 }
 0x337   : > { %v1595_v62 = vmax.f32 %v1591_v60, 0.0  ;;  %v1592_v18 = vadd.f32 %v1785_v1, %v1581_v55 }
 0x338   : > { %1601 = vst.msk [vmem:[%s2119_s23 + $0x10] sm:$0xff] %vm923_vm4, %v1597_v56  ;;  %v1598_v35 = vmax.f32 %v1594_v27, 0.0 }
 0x339   : > { %1599 = vst.msk [vmem:[%s2119_s23] sm:$0xff] %vm923_vm4, %v1595_v62  ;;  %v1596_v43 = vmax.f32 %v1592_v18, 0.0 }
 0x33a   : > { %1602 = vst.msk [vmem:[%s2119_s23 + $0x18] sm:$0xff] %vm923_vm4, %v1598_v35 }
 0x33b   : > { %1600 = vst.msk [vmem:[%s2119_s23 + $0x8] sm:$0xff] %vm923_vm4, %v1596_v43 }
 0x33c PF: > { %s17_s28 = sadd.s32 1, %s1952_s28   ;;  %s2881_s24 = smov %s1944_s26 }
 0x33d   : > { %p14_p10 = scmp.ge.s32.totalorder %s17_s28, 6   ;;  %s2882_s25 = smov %s1948_s27 }
 0x33e   : > { %s2883_s26 = smov %s2886_s29  ;;  %s2884_s27 = smov %s2890_s30 }
 0x33f   :  { %16 = sbr.rel (!%p14_p10) target bundleno = 3 (0x3), region = 86 }

</bundles_post_ra>
